<compile_context>
chip_gen: v5e
topology: v5e:2x2
jax: 0.10.0
libtpu: 0.0.40
codegen_flags: <defaults>
</compile_context>

<pallas_src>
import jax
import jax.numpy as jnp
from jax.experimental import pallas as pl
from jax.experimental.pallas import tpu as pltpu


def _round_up(x: int, m: int) -> int:
    return ((x + m - 1) // m) * m


# ---------------------------------------------------------------------------
# Encoder kernel: one grid step scores a lane-aligned tile of TN pairs.
# Orientation: pair axis (TN) on lanes, features (vocab / hidden) on sublanes.
# ---------------------------------------------------------------------------
def _make_encoder_kernel(vchunk: int):
    def encoder_kernel(idsT_ref, tblT_ref, w1T_ref, b1_ref, w2_ref, b2_ref,
                       logits_ref, counts_ref):
        vp, tn = counts_ref.shape          # (padded vocab, pair tile)
        seq_len = idsT_ref.shape[0]
        n_chunks = vp // vchunk

        # --- token-count histogram, chunked register accumulation ------------
        # Each vocab chunk is accumulated in registers over the fully-unrolled
        # token loop and stored to VMEM exactly once (one vst per chunk instead
        # of L full read-modify-writes of the whole (Vp, TN) tile).
        base_iota = jax.lax.broadcasted_iota(jnp.int32, (vchunk, tn), 0)
        for c in range(n_chunks):                       # static unroll (small)
            chunk_iota = base_iota + c * vchunk
            cnt = jnp.zeros((vchunk, tn), jnp.float32)
            for l in range(seq_len):                    # static unroll over tokens
                ids_row = idsT_ref[pl.ds(l, 1), :]      # (1, TN) int32, sentinel = -1
                cnt = cnt + (chunk_iota == ids_row).astype(jnp.float32)
            # counts <= seq_len, exact in bf16; halves histogram VMEM + store bytes.
            counts_ref[pl.ds(c * vchunk, vchunk), :] = cnt.astype(jnp.bfloat16)

        # --- per-pair valid-token count (mask stream eliminated) -------------
        valid = jnp.sum((idsT_ref[...] >= 0).astype(jnp.float32),
                        axis=0, keepdims=True)                       # (1, TN)
        inv_len = pl.reciprocal(jnp.maximum(valid, 1.0), approx=True)  # EUP

        # --- masked mean pooling as a native bf16 MXU matmul ------------------
        pooled = jnp.dot(tblT_ref[...], counts_ref[...],
                         preferred_element_type=jnp.float32)          # (Hp, TN) f32
        pooled = pooled * inv_len

        # --- 2-layer classification head --------------------------------------
        h = jnp.dot(w1T_ref[...], pooled.astype(jnp.bfloat16),
                    preferred_element_type=jnp.float32) + b1_ref[...]  # (Hp, TN)
        h = jnp.maximum(h, 0.0)

        # Single logit per pair: VPU multiply + sublane reduce (avoids a
        # degenerate 1-column MXU matmul); lane-dense (1, TN) write.
        logits = jnp.sum(h * w2_ref[...], axis=0, keepdims=True) + b2_ref[0, 0]
        logits_ref[...] = logits

    return encoder_kernel


# ---------------------------------------------------------------------------
# Wrapper == Reranker.forward
# ---------------------------------------------------------------------------
def reranker_forward(batch, params, n_passages, *, row_tile=256, vocab_chunk=32):
    input_ids = batch["input_ids"].astype(jnp.int32)        # (N, L), N = B * P
    mask = batch["attention_mask"]                           # (N, L)
    labels = batch["labels"].astype(jnp.int32)               # (B,)

    N, L = input_ids.shape
    V, H = params["emb_table"].shape

    if row_tile % 128 != 0:
        raise ValueError("row_tile must be a multiple of the 128-lane width")
    if vocab_chunk % 8 != 0:
        raise ValueError("vocab_chunk must be a multiple of 8 sublanes")

    TN = row_tile
    Npad = _round_up(N, TN)               # pair axis padded to the tile size
    Hp = _round_up(H, 128)                # hidden padded to lane width
    Vp = _round_up(V, vocab_chunk)        # vocab padded to the chunk size

    # Layout plumbing (tiny, once in JAX): pair axis -> lanes.
    # Masked / padded positions get sentinel -1 (never matches the >=0 iota),
    # so the attention-mask stream is not needed inside the kernel.
    ids_masked = jnp.where(mask != 0, input_ids, -1)
    idsT = jnp.full((Npad, L), -1, jnp.int32).at[:N].set(ids_masked).T       # (L, Npad)

    # Weights transposed + zero-padded; table & W1 in bf16 for native MXU passes.
    tblT = jnp.zeros((Hp, Vp), jnp.bfloat16).at[:H, :V].set(
        params["emb_table"].astype(jnp.bfloat16).T)                          # (Hp, Vp)
    w1T = jnp.zeros((Hp, Hp), jnp.bfloat16).at[:H, :H].set(
        params["w1"].astype(jnp.bfloat16).T)                                 # (Hp, Hp)
    b1c = jnp.zeros((Hp, 1), jnp.float32).at[:H, 0].set(
        params["b1"].astype(jnp.float32).reshape(-1))                        # (Hp, 1)
    w2c = jnp.zeros((Hp, 1), jnp.float32).at[:H, 0].set(
        params["w2"].astype(jnp.float32).reshape(-1))                        # (Hp, 1)
    b2 = params["b2"].astype(jnp.float32).reshape(1, 1)                      # (1, 1) SMEM

    grid = (Npad // TN,)
    cost = pl.CostEstimate(
        flops=int(2 * Npad * Vp * Hp + 2 * Npad * Hp * Hp + Npad * L * Vp),
        transcendentals=0,
        bytes_accessed=int(4 * idsT.size + 2 * (tblT.size + w1T.size) + 4 * Npad),
    )

    logits_row = pl.pallas_call(
        _make_encoder_kernel(vocab_chunk),
        out_shape=jax.ShapeDtypeStruct((1, Npad), jnp.float32),
        grid=grid,
        in_specs=[
            pl.BlockSpec((L, TN), lambda i: (0, i)),             # ids tile (streamed)
            pl.BlockSpec(memory_space=pltpu.MemorySpace.VMEM),   # emb_table^T, single-buffered
            pl.BlockSpec(memory_space=pltpu.MemorySpace.VMEM),   # w1^T
            pl.BlockSpec(memory_space=pltpu.MemorySpace.VMEM),   # b1 column
            pl.BlockSpec(memory_space=pltpu.MemorySpace.VMEM),   # w2 column
            pl.BlockSpec(memory_space=pltpu.MemorySpace.SMEM),   # b2 scalar
        ],
        out_specs=pl.BlockSpec((1, TN), lambda i: (0, i)),       # lane-dense logits
        scratch_shapes=[pltpu.VMEM((Vp, TN), jnp.bfloat16)],     # token-count histogram
        compiler_params=pltpu.CompilerParams(
            dimension_semantics=("parallel",),                   # shard tiles across TCs
            vmem_limit_bytes=32 * 1024 * 1024,
        ),
        cost_estimate=cost,
    )(idsT, tblT, w1T, b1c, w2c, b2)

    # outputs.logits = outputs.logits.view(-1, train_n_passages)
    logits = logits_row[0, :N].reshape(-1, n_passages)           # (B, P)

    # nn.CrossEntropyLoss(reduction='mean') on a few-KB array: plain JAX.
    logp = jax.nn.log_softmax(logits, axis=-1)
    loss = -jnp.mean(jnp.take_along_axis(logp, labels[:, None], axis=-1)[:, 0])
    return logits, loss


# ---------------------------------------------------------------------------
# Pure-JAX reference (for correctness check)
# ---------------------------------------------------------------------------
def reranker_forward_ref(batch, params, n_passages):
    emb = jnp.take(params["emb_table"].astype(jnp.float32), batch["input_ids"], axis=0)
    mask = batch["attention_mask"].astype(jnp.float32)
    pooled = (emb * mask[:, :, None]).sum(1) / jnp.maximum(mask.sum(1, keepdims=True), 1.0)
    h = jnp.maximum(
        jnp.dot(pooled, params["w1"], precision=jax.lax.Precision.HIGHEST)
        + params["b1"], 0.0)
    logits = (jnp.dot(h, params["w2"], precision=jax.lax.Precision.HIGHEST)
              + params["b2"]).reshape(-1, n_passages)
    labels = batch["labels"].astype(jnp.int32)
    lse = jax.nn.logsumexp(logits, axis=-1)
    tgt = jnp.take_along_axis(logits, labels[:, None], axis=-1)[:, 0]
    return logits, jnp.mean(lse - tgt)


if __name__ == "__main__":
    # Small synthetic cross-encoder: B queries x P passages, short sequences.
    # row_tile=128 keeps the test tiny while still giving a 2-step parallel grid.
    B, P, L, H, VOCAB = 40, 4, 16, 32, 203
    N = B * P

    key = jax.random.PRNGKey(0)
    k_emb, k_w1, k_b1, k_w2, k_b2, k_ids, k_len, k_lab = jax.random.split(key, 8)

    params = {
        "emb_table": jax.random.normal(k_emb, (VOCAB, H), jnp.float32) * 0.05,
        "w1": jax.random.normal(k_w1, (H, H), jnp.float32) * 0.1,
        "b1": jax.random.normal(k_b1, (1, H), jnp.float32) * 0.01,
        "w2": jax.random.normal(k_w2, (H, 1), jnp.float32) * 0.1,
        "b2": jax.random.normal(k_b2, (1, 1), jnp.float32) * 0.01,
    }

    input_ids = jax.random.randint(k_ids, (N, L), 0, VOCAB, dtype=jnp.int32)
    lens = jax.random.randint(k_len, (N, 1), 4, L + 1, dtype=jnp.int32)
    attention_mask = (jnp.arange(L, dtype=jnp.int32)[None, :] < lens).astype(jnp.int32)
    labels = jax.random.randint(k_lab, (B,), 0, P, dtype=jnp.int32)

    batch = {"input_ids": input_ids, "attention_mask": attention_mask, "labels": labels}

    logits, loss = reranker_forward(batch, params, n_passages=P, row_tile=128)
    jax.block_until_ready((logits, loss))

    logits_ref, loss_ref = reranker_forward_ref(batch, params, n_passages=P)
    # bf16 MXU passes + approx reciprocal vs f32-HIGHEST reference.
    assert jnp.allclose(logits, logits_ref, atol=5e-3, rtol=5e-3), "logits mismatch"
    assert jnp.allclose(loss, loss_ref, atol=5e-3, rtol=5e-3), "loss mismatch"

    print("KERNEL_OK")
</pallas_src>

<mosaic_0001>
module attributes {stable_mosaic.version = 11 : i64} {
  func.func @encoder_kernel(%arg0: i32, %arg1: memref<16x128xi32, #tpu.memory_space<vmem>>, %arg2: memref<128x224xbf16, #tpu.memory_space<vmem>>, %arg3: memref<128x128xbf16, #tpu.memory_space<vmem>>, %arg4: memref<128x1xf32, #tpu.memory_space<vmem>>, %arg5: memref<128x1xf32, #tpu.memory_space<vmem>>, %arg6: memref<1x1xf32, #tpu.memory_space<smem>>, %arg7: memref<1x128xf32, #tpu.memory_space<vmem>>, %arg8: memref<224x128xbf16, #tpu.memory_space<vmem>>) attributes {dimension_semantics = [#tpu.dimension_semantics<parallel>], iteration_bounds = array<i64: 2>, scalar_prefetch = 0 : i64, scratch_operands = 1 : i64, tpu.core_type = #tpu.core_type<tc>, window_params = [{transform_indices = @transform_0, window_bounds = array<i64: 16, 128>}, {pipeline_mode = #tpu.pipeline_mode<synchronous>, transform_indices = @transform_1, window_bounds = array<i64: 128, 224>}, {pipeline_mode = #tpu.pipeline_mode<synchronous>, transform_indices = @transform_2, window_bounds = array<i64: 128, 128>}, {pipeline_mode = #tpu.pipeline_mode<synchronous>, transform_indices = @transform_3, window_bounds = array<i64: 128, 1>}, {pipeline_mode = #tpu.pipeline_mode<synchronous>, transform_indices = @transform_4, window_bounds = array<i64: 128, 1>}, {transform_indices = @transform_5, window_bounds = array<i64: 1, 1>}, {transform_indices = @transform_6, window_bounds = array<i64: 1, 128>}]} {
    %0 = tpu.iota {dimensions = array<i32: 0>} : vector<32x128xi32>
    %c0_i32 = arith.constant 0 : i32
    %1 = vector.broadcast %c0_i32 : i32 to vector<32x128xi32>
    %2 = arith.addi %0, %1 : vector<32x128xi32>
    %cst = arith.constant 0.000000e+00 : f32
    %3 = vector.broadcast %cst : f32 to vector<32x128xf32>
    %c0 = arith.constant 0 : index
    %c0_0 = arith.constant 0 : index
    %4 = vector.load %arg1[%c0, %c0_0] : memref<16x128xi32, #tpu.memory_space<vmem>>, vector<1x128xi32>
    %5 = vector.broadcast %4 : vector<1x128xi32> to vector<32x128xi32>
    %6 = arith.cmpi eq, %2, %5 : vector<32x128xi32>
    %7 = arith.extui %6 : vector<32x128xi1> to vector<32x128xi32>
    %8 = arith.sitofp %7 : vector<32x128xi32> to vector<32x128xf32>
    %9 = arith.addf %3, %8 : vector<32x128xf32>
    %c1 = arith.constant 1 : index
    %c0_1 = arith.constant 0 : index
    %10 = vector.load %arg1[%c1, %c0_1] : memref<16x128xi32, #tpu.memory_space<vmem>>, vector<1x128xi32>
    %11 = vector.broadcast %10 : vector<1x128xi32> to vector<32x128xi32>
    %12 = arith.cmpi eq, %2, %11 : vector<32x128xi32>
    %13 = arith.extui %12 : vector<32x128xi1> to vector<32x128xi32>
    %14 = arith.sitofp %13 : vector<32x128xi32> to vector<32x128xf32>
    %15 = arith.addf %9, %14 : vector<32x128xf32>
    %c2 = arith.constant 2 : index
    %c0_2 = arith.constant 0 : index
    %16 = vector.load %arg1[%c2, %c0_2] : memref<16x128xi32, #tpu.memory_space<vmem>>, vector<1x128xi32>
    %17 = vector.broadcast %16 : vector<1x128xi32> to vector<32x128xi32>
    %18 = arith.cmpi eq, %2, %17 : vector<32x128xi32>
    %19 = arith.extui %18 : vector<32x128xi1> to vector<32x128xi32>
    %20 = arith.sitofp %19 : vector<32x128xi32> to vector<32x128xf32>
    %21 = arith.addf %15, %20 : vector<32x128xf32>
    %c3 = arith.constant 3 : index
    %c0_3 = arith.constant 0 : index
    %22 = vector.load %arg1[%c3, %c0_3] : memref<16x128xi32, #tpu.memory_space<vmem>>, vector<1x128xi32>
    %23 = vector.broadcast %22 : vector<1x128xi32> to vector<32x128xi32>
    %24 = arith.cmpi eq, %2, %23 : vector<32x128xi32>
    %25 = arith.extui %24 : vector<32x128xi1> to vector<32x128xi32>
    %26 = arith.sitofp %25 : vector<32x128xi32> to vector<32x128xf32>
    %27 = arith.addf %21, %26 : vector<32x128xf32>
    %c4 = arith.constant 4 : index
    %c0_4 = arith.constant 0 : index
    %28 = vector.load %arg1[%c4, %c0_4] : memref<16x128xi32, #tpu.memory_space<vmem>>, vector<1x128xi32>
    %29 = vector.broadcast %28 : vector<1x128xi32> to vector<32x128xi32>
    %30 = arith.cmpi eq, %2, %29 : vector<32x128xi32>
    %31 = arith.extui %30 : vector<32x128xi1> to vector<32x128xi32>
    %32 = arith.sitofp %31 : vector<32x128xi32> to vector<32x128xf32>
    %33 = arith.addf %27, %32 : vector<32x128xf32>
    %c5 = arith.constant 5 : index
    %c0_5 = arith.constant 0 : index
    %34 = vector.load %arg1[%c5, %c0_5] : memref<16x128xi32, #tpu.memory_space<vmem>>, vector<1x128xi32>
    %35 = vector.broadcast %34 : vector<1x128xi32> to vector<32x128xi32>
    %36 = arith.cmpi eq, %2, %35 : vector<32x128xi32>
    %37 = arith.extui %36 : vector<32x128xi1> to vector<32x128xi32>
    %38 = arith.sitofp %37 : vector<32x128xi32> to vector<32x128xf32>
    %39 = arith.addf %33, %38 : vector<32x128xf32>
    %c6 = arith.constant 6 : index
    %c0_6 = arith.constant 0 : index
    %40 = vector.load %arg1[%c6, %c0_6] : memref<16x128xi32, #tpu.memory_space<vmem>>, vector<1x128xi32>
    %41 = vector.broadcast %40 : vector<1x128xi32> to vector<32x128xi32>
    %42 = arith.cmpi eq, %2, %41 : vector<32x128xi32>
    %43 = arith.extui %42 : vector<32x128xi1> to vector<32x128xi32>
    %44 = arith.sitofp %43 : vector<32x128xi32> to vector<32x128xf32>
    %45 = arith.addf %39, %44 : vector<32x128xf32>
    %c7 = arith.constant 7 : index
    %c0_7 = arith.constant 0 : index
    %46 = vector.load %arg1[%c7, %c0_7] : memref<16x128xi32, #tpu.memory_space<vmem>>, vector<1x128xi32>
    %47 = vector.broadcast %46 : vector<1x128xi32> to vector<32x128xi32>
    %48 = arith.cmpi eq, %2, %47 : vector<32x128xi32>
    %49 = arith.extui %48 : vector<32x128xi1> to vector<32x128xi32>
    %50 = arith.sitofp %49 : vector<32x128xi32> to vector<32x128xf32>
    %51 = arith.addf %45, %50 : vector<32x128xf32>
    %c8 = arith.constant 8 : index
    %c0_8 = arith.constant 0 : index
    %52 = vector.load %arg1[%c8, %c0_8] : memref<16x128xi32, #tpu.memory_space<vmem>>, vector<1x128xi32>
    %53 = vector.broadcast %52 : vector<1x128xi32> to vector<32x128xi32>
    %54 = arith.cmpi eq, %2, %53 : vector<32x128xi32>
    %55 = arith.extui %54 : vector<32x128xi1> to vector<32x128xi32>
    %56 = arith.sitofp %55 : vector<32x128xi32> to vector<32x128xf32>
    %57 = arith.addf %51, %56 : vector<32x128xf32>
    %c9 = arith.constant 9 : index
    %c0_9 = arith.constant 0 : index
    %58 = vector.load %arg1[%c9, %c0_9] : memref<16x128xi32, #tpu.memory_space<vmem>>, vector<1x128xi32>
    %59 = vector.broadcast %58 : vector<1x128xi32> to vector<32x128xi32>
    %60 = arith.cmpi eq, %2, %59 : vector<32x128xi32>
    %61 = arith.extui %60 : vector<32x128xi1> to vector<32x128xi32>
    %62 = arith.sitofp %61 : vector<32x128xi32> to vector<32x128xf32>
    %63 = arith.addf %57, %62 : vector<32x128xf32>
    %c10 = arith.constant 10 : index
    %c0_10 = arith.constant 0 : index
    %64 = vector.load %arg1[%c10, %c0_10] : memref<16x128xi32, #tpu.memory_space<vmem>>, vector<1x128xi32>
    %65 = vector.broadcast %64 : vector<1x128xi32> to vector<32x128xi32>
    %66 = arith.cmpi eq, %2, %65 : vector<32x128xi32>
    %67 = arith.extui %66 : vector<32x128xi1> to vector<32x128xi32>
    %68 = arith.sitofp %67 : vector<32x128xi32> to vector<32x128xf32>
    %69 = arith.addf %63, %68 : vector<32x128xf32>
    %c11 = arith.constant 11 : index
    %c0_11 = arith.constant 0 : index
    %70 = vector.load %arg1[%c11, %c0_11] : memref<16x128xi32, #tpu.memory_space<vmem>>, vector<1x128xi32>
    %71 = vector.broadcast %70 : vector<1x128xi32> to vector<32x128xi32>
    %72 = arith.cmpi eq, %2, %71 : vector<32x128xi32>
    %73 = arith.extui %72 : vector<32x128xi1> to vector<32x128xi32>
    %74 = arith.sitofp %73 : vector<32x128xi32> to vector<32x128xf32>
    %75 = arith.addf %69, %74 : vector<32x128xf32>
    %c12 = arith.constant 12 : index
    %c0_12 = arith.constant 0 : index
    %76 = vector.load %arg1[%c12, %c0_12] : memref<16x128xi32, #tpu.memory_space<vmem>>, vector<1x128xi32>
    %77 = vector.broadcast %76 : vector<1x128xi32> to vector<32x128xi32>
    %78 = arith.cmpi eq, %2, %77 : vector<32x128xi32>
    %79 = arith.extui %78 : vector<32x128xi1> to vector<32x128xi32>
    %80 = arith.sitofp %79 : vector<32x128xi32> to vector<32x128xf32>
    %81 = arith.addf %75, %80 : vector<32x128xf32>
    %c13 = arith.constant 13 : index
    %c0_13 = arith.constant 0 : index
    %82 = vector.load %arg1[%c13, %c0_13] : memref<16x128xi32, #tpu.memory_space<vmem>>, vector<1x128xi32>
    %83 = vector.broadcast %82 : vector<1x128xi32> to vector<32x128xi32>
    %84 = arith.cmpi eq, %2, %83 : vector<32x128xi32>
    %85 = arith.extui %84 : vector<32x128xi1> to vector<32x128xi32>
    %86 = arith.sitofp %85 : vector<32x128xi32> to vector<32x128xf32>
    %87 = arith.addf %81, %86 : vector<32x128xf32>
    %c14 = arith.constant 14 : index
    %c0_14 = arith.constant 0 : index
    %88 = vector.load %arg1[%c14, %c0_14] : memref<16x128xi32, #tpu.memory_space<vmem>>, vector<1x128xi32>
    %89 = vector.broadcast %88 : vector<1x128xi32> to vector<32x128xi32>
    %90 = arith.cmpi eq, %2, %89 : vector<32x128xi32>
    %91 = arith.extui %90 : vector<32x128xi1> to vector<32x128xi32>
    %92 = arith.sitofp %91 : vector<32x128xi32> to vector<32x128xf32>
    %93 = arith.addf %87, %92 : vector<32x128xf32>
    %c15 = arith.constant 15 : index
    %c0_15 = arith.constant 0 : index
    %94 = vector.load %arg1[%c15, %c0_15] : memref<16x128xi32, #tpu.memory_space<vmem>>, vector<1x128xi32>
    %95 = vector.broadcast %94 : vector<1x128xi32> to vector<32x128xi32>
    %96 = arith.cmpi eq, %2, %95 : vector<32x128xi32>
    %97 = arith.extui %96 : vector<32x128xi1> to vector<32x128xi32>
    %98 = arith.sitofp %97 : vector<32x128xi32> to vector<32x128xf32>
    %99 = arith.addf %93, %98 : vector<32x128xf32>
    %100 = arith.truncf %99 : vector<32x128xf32> to vector<32x128xbf16>
    %c0_16 = arith.constant 0 : index
    %c0_17 = arith.constant 0 : index
    %101 = vector.load %arg8[%c0_16, %c0_17] : memref<224x128xbf16, #tpu.memory_space<vmem>>, vector<32x128xbf16>
    tpu.vector_store %arg8[%c0_16, %c0_17], %100 {strides = array<i32>} : memref<224x128xbf16, #tpu.memory_space<vmem>>, vector<32x128xbf16>,
    %c32_i32 = arith.constant 32 : i32
    %102 = vector.broadcast %c32_i32 : i32 to vector<32x128xi32>
    %103 = arith.addi %0, %102 : vector<32x128xi32>
    %cst_18 = arith.constant 0.000000e+00 : f32
    %104 = vector.broadcast %cst_18 : f32 to vector<32x128xf32>
    %c0_19 = arith.constant 0 : index
    %c0_20 = arith.constant 0 : index
    %105 = vector.load %arg1[%c0_19, %c0_20] : memref<16x128xi32, #tpu.memory_space<vmem>>, vector<1x128xi32>
    %106 = vector.broadcast %105 : vector<1x128xi32> to vector<32x128xi32>
    %107 = arith.cmpi eq, %103, %106 : vector<32x128xi32>
    %108 = arith.extui %107 : vector<32x128xi1> to vector<32x128xi32>
    %109 = arith.sitofp %108 : vector<32x128xi32> to vector<32x128xf32>
    %110 = arith.addf %104, %109 : vector<32x128xf32>
    %c1_21 = arith.constant 1 : index
    %c0_22 = arith.constant 0 : index
    %111 = vector.load %arg1[%c1_21, %c0_22] : memref<16x128xi32, #tpu.memory_space<vmem>>, vector<1x128xi32>
    %112 = vector.broadcast %111 : vector<1x128xi32> to vector<32x128xi32>
    %113 = arith.cmpi eq, %103, %112 : vector<32x128xi32>
    %114 = arith.extui %113 : vector<32x128xi1> to vector<32x128xi32>
    %115 = arith.sitofp %114 : vector<32x128xi32> to vector<32x128xf32>
    %116 = arith.addf %110, %115 : vector<32x128xf32>
    %c2_23 = arith.constant 2 : index
    %c0_24 = arith.constant 0 : index
    %117 = vector.load %arg1[%c2_23, %c0_24] : memref<16x128xi32, #tpu.memory_space<vmem>>, vector<1x128xi32>
    %118 = vector.broadcast %117 : vector<1x128xi32> to vector<32x128xi32>
    %119 = arith.cmpi eq, %103, %118 : vector<32x128xi32>
    %120 = arith.extui %119 : vector<32x128xi1> to vector<32x128xi32>
    %121 = arith.sitofp %120 : vector<32x128xi32> to vector<32x128xf32>
    %122 = arith.addf %116, %121 : vector<32x128xf32>
    %c3_25 = arith.constant 3 : index
    %c0_26 = arith.constant 0 : index
    %123 = vector.load %arg1[%c3_25, %c0_26] : memref<16x128xi32, #tpu.memory_space<vmem>>, vector<1x128xi32>
    %124 = vector.broadcast %123 : vector<1x128xi32> to vector<32x128xi32>
    %125 = arith.cmpi eq, %103, %124 : vector<32x128xi32>
    %126 = arith.extui %125 : vector<32x128xi1> to vector<32x128xi32>
    %127 = arith.sitofp %126 : vector<32x128xi32> to vector<32x128xf32>
    %128 = arith.addf %122, %127 : vector<32x128xf32>
    %c4_27 = arith.constant 4 : index
    %c0_28 = arith.constant 0 : index
    %129 = vector.load %arg1[%c4_27, %c0_28] : memref<16x128xi32, #tpu.memory_space<vmem>>, vector<1x128xi32>
    %130 = vector.broadcast %129 : vector<1x128xi32> to vector<32x128xi32>
    %131 = arith.cmpi eq, %103, %130 : vector<32x128xi32>
    %132 = arith.extui %131 : vector<32x128xi1> to vector<32x128xi32>
    %133 = arith.sitofp %132 : vector<32x128xi32> to vector<32x128xf32>
    %134 = arith.addf %128, %133 : vector<32x128xf32>
    %c5_29 = arith.constant 5 : index
    %c0_30 = arith.constant 0 : index
    %135 = vector.load %arg1[%c5_29, %c0_30] : memref<16x128xi32, #tpu.memory_space<vmem>>, vector<1x128xi32>
    %136 = vector.broadcast %135 : vector<1x128xi32> to vector<32x128xi32>
    %137 = arith.cmpi eq, %103, %136 : vector<32x128xi32>
    %138 = arith.extui %137 : vector<32x128xi1> to vector<32x128xi32>
    %139 = arith.sitofp %138 : vector<32x128xi32> to vector<32x128xf32>
    %140 = arith.addf %134, %139 : vector<32x128xf32>
    %c6_31 = arith.constant 6 : index
    %c0_32 = arith.constant 0 : index
    %141 = vector.load %arg1[%c6_31, %c0_32] : memref<16x128xi32, #tpu.memory_space<vmem>>, vector<1x128xi32>
    %142 = vector.broadcast %141 : vector<1x128xi32> to vector<32x128xi32>
    %143 = arith.cmpi eq, %103, %142 : vector<32x128xi32>
    %144 = arith.extui %143 : vector<32x128xi1> to vector<32x128xi32>
    %145 = arith.sitofp %144 : vector<32x128xi32> to vector<32x128xf32>
    %146 = arith.addf %140, %145 : vector<32x128xf32>
    %c7_33 = arith.constant 7 : index
    %c0_34 = arith.constant 0 : index
    %147 = vector.load %arg1[%c7_33, %c0_34] : memref<16x128xi32, #tpu.memory_space<vmem>>, vector<1x128xi32>
    %148 = vector.broadcast %147 : vector<1x128xi32> to vector<32x128xi32>
    %149 = arith.cmpi eq, %103, %148 : vector<32x128xi32>
    %150 = arith.extui %149 : vector<32x128xi1> to vector<32x128xi32>
    %151 = arith.sitofp %150 : vector<32x128xi32> to vector<32x128xf32>
    %152 = arith.addf %146, %151 : vector<32x128xf32>
    %c8_35 = arith.constant 8 : index
    %c0_36 = arith.constant 0 : index
    %153 = vector.load %arg1[%c8_35, %c0_36] : memref<16x128xi32, #tpu.memory_space<vmem>>, vector<1x128xi32>
    %154 = vector.broadcast %153 : vector<1x128xi32> to vector<32x128xi32>
    %155 = arith.cmpi eq, %103, %154 : vector<32x128xi32>
    %156 = arith.extui %155 : vector<32x128xi1> to vector<32x128xi32>
    %157 = arith.sitofp %156 : vector<32x128xi32> to vector<32x128xf32>
    %158 = arith.addf %152, %157 : vector<32x128xf32>
    %c9_37 = arith.constant 9 : index
    %c0_38 = arith.constant 0 : index
    %159 = vector.load %arg1[%c9_37, %c0_38] : memref<16x128xi32, #tpu.memory_space<vmem>>, vector<1x128xi32>
    %160 = vector.broadcast %159 : vector<1x128xi32> to vector<32x128xi32>
    %161 = arith.cmpi eq, %103, %160 : vector<32x128xi32>
    %162 = arith.extui %161 : vector<32x128xi1> to vector<32x128xi32>
    %163 = arith.sitofp %162 : vector<32x128xi32> to vector<32x128xf32>
    %164 = arith.addf %158, %163 : vector<32x128xf32>
    %c10_39 = arith.constant 10 : index
    %c0_40 = arith.constant 0 : index
    %165 = vector.load %arg1[%c10_39, %c0_40] : memref<16x128xi32, #tpu.memory_space<vmem>>, vector<1x128xi32>
    %166 = vector.broadcast %165 : vector<1x128xi32> to vector<32x128xi32>
    %167 = arith.cmpi eq, %103, %166 : vector<32x128xi32>
    %168 = arith.extui %167 : vector<32x128xi1> to vector<32x128xi32>
    %169 = arith.sitofp %168 : vector<32x128xi32> to vector<32x128xf32>
    %170 = arith.addf %164, %169 : vector<32x128xf32>
    %c11_41 = arith.constant 11 : index
    %c0_42 = arith.constant 0 : index
    %171 = vector.load %arg1[%c11_41, %c0_42] : memref<16x128xi32, #tpu.memory_space<vmem>>, vector<1x128xi32>
    %172 = vector.broadcast %171 : vector<1x128xi32> to vector<32x128xi32>
    %173 = arith.cmpi eq, %103, %172 : vector<32x128xi32>
    %174 = arith.extui %173 : vector<32x128xi1> to vector<32x128xi32>
    %175 = arith.sitofp %174 : vector<32x128xi32> to vector<32x128xf32>
    %176 = arith.addf %170, %175 : vector<32x128xf32>
    %c12_43 = arith.constant 12 : index
    %c0_44 = arith.constant 0 : index
    %177 = vector.load %arg1[%c12_43, %c0_44] : memref<16x128xi32, #tpu.memory_space<vmem>>, vector<1x128xi32>
    %178 = vector.broadcast %177 : vector<1x128xi32> to vector<32x128xi32>
    %179 = arith.cmpi eq, %103, %178 : vector<32x128xi32>
    %180 = arith.extui %179 : vector<32x128xi1> to vector<32x128xi32>
    %181 = arith.sitofp %180 : vector<32x128xi32> to vector<32x128xf32>
    %182 = arith.addf %176, %181 : vector<32x128xf32>
    %c13_45 = arith.constant 13 : index
    %c0_46 = arith.constant 0 : index
    %183 = vector.load %arg1[%c13_45, %c0_46] : memref<16x128xi32, #tpu.memory_space<vmem>>, vector<1x128xi32>
    %184 = vector.broadcast %183 : vector<1x128xi32> to vector<32x128xi32>
    %185 = arith.cmpi eq, %103, %184 : vector<32x128xi32>
    %186 = arith.extui %185 : vector<32x128xi1> to vector<32x128xi32>
    %187 = arith.sitofp %186 : vector<32x128xi32> to vector<32x128xf32>
    %188 = arith.addf %182, %187 : vector<32x128xf32>
    %c14_47 = arith.constant 14 : index
    %c0_48 = arith.constant 0 : index
    %189 = vector.load %arg1[%c14_47, %c0_48] : memref<16x128xi32, #tpu.memory_space<vmem>>, vector<1x128xi32>
    %190 = vector.broadcast %189 : vector<1x128xi32> to vector<32x128xi32>
    %191 = arith.cmpi eq, %103, %190 : vector<32x128xi32>
    %192 = arith.extui %191 : vector<32x128xi1> to vector<32x128xi32>
    %193 = arith.sitofp %192 : vector<32x128xi32> to vector<32x128xf32>
    %194 = arith.addf %188, %193 : vector<32x128xf32>
    %c15_49 = arith.constant 15 : index
    %c0_50 = arith.constant 0 : index
    %195 = vector.load %arg1[%c15_49, %c0_50] : memref<16x128xi32, #tpu.memory_space<vmem>>, vector<1x128xi32>
    %196 = vector.broadcast %195 : vector<1x128xi32> to vector<32x128xi32>
    %197 = arith.cmpi eq, %103, %196 : vector<32x128xi32>
    %198 = arith.extui %197 : vector<32x128xi1> to vector<32x128xi32>
    %199 = arith.sitofp %198 : vector<32x128xi32> to vector<32x128xf32>
    %200 = arith.addf %194, %199 : vector<32x128xf32>
    %201 = arith.truncf %200 : vector<32x128xf32> to vector<32x128xbf16>
    %c32 = arith.constant 32 : index
    %c0_51 = arith.constant 0 : index
    %202 = vector.load %arg8[%c32, %c0_51] : memref<224x128xbf16, #tpu.memory_space<vmem>>, vector<32x128xbf16>
    tpu.vector_store %arg8[%c32, %c0_51], %201 {strides = array<i32>} : memref<224x128xbf16, #tpu.memory_space<vmem>>, vector<32x128xbf16>,
    %c64_i32 = arith.constant 64 : i32
    %203 = vector.broadcast %c64_i32 : i32 to vector<32x128xi32>
    %204 = arith.addi %0, %203 : vector<32x128xi32>
    %cst_52 = arith.constant 0.000000e+00 : f32
    %205 = vector.broadcast %cst_52 : f32 to vector<32x128xf32>
    %c0_53 = arith.constant 0 : index
    %c0_54 = arith.constant 0 : index
    %206 = vector.load %arg1[%c0_53, %c0_54] : memref<16x128xi32, #tpu.memory_space<vmem>>, vector<1x128xi32>
    %207 = vector.broadcast %206 : vector<1x128xi32> to vector<32x128xi32>
    %208 = arith.cmpi eq, %204, %207 : vector<32x128xi32>
    %209 = arith.extui %208 : vector<32x128xi1> to vector<32x128xi32>
    %210 = arith.sitofp %209 : vector<32x128xi32> to vector<32x128xf32>
    %211 = arith.addf %205, %210 : vector<32x128xf32>
    %c1_55 = arith.constant 1 : index
    %c0_56 = arith.constant 0 : index
    %212 = vector.load %arg1[%c1_55, %c0_56] : memref<16x128xi32, #tpu.memory_space<vmem>>, vector<1x128xi32>
    %213 = vector.broadcast %212 : vector<1x128xi32> to vector<32x128xi32>
    %214 = arith.cmpi eq, %204, %213 : vector<32x128xi32>
    %215 = arith.extui %214 : vector<32x128xi1> to vector<32x128xi32>
    %216 = arith.sitofp %215 : vector<32x128xi32> to vector<32x128xf32>
    %217 = arith.addf %211, %216 : vector<32x128xf32>
    %c2_57 = arith.constant 2 : index
    %c0_58 = arith.constant 0 : index
    %218 = vector.load %arg1[%c2_57, %c0_58] : memref<16x128xi32, #tpu.memory_space<vmem>>, vector<1x128xi32>
    %219 = vector.broadcast %218 : vector<1x128xi32> to vector<32x128xi32>
    %220 = arith.cmpi eq, %204, %219 : vector<32x128xi32>
    %221 = arith.extui %220 : vector<32x128xi1> to vector<32x128xi32>
    %222 = arith.sitofp %221 : vector<32x128xi32> to vector<32x128xf32>
    %223 = arith.addf %217, %222 : vector<32x128xf32>
    %c3_59 = arith.constant 3 : index
    %c0_60 = arith.constant 0 : index
    %224 = vector.load %arg1[%c3_59, %c0_60] : memref<16x128xi32, #tpu.memory_space<vmem>>, vector<1x128xi32>
    %225 = vector.broadcast %224 : vector<1x128xi32> to vector<32x128xi32>
    %226 = arith.cmpi eq, %204, %225 : vector<32x128xi32>
    %227 = arith.extui %226 : vector<32x128xi1> to vector<32x128xi32>
    %228 = arith.sitofp %227 : vector<32x128xi32> to vector<32x128xf32>
    %229 = arith.addf %223, %228 : vector<32x128xf32>
    %c4_61 = arith.constant 4 : index
    %c0_62 = arith.constant 0 : index
    %230 = vector.load %arg1[%c4_61, %c0_62] : memref<16x128xi32, #tpu.memory_space<vmem>>, vector<1x128xi32>
    %231 = vector.broadcast %230 : vector<1x128xi32> to vector<32x128xi32>
    %232 = arith.cmpi eq, %204, %231 : vector<32x128xi32>
    %233 = arith.extui %232 : vector<32x128xi1> to vector<32x128xi32>
    %234 = arith.sitofp %233 : vector<32x128xi32> to vector<32x128xf32>
    %235 = arith.addf %229, %234 : vector<32x128xf32>
    %c5_63 = arith.constant 5 : index
    %c0_64 = arith.constant 0 : index
    %236 = vector.load %arg1[%c5_63, %c0_64] : memref<16x128xi32, #tpu.memory_space<vmem>>, vector<1x128xi32>
    %237 = vector.broadcast %236 : vector<1x128xi32> to vector<32x128xi32>
    %238 = arith.cmpi eq, %204, %237 : vector<32x128xi32>
    %239 = arith.extui %238 : vector<32x128xi1> to vector<32x128xi32>
    %240 = arith.sitofp %239 : vector<32x128xi32> to vector<32x128xf32>
    %241 = arith.addf %235, %240 : vector<32x128xf32>
    %c6_65 = arith.constant 6 : index
    %c0_66 = arith.constant 0 : index
    %242 = vector.load %arg1[%c6_65, %c0_66] : memref<16x128xi32, #tpu.memory_space<vmem>>, vector<1x128xi32>
    %243 = vector.broadcast %242 : vector<1x128xi32> to vector<32x128xi32>
    %244 = arith.cmpi eq, %204, %243 : vector<32x128xi32>
    %245 = arith.extui %244 : vector<32x128xi1> to vector<32x128xi32>
    %246 = arith.sitofp %245 : vector<32x128xi32> to vector<32x128xf32>
    %247 = arith.addf %241, %246 : vector<32x128xf32>
    %c7_67 = arith.constant 7 : index
    %c0_68 = arith.constant 0 : index
    %248 = vector.load %arg1[%c7_67, %c0_68] : memref<16x128xi32, #tpu.memory_space<vmem>>, vector<1x128xi32>
    %249 = vector.broadcast %248 : vector<1x128xi32> to vector<32x128xi32>
    %250 = arith.cmpi eq, %204, %249 : vector<32x128xi32>
    %251 = arith.extui %250 : vector<32x128xi1> to vector<32x128xi32>
    %252 = arith.sitofp %251 : vector<32x128xi32> to vector<32x128xf32>
    %253 = arith.addf %247, %252 : vector<32x128xf32>
    %c8_69 = arith.constant 8 : index
    %c0_70 = arith.constant 0 : index
    %254 = vector.load %arg1[%c8_69, %c0_70] : memref<16x128xi32, #tpu.memory_space<vmem>>, vector<1x128xi32>
    %255 = vector.broadcast %254 : vector<1x128xi32> to vector<32x128xi32>
    %256 = arith.cmpi eq, %204, %255 : vector<32x128xi32>
    %257 = arith.extui %256 : vector<32x128xi1> to vector<32x128xi32>
    %258 = arith.sitofp %257 : vector<32x128xi32> to vector<32x128xf32>
    %259 = arith.addf %253, %258 : vector<32x128xf32>
    %c9_71 = arith.constant 9 : index
    %c0_72 = arith.constant 0 : index
    %260 = vector.load %arg1[%c9_71, %c0_72] : memref<16x128xi32, #tpu.memory_space<vmem>>, vector<1x128xi32>
    %261 = vector.broadcast %260 : vector<1x128xi32> to vector<32x128xi32>
    %262 = arith.cmpi eq, %204, %261 : vector<32x128xi32>
    %263 = arith.extui %262 : vector<32x128xi1> to vector<32x128xi32>
    %264 = arith.sitofp %263 : vector<32x128xi32> to vector<32x128xf32>
    %265 = arith.addf %259, %264 : vector<32x128xf32>
    %c10_73 = arith.constant 10 : index
    %c0_74 = arith.constant 0 : index
    %266 = vector.load %arg1[%c10_73, %c0_74] : memref<16x128xi32, #tpu.memory_space<vmem>>, vector<1x128xi32>
    %267 = vector.broadcast %266 : vector<1x128xi32> to vector<32x128xi32>
    %268 = arith.cmpi eq, %204, %267 : vector<32x128xi32>
    %269 = arith.extui %268 : vector<32x128xi1> to vector<32x128xi32>
    %270 = arith.sitofp %269 : vector<32x128xi32> to vector<32x128xf32>
    %271 = arith.addf %265, %270 : vector<32x128xf32>
    %c11_75 = arith.constant 11 : index
    %c0_76 = arith.constant 0 : index
    %272 = vector.load %arg1[%c11_75, %c0_76] : memref<16x128xi32, #tpu.memory_space<vmem>>, vector<1x128xi32>
    %273 = vector.broadcast %272 : vector<1x128xi32> to vector<32x128xi32>
    %274 = arith.cmpi eq, %204, %273 : vector<32x128xi32>
    %275 = arith.extui %274 : vector<32x128xi1> to vector<32x128xi32>
    %276 = arith.sitofp %275 : vector<32x128xi32> to vector<32x128xf32>
    %277 = arith.addf %271, %276 : vector<32x128xf32>
    %c12_77 = arith.constant 12 : index
    %c0_78 = arith.constant 0 : index
    %278 = vector.load %arg1[%c12_77, %c0_78] : memref<16x128xi32, #tpu.memory_space<vmem>>, vector<1x128xi32>
    %279 = vector.broadcast %278 : vector<1x128xi32> to vector<32x128xi32>
    %280 = arith.cmpi eq, %204, %279 : vector<32x128xi32>
    %281 = arith.extui %280 : vector<32x128xi1> to vector<32x128xi32>
    %282 = arith.sitofp %281 : vector<32x128xi32> to vector<32x128xf32>
    %283 = arith.addf %277, %282 : vector<32x128xf32>
    %c13_79 = arith.constant 13 : index
    %c0_80 = arith.constant 0 : index
    %284 = vector.load %arg1[%c13_79, %c0_80] : memref<16x128xi32, #tpu.memory_space<vmem>>, vector<1x128xi32>
    %285 = vector.broadcast %284 : vector<1x128xi32> to vector<32x128xi32>
    %286 = arith.cmpi eq, %204, %285 : vector<32x128xi32>
    %287 = arith.extui %286 : vector<32x128xi1> to vector<32x128xi32>
    %288 = arith.sitofp %287 : vector<32x128xi32> to vector<32x128xf32>
    %289 = arith.addf %283, %288 : vector<32x128xf32>
    %c14_81 = arith.constant 14 : index
    %c0_82 = arith.constant 0 : index
    %290 = vector.load %arg1[%c14_81, %c0_82] : memref<16x128xi32, #tpu.memory_space<vmem>>, vector<1x128xi32>
    %291 = vector.broadcast %290 : vector<1x128xi32> to vector<32x128xi32>
    %292 = arith.cmpi eq, %204, %291 : vector<32x128xi32>
    %293 = arith.extui %292 : vector<32x128xi1> to vector<32x128xi32>
    %294 = arith.sitofp %293 : vector<32x128xi32> to vector<32x128xf32>
    %295 = arith.addf %289, %294 : vector<32x128xf32>
    %c15_83 = arith.constant 15 : index
    %c0_84 = arith.constant 0 : index
    %296 = vector.load %arg1[%c15_83, %c0_84] : memref<16x128xi32, #tpu.memory_space<vmem>>, vector<1x128xi32>
    %297 = vector.broadcast %296 : vector<1x128xi32> to vector<32x128xi32>
    %298 = arith.cmpi eq, %204, %297 : vector<32x128xi32>
    %299 = arith.extui %298 : vector<32x128xi1> to vector<32x128xi32>
    %300 = arith.sitofp %299 : vector<32x128xi32> to vector<32x128xf32>
    %301 = arith.addf %295, %300 : vector<32x128xf32>
    %302 = arith.truncf %301 : vector<32x128xf32> to vector<32x128xbf16>
    %c64 = arith.constant 64 : index
    %c0_85 = arith.constant 0 : index
    %303 = vector.load %arg8[%c64, %c0_85] : memref<224x128xbf16, #tpu.memory_space<vmem>>, vector<32x128xbf16>
    tpu.vector_store %arg8[%c64, %c0_85], %302 {strides = array<i32>} : memref<224x128xbf16, #tpu.memory_space<vmem>>, vector<32x128xbf16>,
    %c96_i32 = arith.constant 96 : i32
    %304 = vector.broadcast %c96_i32 : i32 to vector<32x128xi32>
    %305 = arith.addi %0, %304 : vector<32x128xi32>
    %cst_86 = arith.constant 0.000000e+00 : f32
    %306 = vector.broadcast %cst_86 : f32 to vector<32x128xf32>
    %c0_87 = arith.constant 0 : index
    %c0_88 = arith.constant 0 : index
    %307 = vector.load %arg1[%c0_87, %c0_88] : memref<16x128xi32, #tpu.memory_space<vmem>>, vector<1x128xi32>
    %308 = vector.broadcast %307 : vector<1x128xi32> to vector<32x128xi32>
    %309 = arith.cmpi eq, %305, %308 : vector<32x128xi32>
    %310 = arith.extui %309 : vector<32x128xi1> to vector<32x128xi32>
    %311 = arith.sitofp %310 : vector<32x128xi32> to vector<32x128xf32>
    %312 = arith.addf %306, %311 : vector<32x128xf32>
    %c1_89 = arith.constant 1 : index
    %c0_90 = arith.constant 0 : index
    %313 = vector.load %arg1[%c1_89, %c0_90] : memref<16x128xi32, #tpu.memory_space<vmem>>, vector<1x128xi32>
    %314 = vector.broadcast %313 : vector<1x128xi32> to vector<32x128xi32>
    %315 = arith.cmpi eq, %305, %314 : vector<32x128xi32>
    %316 = arith.extui %315 : vector<32x128xi1> to vector<32x128xi32>
    %317 = arith.sitofp %316 : vector<32x128xi32> to vector<32x128xf32>
    %318 = arith.addf %312, %317 : vector<32x128xf32>
    %c2_91 = arith.constant 2 : index
    %c0_92 = arith.constant 0 : index
    %319 = vector.load %arg1[%c2_91, %c0_92] : memref<16x128xi32, #tpu.memory_space<vmem>>, vector<1x128xi32>
    %320 = vector.broadcast %319 : vector<1x128xi32> to vector<32x128xi32>
    %321 = arith.cmpi eq, %305, %320 : vector<32x128xi32>
    %322 = arith.extui %321 : vector<32x128xi1> to vector<32x128xi32>
    %323 = arith.sitofp %322 : vector<32x128xi32> to vector<32x128xf32>
    %324 = arith.addf %318, %323 : vector<32x128xf32>
    %c3_93 = arith.constant 3 : index
    %c0_94 = arith.constant 0 : index
    %325 = vector.load %arg1[%c3_93, %c0_94] : memref<16x128xi32, #tpu.memory_space<vmem>>, vector<1x128xi32>
    %326 = vector.broadcast %325 : vector<1x128xi32> to vector<32x128xi32>
    %327 = arith.cmpi eq, %305, %326 : vector<32x128xi32>
    %328 = arith.extui %327 : vector<32x128xi1> to vector<32x128xi32>
    %329 = arith.sitofp %328 : vector<32x128xi32> to vector<32x128xf32>
    %330 = arith.addf %324, %329 : vector<32x128xf32>
    %c4_95 = arith.constant 4 : index
    %c0_96 = arith.constant 0 : index
    %331 = vector.load %arg1[%c4_95, %c0_96] : memref<16x128xi32, #tpu.memory_space<vmem>>, vector<1x128xi32>
    %332 = vector.broadcast %331 : vector<1x128xi32> to vector<32x128xi32>
    %333 = arith.cmpi eq, %305, %332 : vector<32x128xi32>
    %334 = arith.extui %333 : vector<32x128xi1> to vector<32x128xi32>
    %335 = arith.sitofp %334 : vector<32x128xi32> to vector<32x128xf32>
    %336 = arith.addf %330, %335 : vector<32x128xf32>
    %c5_97 = arith.constant 5 : index
    %c0_98 = arith.constant 0 : index
    %337 = vector.load %arg1[%c5_97, %c0_98] : memref<16x128xi32, #tpu.memory_space<vmem>>, vector<1x128xi32>
    %338 = vector.broadcast %337 : vector<1x128xi32> to vector<32x128xi32>
    %339 = arith.cmpi eq, %305, %338 : vector<32x128xi32>
    %340 = arith.extui %339 : vector<32x128xi1> to vector<32x128xi32>
    %341 = arith.sitofp %340 : vector<32x128xi32> to vector<32x128xf32>
    %342 = arith.addf %336, %341 : vector<32x128xf32>
    %c6_99 = arith.constant 6 : index
    %c0_100 = arith.constant 0 : index
    %343 = vector.load %arg1[%c6_99, %c0_100] : memref<16x128xi32, #tpu.memory_space<vmem>>, vector<1x128xi32>
    %344 = vector.broadcast %343 : vector<1x128xi32> to vector<32x128xi32>
    %345 = arith.cmpi eq, %305, %344 : vector<32x128xi32>
    %346 = arith.extui %345 : vector<32x128xi1> to vector<32x128xi32>
    %347 = arith.sitofp %346 : vector<32x128xi32> to vector<32x128xf32>
    %348 = arith.addf %342, %347 : vector<32x128xf32>
    %c7_101 = arith.constant 7 : index
    %c0_102 = arith.constant 0 : index
    %349 = vector.load %arg1[%c7_101, %c0_102] : memref<16x128xi32, #tpu.memory_space<vmem>>, vector<1x128xi32>
    %350 = vector.broadcast %349 : vector<1x128xi32> to vector<32x128xi32>
    %351 = arith.cmpi eq, %305, %350 : vector<32x128xi32>
    %352 = arith.extui %351 : vector<32x128xi1> to vector<32x128xi32>
    %353 = arith.sitofp %352 : vector<32x128xi32> to vector<32x128xf32>
    %354 = arith.addf %348, %353 : vector<32x128xf32>
    %c8_103 = arith.constant 8 : index
    %c0_104 = arith.constant 0 : index
    %355 = vector.load %arg1[%c8_103, %c0_104] : memref<16x128xi32, #tpu.memory_space<vmem>>, vector<1x128xi32>
    %356 = vector.broadcast %355 : vector<1x128xi32> to vector<32x128xi32>
    %357 = arith.cmpi eq, %305, %356 : vector<32x128xi32>
    %358 = arith.extui %357 : vector<32x128xi1> to vector<32x128xi32>
    %359 = arith.sitofp %358 : vector<32x128xi32> to vector<32x128xf32>
    %360 = arith.addf %354, %359 : vector<32x128xf32>
    %c9_105 = arith.constant 9 : index
    %c0_106 = arith.constant 0 : index
    %361 = vector.load %arg1[%c9_105, %c0_106] : memref<16x128xi32, #tpu.memory_space<vmem>>, vector<1x128xi32>
    %362 = vector.broadcast %361 : vector<1x128xi32> to vector<32x128xi32>
    %363 = arith.cmpi eq, %305, %362 : vector<32x128xi32>
    %364 = arith.extui %363 : vector<32x128xi1> to vector<32x128xi32>
    %365 = arith.sitofp %364 : vector<32x128xi32> to vector<32x128xf32>
    %366 = arith.addf %360, %365 : vector<32x128xf32>
    %c10_107 = arith.constant 10 : index
    %c0_108 = arith.constant 0 : index
    %367 = vector.load %arg1[%c10_107, %c0_108] : memref<16x128xi32, #tpu.memory_space<vmem>>, vector<1x128xi32>
    %368 = vector.broadcast %367 : vector<1x128xi32> to vector<32x128xi32>
    %369 = arith.cmpi eq, %305, %368 : vector<32x128xi32>
    %370 = arith.extui %369 : vector<32x128xi1> to vector<32x128xi32>
    %371 = arith.sitofp %370 : vector<32x128xi32> to vector<32x128xf32>
    %372 = arith.addf %366, %371 : vector<32x128xf32>
    %c11_109 = arith.constant 11 : index
    %c0_110 = arith.constant 0 : index
    %373 = vector.load %arg1[%c11_109, %c0_110] : memref<16x128xi32, #tpu.memory_space<vmem>>, vector<1x128xi32>
    %374 = vector.broadcast %373 : vector<1x128xi32> to vector<32x128xi32>
    %375 = arith.cmpi eq, %305, %374 : vector<32x128xi32>
    %376 = arith.extui %375 : vector<32x128xi1> to vector<32x128xi32>
    %377 = arith.sitofp %376 : vector<32x128xi32> to vector<32x128xf32>
    %378 = arith.addf %372, %377 : vector<32x128xf32>
    %c12_111 = arith.constant 12 : index
    %c0_112 = arith.constant 0 : index
    %379 = vector.load %arg1[%c12_111, %c0_112] : memref<16x128xi32, #tpu.memory_space<vmem>>, vector<1x128xi32>
    %380 = vector.broadcast %379 : vector<1x128xi32> to vector<32x128xi32>
    %381 = arith.cmpi eq, %305, %380 : vector<32x128xi32>
    %382 = arith.extui %381 : vector<32x128xi1> to vector<32x128xi32>
    %383 = arith.sitofp %382 : vector<32x128xi32> to vector<32x128xf32>
    %384 = arith.addf %378, %383 : vector<32x128xf32>
    %c13_113 = arith.constant 13 : index
    %c0_114 = arith.constant 0 : index
    %385 = vector.load %arg1[%c13_113, %c0_114] : memref<16x128xi32, #tpu.memory_space<vmem>>, vector<1x128xi32>
    %386 = vector.broadcast %385 : vector<1x128xi32> to vector<32x128xi32>
    %387 = arith.cmpi eq, %305, %386 : vector<32x128xi32>
    %388 = arith.extui %387 : vector<32x128xi1> to vector<32x128xi32>
    %389 = arith.sitofp %388 : vector<32x128xi32> to vector<32x128xf32>
    %390 = arith.addf %384, %389 : vector<32x128xf32>
    %c14_115 = arith.constant 14 : index
    %c0_116 = arith.constant 0 : index
    %391 = vector.load %arg1[%c14_115, %c0_116] : memref<16x128xi32, #tpu.memory_space<vmem>>, vector<1x128xi32>
    %392 = vector.broadcast %391 : vector<1x128xi32> to vector<32x128xi32>
    %393 = arith.cmpi eq, %305, %392 : vector<32x128xi32>
    %394 = arith.extui %393 : vector<32x128xi1> to vector<32x128xi32>
    %395 = arith.sitofp %394 : vector<32x128xi32> to vector<32x128xf32>
    %396 = arith.addf %390, %395 : vector<32x128xf32>
    %c15_117 = arith.constant 15 : index
    %c0_118 = arith.constant 0 : index
    %397 = vector.load %arg1[%c15_117, %c0_118] : memref<16x128xi32, #tpu.memory_space<vmem>>, vector<1x128xi32>
    %398 = vector.broadcast %397 : vector<1x128xi32> to vector<32x128xi32>
    %399 = arith.cmpi eq, %305, %398 : vector<32x128xi32>
    %400 = arith.extui %399 : vector<32x128xi1> to vector<32x128xi32>
    %401 = arith.sitofp %400 : vector<32x128xi32> to vector<32x128xf32>
    %402 = arith.addf %396, %401 : vector<32x128xf32>
    %403 = arith.truncf %402 : vector<32x128xf32> to vector<32x128xbf16>
    %c96 = arith.constant 96 : index
    %c0_119 = arith.constant 0 : index
    %404 = vector.load %arg8[%c96, %c0_119] : memref<224x128xbf16, #tpu.memory_space<vmem>>, vector<32x128xbf16>
    tpu.vector_store %arg8[%c96, %c0_119], %403 {strides = array<i32>} : memref<224x128xbf16, #tpu.memory_space<vmem>>, vector<32x128xbf16>,
    %c128_i32 = arith.constant 128 : i32
    %405 = vector.broadcast %c128_i32 : i32 to vector<32x128xi32>
    %406 = arith.addi %0, %405 : vector<32x128xi32>
    %cst_120 = arith.constant 0.000000e+00 : f32
    %407 = vector.broadcast %cst_120 : f32 to vector<32x128xf32>
    %c0_121 = arith.constant 0 : index
    %c0_122 = arith.constant 0 : index
    %408 = vector.load %arg1[%c0_121, %c0_122] : memref<16x128xi32, #tpu.memory_space<vmem>>, vector<1x128xi32>
    %409 = vector.broadcast %408 : vector<1x128xi32> to vector<32x128xi32>
    %410 = arith.cmpi eq, %406, %409 : vector<32x128xi32>
    %411 = arith.extui %410 : vector<32x128xi1> to vector<32x128xi32>
    %412 = arith.sitofp %411 : vector<32x128xi32> to vector<32x128xf32>
    %413 = arith.addf %407, %412 : vector<32x128xf32>
    %c1_123 = arith.constant 1 : index
    %c0_124 = arith.constant 0 : index
    %414 = vector.load %arg1[%c1_123, %c0_124] : memref<16x128xi32, #tpu.memory_space<vmem>>, vector<1x128xi32>
    %415 = vector.broadcast %414 : vector<1x128xi32> to vector<32x128xi32>
    %416 = arith.cmpi eq, %406, %415 : vector<32x128xi32>
    %417 = arith.extui %416 : vector<32x128xi1> to vector<32x128xi32>
    %418 = arith.sitofp %417 : vector<32x128xi32> to vector<32x128xf32>
    %419 = arith.addf %413, %418 : vector<32x128xf32>
    %c2_125 = arith.constant 2 : index
    %c0_126 = arith.constant 0 : index
    %420 = vector.load %arg1[%c2_125, %c0_126] : memref<16x128xi32, #tpu.memory_space<vmem>>, vector<1x128xi32>
    %421 = vector.broadcast %420 : vector<1x128xi32> to vector<32x128xi32>
    %422 = arith.cmpi eq, %406, %421 : vector<32x128xi32>
    %423 = arith.extui %422 : vector<32x128xi1> to vector<32x128xi32>
    %424 = arith.sitofp %423 : vector<32x128xi32> to vector<32x128xf32>
    %425 = arith.addf %419, %424 : vector<32x128xf32>
    %c3_127 = arith.constant 3 : index
    %c0_128 = arith.constant 0 : index
    %426 = vector.load %arg1[%c3_127, %c0_128] : memref<16x128xi32, #tpu.memory_space<vmem>>, vector<1x128xi32>
    %427 = vector.broadcast %426 : vector<1x128xi32> to vector<32x128xi32>
    %428 = arith.cmpi eq, %406, %427 : vector<32x128xi32>
    %429 = arith.extui %428 : vector<32x128xi1> to vector<32x128xi32>
    %430 = arith.sitofp %429 : vector<32x128xi32> to vector<32x128xf32>
    %431 = arith.addf %425, %430 : vector<32x128xf32>
    %c4_129 = arith.constant 4 : index
    %c0_130 = arith.constant 0 : index
    %432 = vector.load %arg1[%c4_129, %c0_130] : memref<16x128xi32, #tpu.memory_space<vmem>>, vector<1x128xi32>
    %433 = vector.broadcast %432 : vector<1x128xi32> to vector<32x128xi32>
    %434 = arith.cmpi eq, %406, %433 : vector<32x128xi32>
    %435 = arith.extui %434 : vector<32x128xi1> to vector<32x128xi32>
    %436 = arith.sitofp %435 : vector<32x128xi32> to vector<32x128xf32>
    %437 = arith.addf %431, %436 : vector<32x128xf32>
    %c5_131 = arith.constant 5 : index
    %c0_132 = arith.constant 0 : index
    %438 = vector.load %arg1[%c5_131, %c0_132] : memref<16x128xi32, #tpu.memory_space<vmem>>, vector<1x128xi32>
    %439 = vector.broadcast %438 : vector<1x128xi32> to vector<32x128xi32>
    %440 = arith.cmpi eq, %406, %439 : vector<32x128xi32>
    %441 = arith.extui %440 : vector<32x128xi1> to vector<32x128xi32>
    %442 = arith.sitofp %441 : vector<32x128xi32> to vector<32x128xf32>
    %443 = arith.addf %437, %442 : vector<32x128xf32>
    %c6_133 = arith.constant 6 : index
    %c0_134 = arith.constant 0 : index
    %444 = vector.load %arg1[%c6_133, %c0_134] : memref<16x128xi32, #tpu.memory_space<vmem>>, vector<1x128xi32>
    %445 = vector.broadcast %444 : vector<1x128xi32> to vector<32x128xi32>
    %446 = arith.cmpi eq, %406, %445 : vector<32x128xi32>
    %447 = arith.extui %446 : vector<32x128xi1> to vector<32x128xi32>
    %448 = arith.sitofp %447 : vector<32x128xi32> to vector<32x128xf32>
    %449 = arith.addf %443, %448 : vector<32x128xf32>
    %c7_135 = arith.constant 7 : index
    %c0_136 = arith.constant 0 : index
    %450 = vector.load %arg1[%c7_135, %c0_136] : memref<16x128xi32, #tpu.memory_space<vmem>>, vector<1x128xi32>
    %451 = vector.broadcast %450 : vector<1x128xi32> to vector<32x128xi32>
    %452 = arith.cmpi eq, %406, %451 : vector<32x128xi32>
    %453 = arith.extui %452 : vector<32x128xi1> to vector<32x128xi32>
    %454 = arith.sitofp %453 : vector<32x128xi32> to vector<32x128xf32>
    %455 = arith.addf %449, %454 : vector<32x128xf32>
    %c8_137 = arith.constant 8 : index
    %c0_138 = arith.constant 0 : index
    %456 = vector.load %arg1[%c8_137, %c0_138] : memref<16x128xi32, #tpu.memory_space<vmem>>, vector<1x128xi32>
    %457 = vector.broadcast %456 : vector<1x128xi32> to vector<32x128xi32>
    %458 = arith.cmpi eq, %406, %457 : vector<32x128xi32>
    %459 = arith.extui %458 : vector<32x128xi1> to vector<32x128xi32>
    %460 = arith.sitofp %459 : vector<32x128xi32> to vector<32x128xf32>
    %461 = arith.addf %455, %460 : vector<32x128xf32>
    %c9_139 = arith.constant 9 : index
    %c0_140 = arith.constant 0 : index
    %462 = vector.load %arg1[%c9_139, %c0_140] : memref<16x128xi32, #tpu.memory_space<vmem>>, vector<1x128xi32>
    %463 = vector.broadcast %462 : vector<1x128xi32> to vector<32x128xi32>
    %464 = arith.cmpi eq, %406, %463 : vector<32x128xi32>
    %465 = arith.extui %464 : vector<32x128xi1> to vector<32x128xi32>
    %466 = arith.sitofp %465 : vector<32x128xi32> to vector<32x128xf32>
    %467 = arith.addf %461, %466 : vector<32x128xf32>
    %c10_141 = arith.constant 10 : index
    %c0_142 = arith.constant 0 : index
    %468 = vector.load %arg1[%c10_141, %c0_142] : memref<16x128xi32, #tpu.memory_space<vmem>>, vector<1x128xi32>
    %469 = vector.broadcast %468 : vector<1x128xi32> to vector<32x128xi32>
    %470 = arith.cmpi eq, %406, %469 : vector<32x128xi32>
    %471 = arith.extui %470 : vector<32x128xi1> to vector<32x128xi32>
    %472 = arith.sitofp %471 : vector<32x128xi32> to vector<32x128xf32>
    %473 = arith.addf %467, %472 : vector<32x128xf32>
    %c11_143 = arith.constant 11 : index
    %c0_144 = arith.constant 0 : index
    %474 = vector.load %arg1[%c11_143, %c0_144] : memref<16x128xi32, #tpu.memory_space<vmem>>, vector<1x128xi32>
    %475 = vector.broadcast %474 : vector<1x128xi32> to vector<32x128xi32>
    %476 = arith.cmpi eq, %406, %475 : vector<32x128xi32>
    %477 = arith.extui %476 : vector<32x128xi1> to vector<32x128xi32>
    %478 = arith.sitofp %477 : vector<32x128xi32> to vector<32x128xf32>
    %479 = arith.addf %473, %478 : vector<32x128xf32>
    %c12_145 = arith.constant 12 : index
    %c0_146 = arith.constant 0 : index
    %480 = vector.load %arg1[%c12_145, %c0_146] : memref<16x128xi32, #tpu.memory_space<vmem>>, vector<1x128xi32>
    %481 = vector.broadcast %480 : vector<1x128xi32> to vector<32x128xi32>
    %482 = arith.cmpi eq, %406, %481 : vector<32x128xi32>
    %483 = arith.extui %482 : vector<32x128xi1> to vector<32x128xi32>
    %484 = arith.sitofp %483 : vector<32x128xi32> to vector<32x128xf32>
    %485 = arith.addf %479, %484 : vector<32x128xf32>
    %c13_147 = arith.constant 13 : index
    %c0_148 = arith.constant 0 : index
    %486 = vector.load %arg1[%c13_147, %c0_148] : memref<16x128xi32, #tpu.memory_space<vmem>>, vector<1x128xi32>
    %487 = vector.broadcast %486 : vector<1x128xi32> to vector<32x128xi32>
    %488 = arith.cmpi eq, %406, %487 : vector<32x128xi32>
    %489 = arith.extui %488 : vector<32x128xi1> to vector<32x128xi32>
    %490 = arith.sitofp %489 : vector<32x128xi32> to vector<32x128xf32>
    %491 = arith.addf %485, %490 : vector<32x128xf32>
    %c14_149 = arith.constant 14 : index
    %c0_150 = arith.constant 0 : index
    %492 = vector.load %arg1[%c14_149, %c0_150] : memref<16x128xi32, #tpu.memory_space<vmem>>, vector<1x128xi32>
    %493 = vector.broadcast %492 : vector<1x128xi32> to vector<32x128xi32>
    %494 = arith.cmpi eq, %406, %493 : vector<32x128xi32>
    %495 = arith.extui %494 : vector<32x128xi1> to vector<32x128xi32>
    %496 = arith.sitofp %495 : vector<32x128xi32> to vector<32x128xf32>
    %497 = arith.addf %491, %496 : vector<32x128xf32>
    %c15_151 = arith.constant 15 : index
    %c0_152 = arith.constant 0 : index
    %498 = vector.load %arg1[%c15_151, %c0_152] : memref<16x128xi32, #tpu.memory_space<vmem>>, vector<1x128xi32>
    %499 = vector.broadcast %498 : vector<1x128xi32> to vector<32x128xi32>
    %500 = arith.cmpi eq, %406, %499 : vector<32x128xi32>
    %501 = arith.extui %500 : vector<32x128xi1> to vector<32x128xi32>
    %502 = arith.sitofp %501 : vector<32x128xi32> to vector<32x128xf32>
    %503 = arith.addf %497, %502 : vector<32x128xf32>
    %504 = arith.truncf %503 : vector<32x128xf32> to vector<32x128xbf16>
    %c128 = arith.constant 128 : index
    %c0_153 = arith.constant 0 : index
    %505 = vector.load %arg8[%c128, %c0_153] : memref<224x128xbf16, #tpu.memory_space<vmem>>, vector<32x128xbf16>
    tpu.vector_store %arg8[%c128, %c0_153], %504 {strides = array<i32>} : memref<224x128xbf16, #tpu.memory_space<vmem>>, vector<32x128xbf16>,
    %c160_i32 = arith.constant 160 : i32
    %506 = vector.broadcast %c160_i32 : i32 to vector<32x128xi32>
    %507 = arith.addi %0, %506 : vector<32x128xi32>
    %cst_154 = arith.constant 0.000000e+00 : f32
    %508 = vector.broadcast %cst_154 : f32 to vector<32x128xf32>
    %c0_155 = arith.constant 0 : index
    %c0_156 = arith.constant 0 : index
    %509 = vector.load %arg1[%c0_155, %c0_156] : memref<16x128xi32, #tpu.memory_space<vmem>>, vector<1x128xi32>
    %510 = vector.broadcast %509 : vector<1x128xi32> to vector<32x128xi32>
    %511 = arith.cmpi eq, %507, %510 : vector<32x128xi32>
    %512 = arith.extui %511 : vector<32x128xi1> to vector<32x128xi32>
    %513 = arith.sitofp %512 : vector<32x128xi32> to vector<32x128xf32>
    %514 = arith.addf %508, %513 : vector<32x128xf32>
    %c1_157 = arith.constant 1 : index
    %c0_158 = arith.constant 0 : index
    %515 = vector.load %arg1[%c1_157, %c0_158] : memref<16x128xi32, #tpu.memory_space<vmem>>, vector<1x128xi32>
    %516 = vector.broadcast %515 : vector<1x128xi32> to vector<32x128xi32>
    %517 = arith.cmpi eq, %507, %516 : vector<32x128xi32>
    %518 = arith.extui %517 : vector<32x128xi1> to vector<32x128xi32>
    %519 = arith.sitofp %518 : vector<32x128xi32> to vector<32x128xf32>
    %520 = arith.addf %514, %519 : vector<32x128xf32>
    %c2_159 = arith.constant 2 : index
    %c0_160 = arith.constant 0 : index
    %521 = vector.load %arg1[%c2_159, %c0_160] : memref<16x128xi32, #tpu.memory_space<vmem>>, vector<1x128xi32>
    %522 = vector.broadcast %521 : vector<1x128xi32> to vector<32x128xi32>
    %523 = arith.cmpi eq, %507, %522 : vector<32x128xi32>
    %524 = arith.extui %523 : vector<32x128xi1> to vector<32x128xi32>
    %525 = arith.sitofp %524 : vector<32x128xi32> to vector<32x128xf32>
    %526 = arith.addf %520, %525 : vector<32x128xf32>
    %c3_161 = arith.constant 3 : index
    %c0_162 = arith.constant 0 : index
    %527 = vector.load %arg1[%c3_161, %c0_162] : memref<16x128xi32, #tpu.memory_space<vmem>>, vector<1x128xi32>
    %528 = vector.broadcast %527 : vector<1x128xi32> to vector<32x128xi32>
    %529 = arith.cmpi eq, %507, %528 : vector<32x128xi32>
    %530 = arith.extui %529 : vector<32x128xi1> to vector<32x128xi32>
    %531 = arith.sitofp %530 : vector<32x128xi32> to vector<32x128xf32>
    %532 = arith.addf %526, %531 : vector<32x128xf32>
    %c4_163 = arith.constant 4 : index
    %c0_164 = arith.constant 0 : index
    %533 = vector.load %arg1[%c4_163, %c0_164] : memref<16x128xi32, #tpu.memory_space<vmem>>, vector<1x128xi32>
    %534 = vector.broadcast %533 : vector<1x128xi32> to vector<32x128xi32>
    %535 = arith.cmpi eq, %507, %534 : vector<32x128xi32>
    %536 = arith.extui %535 : vector<32x128xi1> to vector<32x128xi32>
    %537 = arith.sitofp %536 : vector<32x128xi32> to vector<32x128xf32>
    %538 = arith.addf %532, %537 : vector<32x128xf32>
    %c5_165 = arith.constant 5 : index
    %c0_166 = arith.constant 0 : index
    %539 = vector.load %arg1[%c5_165, %c0_166] : memref<16x128xi32, #tpu.memory_space<vmem>>, vector<1x128xi32>
    %540 = vector.broadcast %539 : vector<1x128xi32> to vector<32x128xi32>
    %541 = arith.cmpi eq, %507, %540 : vector<32x128xi32>
    %542 = arith.extui %541 : vector<32x128xi1> to vector<32x128xi32>
    %543 = arith.sitofp %542 : vector<32x128xi32> to vector<32x128xf32>
    %544 = arith.addf %538, %543 : vector<32x128xf32>
    %c6_167 = arith.constant 6 : index
    %c0_168 = arith.constant 0 : index
    %545 = vector.load %arg1[%c6_167, %c0_168] : memref<16x128xi32, #tpu.memory_space<vmem>>, vector<1x128xi32>
    %546 = vector.broadcast %545 : vector<1x128xi32> to vector<32x128xi32>
    %547 = arith.cmpi eq, %507, %546 : vector<32x128xi32>
    %548 = arith.extui %547 : vector<32x128xi1> to vector<32x128xi32>
    %549 = arith.sitofp %548 : vector<32x128xi32> to vector<32x128xf32>
    %550 = arith.addf %544, %549 : vector<32x128xf32>
    %c7_169 = arith.constant 7 : index
    %c0_170 = arith.constant 0 : index
    %551 = vector.load %arg1[%c7_169, %c0_170] : memref<16x128xi32, #tpu.memory_space<vmem>>, vector<1x128xi32>
    %552 = vector.broadcast %551 : vector<1x128xi32> to vector<32x128xi32>
    %553 = arith.cmpi eq, %507, %552 : vector<32x128xi32>
    %554 = arith.extui %553 : vector<32x128xi1> to vector<32x128xi32>
    %555 = arith.sitofp %554 : vector<32x128xi32> to vector<32x128xf32>
    %556 = arith.addf %550, %555 : vector<32x128xf32>
    %c8_171 = arith.constant 8 : index
    %c0_172 = arith.constant 0 : index
    %557 = vector.load %arg1[%c8_171, %c0_172] : memref<16x128xi32, #tpu.memory_space<vmem>>, vector<1x128xi32>
    %558 = vector.broadcast %557 : vector<1x128xi32> to vector<32x128xi32>
    %559 = arith.cmpi eq, %507, %558 : vector<32x128xi32>
    %560 = arith.extui %559 : vector<32x128xi1> to vector<32x128xi32>
    %561 = arith.sitofp %560 : vector<32x128xi32> to vector<32x128xf32>
    %562 = arith.addf %556, %561 : vector<32x128xf32>
    %c9_173 = arith.constant 9 : index
    %c0_174 = arith.constant 0 : index
    %563 = vector.load %arg1[%c9_173, %c0_174] : memref<16x128xi32, #tpu.memory_space<vmem>>, vector<1x128xi32>
    %564 = vector.broadcast %563 : vector<1x128xi32> to vector<32x128xi32>
    %565 = arith.cmpi eq, %507, %564 : vector<32x128xi32>
    %566 = arith.extui %565 : vector<32x128xi1> to vector<32x128xi32>
    %567 = arith.sitofp %566 : vector<32x128xi32> to vector<32x128xf32>
    %568 = arith.addf %562, %567 : vector<32x128xf32>
    %c10_175 = arith.constant 10 : index
    %c0_176 = arith.constant 0 : index
    %569 = vector.load %arg1[%c10_175, %c0_176] : memref<16x128xi32, #tpu.memory_space<vmem>>, vector<1x128xi32>
    %570 = vector.broadcast %569 : vector<1x128xi32> to vector<32x128xi32>
    %571 = arith.cmpi eq, %507, %570 : vector<32x128xi32>
    %572 = arith.extui %571 : vector<32x128xi1> to vector<32x128xi32>
    %573 = arith.sitofp %572 : vector<32x128xi32> to vector<32x128xf32>
    %574 = arith.addf %568, %573 : vector<32x128xf32>
    %c11_177 = arith.constant 11 : index
    %c0_178 = arith.constant 0 : index
    %575 = vector.load %arg1[%c11_177, %c0_178] : memref<16x128xi32, #tpu.memory_space<vmem>>, vector<1x128xi32>
    %576 = vector.broadcast %575 : vector<1x128xi32> to vector<32x128xi32>
    %577 = arith.cmpi eq, %507, %576 : vector<32x128xi32>
    %578 = arith.extui %577 : vector<32x128xi1> to vector<32x128xi32>
    %579 = arith.sitofp %578 : vector<32x128xi32> to vector<32x128xf32>
    %580 = arith.addf %574, %579 : vector<32x128xf32>
    %c12_179 = arith.constant 12 : index
    %c0_180 = arith.constant 0 : index
    %581 = vector.load %arg1[%c12_179, %c0_180] : memref<16x128xi32, #tpu.memory_space<vmem>>, vector<1x128xi32>
    %582 = vector.broadcast %581 : vector<1x128xi32> to vector<32x128xi32>
    %583 = arith.cmpi eq, %507, %582 : vector<32x128xi32>
    %584 = arith.extui %583 : vector<32x128xi1> to vector<32x128xi32>
    %585 = arith.sitofp %584 : vector<32x128xi32> to vector<32x128xf32>
    %586 = arith.addf %580, %585 : vector<32x128xf32>
    %c13_181 = arith.constant 13 : index
    %c0_182 = arith.constant 0 : index
    %587 = vector.load %arg1[%c13_181, %c0_182] : memref<16x128xi32, #tpu.memory_space<vmem>>, vector<1x128xi32>
    %588 = vector.broadcast %587 : vector<1x128xi32> to vector<32x128xi32>
    %589 = arith.cmpi eq, %507, %588 : vector<32x128xi32>
    %590 = arith.extui %589 : vector<32x128xi1> to vector<32x128xi32>
    %591 = arith.sitofp %590 : vector<32x128xi32> to vector<32x128xf32>
    %592 = arith.addf %586, %591 : vector<32x128xf32>
    %c14_183 = arith.constant 14 : index
    %c0_184 = arith.constant 0 : index
    %593 = vector.load %arg1[%c14_183, %c0_184] : memref<16x128xi32, #tpu.memory_space<vmem>>, vector<1x128xi32>
    %594 = vector.broadcast %593 : vector<1x128xi32> to vector<32x128xi32>
    %595 = arith.cmpi eq, %507, %594 : vector<32x128xi32>
    %596 = arith.extui %595 : vector<32x128xi1> to vector<32x128xi32>
    %597 = arith.sitofp %596 : vector<32x128xi32> to vector<32x128xf32>
    %598 = arith.addf %592, %597 : vector<32x128xf32>
    %c15_185 = arith.constant 15 : index
    %c0_186 = arith.constant 0 : index
    %599 = vector.load %arg1[%c15_185, %c0_186] : memref<16x128xi32, #tpu.memory_space<vmem>>, vector<1x128xi32>
    %600 = vector.broadcast %599 : vector<1x128xi32> to vector<32x128xi32>
    %601 = arith.cmpi eq, %507, %600 : vector<32x128xi32>
    %602 = arith.extui %601 : vector<32x128xi1> to vector<32x128xi32>
    %603 = arith.sitofp %602 : vector<32x128xi32> to vector<32x128xf32>
    %604 = arith.addf %598, %603 : vector<32x128xf32>
    %605 = arith.truncf %604 : vector<32x128xf32> to vector<32x128xbf16>
    %c160 = arith.constant 160 : index
    %c0_187 = arith.constant 0 : index
    %606 = vector.load %arg8[%c160, %c0_187] : memref<224x128xbf16, #tpu.memory_space<vmem>>, vector<32x128xbf16>
    tpu.vector_store %arg8[%c160, %c0_187], %605 {strides = array<i32>} : memref<224x128xbf16, #tpu.memory_space<vmem>>, vector<32x128xbf16>,
    %c192_i32 = arith.constant 192 : i32
    %607 = vector.broadcast %c192_i32 : i32 to vector<32x128xi32>
    %608 = arith.addi %0, %607 : vector<32x128xi32>
    %cst_188 = arith.constant 0.000000e+00 : f32
    %609 = vector.broadcast %cst_188 : f32 to vector<32x128xf32>
    %c0_189 = arith.constant 0 : index
    %c0_190 = arith.constant 0 : index
    %610 = vector.load %arg1[%c0_189, %c0_190] : memref<16x128xi32, #tpu.memory_space<vmem>>, vector<1x128xi32>
    %611 = vector.broadcast %610 : vector<1x128xi32> to vector<32x128xi32>
    %612 = arith.cmpi eq, %608, %611 : vector<32x128xi32>
    %613 = arith.extui %612 : vector<32x128xi1> to vector<32x128xi32>
    %614 = arith.sitofp %613 : vector<32x128xi32> to vector<32x128xf32>
    %615 = arith.addf %609, %614 : vector<32x128xf32>
    %c1_191 = arith.constant 1 : index
    %c0_192 = arith.constant 0 : index
    %616 = vector.load %arg1[%c1_191, %c0_192] : memref<16x128xi32, #tpu.memory_space<vmem>>, vector<1x128xi32>
    %617 = vector.broadcast %616 : vector<1x128xi32> to vector<32x128xi32>
    %618 = arith.cmpi eq, %608, %617 : vector<32x128xi32>
    %619 = arith.extui %618 : vector<32x128xi1> to vector<32x128xi32>
    %620 = arith.sitofp %619 : vector<32x128xi32> to vector<32x128xf32>
    %621 = arith.addf %615, %620 : vector<32x128xf32>
    %c2_193 = arith.constant 2 : index
    %c0_194 = arith.constant 0 : index
    %622 = vector.load %arg1[%c2_193, %c0_194] : memref<16x128xi32, #tpu.memory_space<vmem>>, vector<1x128xi32>
    %623 = vector.broadcast %622 : vector<1x128xi32> to vector<32x128xi32>
    %624 = arith.cmpi eq, %608, %623 : vector<32x128xi32>
    %625 = arith.extui %624 : vector<32x128xi1> to vector<32x128xi32>
    %626 = arith.sitofp %625 : vector<32x128xi32> to vector<32x128xf32>
    %627 = arith.addf %621, %626 : vector<32x128xf32>
    %c3_195 = arith.constant 3 : index
    %c0_196 = arith.constant 0 : index
    %628 = vector.load %arg1[%c3_195, %c0_196] : memref<16x128xi32, #tpu.memory_space<vmem>>, vector<1x128xi32>
    %629 = vector.broadcast %628 : vector<1x128xi32> to vector<32x128xi32>
    %630 = arith.cmpi eq, %608, %629 : vector<32x128xi32>
    %631 = arith.extui %630 : vector<32x128xi1> to vector<32x128xi32>
    %632 = arith.sitofp %631 : vector<32x128xi32> to vector<32x128xf32>
    %633 = arith.addf %627, %632 : vector<32x128xf32>
    %c4_197 = arith.constant 4 : index
    %c0_198 = arith.constant 0 : index
    %634 = vector.load %arg1[%c4_197, %c0_198] : memref<16x128xi32, #tpu.memory_space<vmem>>, vector<1x128xi32>
    %635 = vector.broadcast %634 : vector<1x128xi32> to vector<32x128xi32>
    %636 = arith.cmpi eq, %608, %635 : vector<32x128xi32>
    %637 = arith.extui %636 : vector<32x128xi1> to vector<32x128xi32>
    %638 = arith.sitofp %637 : vector<32x128xi32> to vector<32x128xf32>
    %639 = arith.addf %633, %638 : vector<32x128xf32>
    %c5_199 = arith.constant 5 : index
    %c0_200 = arith.constant 0 : index
    %640 = vector.load %arg1[%c5_199, %c0_200] : memref<16x128xi32, #tpu.memory_space<vmem>>, vector<1x128xi32>
    %641 = vector.broadcast %640 : vector<1x128xi32> to vector<32x128xi32>
    %642 = arith.cmpi eq, %608, %641 : vector<32x128xi32>
    %643 = arith.extui %642 : vector<32x128xi1> to vector<32x128xi32>
    %644 = arith.sitofp %643 : vector<32x128xi32> to vector<32x128xf32>
    %645 = arith.addf %639, %644 : vector<32x128xf32>
    %c6_201 = arith.constant 6 : index
    %c0_202 = arith.constant 0 : index
    %646 = vector.load %arg1[%c6_201, %c0_202] : memref<16x128xi32, #tpu.memory_space<vmem>>, vector<1x128xi32>
    %647 = vector.broadcast %646 : vector<1x128xi32> to vector<32x128xi32>
    %648 = arith.cmpi eq, %608, %647 : vector<32x128xi32>
    %649 = arith.extui %648 : vector<32x128xi1> to vector<32x128xi32>
    %650 = arith.sitofp %649 : vector<32x128xi32> to vector<32x128xf32>
    %651 = arith.addf %645, %650 : vector<32x128xf32>
    %c7_203 = arith.constant 7 : index
    %c0_204 = arith.constant 0 : index
    %652 = vector.load %arg1[%c7_203, %c0_204] : memref<16x128xi32, #tpu.memory_space<vmem>>, vector<1x128xi32>
    %653 = vector.broadcast %652 : vector<1x128xi32> to vector<32x128xi32>
    %654 = arith.cmpi eq, %608, %653 : vector<32x128xi32>
    %655 = arith.extui %654 : vector<32x128xi1> to vector<32x128xi32>
    %656 = arith.sitofp %655 : vector<32x128xi32> to vector<32x128xf32>
    %657 = arith.addf %651, %656 : vector<32x128xf32>
    %c8_205 = arith.constant 8 : index
    %c0_206 = arith.constant 0 : index
    %658 = vector.load %arg1[%c8_205, %c0_206] : memref<16x128xi32, #tpu.memory_space<vmem>>, vector<1x128xi32>
    %659 = vector.broadcast %658 : vector<1x128xi32> to vector<32x128xi32>
    %660 = arith.cmpi eq, %608, %659 : vector<32x128xi32>
    %661 = arith.extui %660 : vector<32x128xi1> to vector<32x128xi32>
    %662 = arith.sitofp %661 : vector<32x128xi32> to vector<32x128xf32>
    %663 = arith.addf %657, %662 : vector<32x128xf32>
    %c9_207 = arith.constant 9 : index
    %c0_208 = arith.constant 0 : index
    %664 = vector.load %arg1[%c9_207, %c0_208] : memref<16x128xi32, #tpu.memory_space<vmem>>, vector<1x128xi32>
    %665 = vector.broadcast %664 : vector<1x128xi32> to vector<32x128xi32>
    %666 = arith.cmpi eq, %608, %665 : vector<32x128xi32>
    %667 = arith.extui %666 : vector<32x128xi1> to vector<32x128xi32>
    %668 = arith.sitofp %667 : vector<32x128xi32> to vector<32x128xf32>
    %669 = arith.addf %663, %668 : vector<32x128xf32>
    %c10_209 = arith.constant 10 : index
    %c0_210 = arith.constant 0 : index
    %670 = vector.load %arg1[%c10_209, %c0_210] : memref<16x128xi32, #tpu.memory_space<vmem>>, vector<1x128xi32>
    %671 = vector.broadcast %670 : vector<1x128xi32> to vector<32x128xi32>
    %672 = arith.cmpi eq, %608, %671 : vector<32x128xi32>
    %673 = arith.extui %672 : vector<32x128xi1> to vector<32x128xi32>
    %674 = arith.sitofp %673 : vector<32x128xi32> to vector<32x128xf32>
    %675 = arith.addf %669, %674 : vector<32x128xf32>
    %c11_211 = arith.constant 11 : index
    %c0_212 = arith.constant 0 : index
    %676 = vector.load %arg1[%c11_211, %c0_212] : memref<16x128xi32, #tpu.memory_space<vmem>>, vector<1x128xi32>
    %677 = vector.broadcast %676 : vector<1x128xi32> to vector<32x128xi32>
    %678 = arith.cmpi eq, %608, %677 : vector<32x128xi32>
    %679 = arith.extui %678 : vector<32x128xi1> to vector<32x128xi32>
    %680 = arith.sitofp %679 : vector<32x128xi32> to vector<32x128xf32>
    %681 = arith.addf %675, %680 : vector<32x128xf32>
    %c12_213 = arith.constant 12 : index
    %c0_214 = arith.constant 0 : index
    %682 = vector.load %arg1[%c12_213, %c0_214] : memref<16x128xi32, #tpu.memory_space<vmem>>, vector<1x128xi32>
    %683 = vector.broadcast %682 : vector<1x128xi32> to vector<32x128xi32>
    %684 = arith.cmpi eq, %608, %683 : vector<32x128xi32>
    %685 = arith.extui %684 : vector<32x128xi1> to vector<32x128xi32>
    %686 = arith.sitofp %685 : vector<32x128xi32> to vector<32x128xf32>
    %687 = arith.addf %681, %686 : vector<32x128xf32>
    %c13_215 = arith.constant 13 : index
    %c0_216 = arith.constant 0 : index
    %688 = vector.load %arg1[%c13_215, %c0_216] : memref<16x128xi32, #tpu.memory_space<vmem>>, vector<1x128xi32>
    %689 = vector.broadcast %688 : vector<1x128xi32> to vector<32x128xi32>
    %690 = arith.cmpi eq, %608, %689 : vector<32x128xi32>
    %691 = arith.extui %690 : vector<32x128xi1> to vector<32x128xi32>
    %692 = arith.sitofp %691 : vector<32x128xi32> to vector<32x128xf32>
    %693 = arith.addf %687, %692 : vector<32x128xf32>
    %c14_217 = arith.constant 14 : index
    %c0_218 = arith.constant 0 : index
    %694 = vector.load %arg1[%c14_217, %c0_218] : memref<16x128xi32, #tpu.memory_space<vmem>>, vector<1x128xi32>
    %695 = vector.broadcast %694 : vector<1x128xi32> to vector<32x128xi32>
    %696 = arith.cmpi eq, %608, %695 : vector<32x128xi32>
    %697 = arith.extui %696 : vector<32x128xi1> to vector<32x128xi32>
    %698 = arith.sitofp %697 : vector<32x128xi32> to vector<32x128xf32>
    %699 = arith.addf %693, %698 : vector<32x128xf32>
    %c15_219 = arith.constant 15 : index
    %c0_220 = arith.constant 0 : index
    %700 = vector.load %arg1[%c15_219, %c0_220] : memref<16x128xi32, #tpu.memory_space<vmem>>, vector<1x128xi32>
    %701 = vector.broadcast %700 : vector<1x128xi32> to vector<32x128xi32>
    %702 = arith.cmpi eq, %608, %701 : vector<32x128xi32>
    %703 = arith.extui %702 : vector<32x128xi1> to vector<32x128xi32>
    %704 = arith.sitofp %703 : vector<32x128xi32> to vector<32x128xf32>
    %705 = arith.addf %699, %704 : vector<32x128xf32>
    %706 = arith.truncf %705 : vector<32x128xf32> to vector<32x128xbf16>
    %c192 = arith.constant 192 : index
    %c0_221 = arith.constant 0 : index
    %707 = vector.load %arg8[%c192, %c0_221] : memref<224x128xbf16, #tpu.memory_space<vmem>>, vector<32x128xbf16>
    tpu.vector_store %arg8[%c192, %c0_221], %706 {strides = array<i32>} : memref<224x128xbf16, #tpu.memory_space<vmem>>, vector<32x128xbf16>,
    %c0_222 = arith.constant 0 : index
    %c0_223 = arith.constant 0 : index
    %708 = vector.load %arg1[%c0_222, %c0_223] : memref<16x128xi32, #tpu.memory_space<vmem>>, vector<16x128xi32>
    %c0_i32_224 = arith.constant 0 : i32
    %709 = vector.broadcast %c0_i32_224 : i32 to vector<16x128xi32>
    %710 = arith.cmpi sge, %708, %709 : vector<16x128xi32>
    %711 = arith.extui %710 : vector<16x128xi1> to vector<16x128xi32>
    %712 = arith.sitofp %711 : vector<16x128xi32> to vector<16x128xf32>
    %cst_225 = arith.constant dense<0.000000e+00> : vector<128xf32>
    %713 = vector.multi_reduction <add>, %712, %cst_225 [0] : vector<16x128xf32> to vector<128xf32>
    %714 = vector.shape_cast %713 : vector<128xf32> to vector<1x128xf32>
    %cst_226 = arith.constant 1.000000e+00 : f32
    %715 = vector.broadcast %cst_226 : f32 to vector<1x128xf32>
    %716 = arith.maximumf %714, %715 : vector<1x128xf32>
    %717 = tpu.reciprocal %716 {approx = true} : vector<1x128xf32> -> vector<1x128xf32>
    %c0_227 = arith.constant 0 : index
    %c0_228 = arith.constant 0 : index
    %718 = vector.load %arg2[%c0_227, %c0_228] : memref<128x224xbf16, #tpu.memory_space<vmem>>, vector<128x224xbf16>
    %c0_229 = arith.constant 0 : index
    %c0_230 = arith.constant 0 : index
    %719 = vector.load %arg8[%c0_229, %c0_230] : memref<224x128xbf16, #tpu.memory_space<vmem>>, vector<224x128xbf16>
    %cst_231 = arith.constant dense<0.000000e+00> : vector<128x128xf32>
    %720 = tpu.matmul %718, %719, %cst_231 {dimension_numbers = #tpu.dot_dimension_numbers<[1], [0], [0], [1], [0, 0, 1, 1], [], []>} : vector<128x224xbf16>, vector<224x128xbf16>, vector<128x128xf32> -> vector<128x128xf32>
    %721 = vector.broadcast %717 : vector<1x128xf32> to vector<128x128xf32>
    %722 = arith.mulf %720, %721 : vector<128x128xf32>
    %c0_232 = arith.constant 0 : index
    %c0_233 = arith.constant 0 : index
    %723 = vector.load %arg3[%c0_232, %c0_233] : memref<128x128xbf16, #tpu.memory_space<vmem>>, vector<128x128xbf16>
    %724 = arith.truncf %722 : vector<128x128xf32> to vector<128x128xbf16>
    %cst_234 = arith.constant dense<0.000000e+00> : vector<128x128xf32>
    %725 = tpu.matmul %723, %724, %cst_234 {dimension_numbers = #tpu.dot_dimension_numbers<[1], [0], [0], [1], [0, 0, 1, 1], [], []>} : vector<128x128xbf16>, vector<128x128xbf16>, vector<128x128xf32> -> vector<128x128xf32>
    %c0_235 = arith.constant 0 : index
    %c0_236 = arith.constant 0 : index
    %726 = vector.load %arg4[%c0_235, %c0_236] : memref<128x1xf32, #tpu.memory_space<vmem>>, vector<128x1xf32>
    %727 = vector.broadcast %726 : vector<128x1xf32> to vector<128x128xf32>
    %728 = arith.addf %725, %727 : vector<128x128xf32>
    %cst_237 = arith.constant 0.000000e+00 : f32
    %729 = vector.broadcast %cst_237 : f32 to vector<128x128xf32>
    %730 = arith.maximumf %728, %729 : vector<128x128xf32>
    %c0_238 = arith.constant 0 : index
    %c0_239 = arith.constant 0 : index
    %731 = vector.load %arg5[%c0_238, %c0_239] : memref<128x1xf32, #tpu.memory_space<vmem>>, vector<128x1xf32>
    %732 = vector.broadcast %731 : vector<128x1xf32> to vector<128x128xf32>
    %733 = arith.mulf %730, %732 : vector<128x128xf32>
    %cst_240 = arith.constant dense<0.000000e+00> : vector<128xf32>
    %734 = vector.multi_reduction <add>, %733, %cst_240 [0] : vector<128x128xf32> to vector<128xf32>
    %735 = vector.shape_cast %734 : vector<128xf32> to vector<1x128xf32>
    %c0_241 = arith.constant 0 : index
    %c0_242 = arith.constant 0 : index
    %736 = memref.load %arg6[%c0_241, %c0_242] : memref<1x1xf32, #tpu.memory_space<smem>>
    %737 = vector.broadcast %736 : f32 to vector<1x128xf32>
    %738 = arith.addf %735, %737 : vector<1x128xf32>
    %c0_243 = arith.constant 0 : index
    %c0_244 = arith.constant 0 : index
    %739 = vector.load %arg7[%c0_243, %c0_244] : memref<1x128xf32, #tpu.memory_space<vmem>>, vector<1x128xf32>
    tpu.vector_store %arg7[%c0_243, %c0_244], %738 {strides = array<i32>} : memref<1x128xf32, #tpu.memory_space<vmem>>, vector<1x128xf32>,
    return
  }
  func.func @transform_0(%arg0: i32) -> (i32, i32) {
    %c0_i32 = arith.constant 0 : i32
    %c0_i32_0 = arith.constant 0 : i32
    return %c0_i32, %arg0 : i32, i32
  }
  func.func @transform_1(%arg0: i32) -> (i32, i32) {
    %c0_i32 = arith.constant 0 : i32
    %c0_i32_0 = arith.constant 0 : i32
    %c0_i32_1 = arith.constant 0 : i32
    return %c0_i32, %c0_i32_0 : i32, i32
  }
  func.func @transform_2(%arg0: i32) -> (i32, i32) {
    %c0_i32 = arith.constant 0 : i32
    %c0_i32_0 = arith.constant 0 : i32
    %c0_i32_1 = arith.constant 0 : i32
    return %c0_i32, %c0_i32_0 : i32, i32
  }
  func.func @transform_3(%arg0: i32) -> (i32, i32) {
    %c0_i32 = arith.constant 0 : i32
    %c0_i32_0 = arith.constant 0 : i32
    %c0_i32_1 = arith.constant 0 : i32
    return %c0_i32, %c0_i32_0 : i32, i32
  }
  func.func @transform_4(%arg0: i32) -> (i32, i32) {
    %c0_i32 = arith.constant 0 : i32
    %c0_i32_0 = arith.constant 0 : i32
    %c0_i32_1 = arith.constant 0 : i32
    return %c0_i32, %c0_i32_0 : i32, i32
  }
  func.func @transform_5(%arg0: i32) -> (i32, i32) {
    %c0_i32 = arith.constant 0 : i32
    %c0_i32_0 = arith.constant 0 : i32
    %c0_i32_1 = arith.constant 0 : i32
    return %c0_i32, %c0_i32_0 : i32, i32
  }
  func.func @transform_6(%arg0: i32) -> (i32, i32) {
    %c0_i32 = arith.constant 0 : i32
    %c0_i32_0 = arith.constant 0 : i32
    return %c0_i32, %arg0 : i32, i32
  }
}

</mosaic_0001>

<bundles_post_ra>
// kernel: tpu_custom_call.1
= control target key start
LH: loop header
LB: loop body
LE: loop exit
PB: predicated region body
PF: predicated region fallthrough
CT: control target
= control target key end

     0   :  { %s6364_s0 = inlined_call_operand.vmem [shape: s32[16,256], index: 0, kind: input, shape index: {}]   ;;  %s6365_s1 = inlined_call_operand.vmem [shape: bf16[128,224], index: 1, kind: input, shape index: {}]   ;;  %s6366_s2 = inlined_call_operand.vmem [shape: bf16[128,128], index: 2, kind: input, shape index: {}]   ;;  %s6367_s3 = inlined_call_operand.vmem [shape: f32[128,1], index: 3, kind: input, shape index: {}]   ;;  %s6368_s4 = inlined_call_operand.vmem [shape: f32[128,1], index: 4, kind: input, shape index: {}]   ;;  %s6369_s5 = inlined_call_operand.<no memory space> [shape: f32[1,1], index: 5, kind: input, shape index: {}]   ;;  %s6370_s6 = inlined_call_operand.hbm [shape: f32[1,256], index: 6, kind: output, shape index: {}]  }
   0x1   :  { %11 = sst [smem:[#allocation3]] %s6369_s5 }
   0x2   :  { %12 = vsyncpa [#allocation6], 0 }
   0x3   :  { %14 = vsyncpa [#allocation6 + $0x1], 0  ;;  %s4209_s23 = smov 0   ;;  %s4211_s24 = smov 0  }
   0x4   :  { %s4213_s25 = smov 0   ;;  %s4215_s26 = smov 0  }
   0x5 LB: > { %s3190_s5 = sadd.s32 4294967295, %s4167_s26   ;;  %s3191_s27 = sadd.s32 4294967294, %s4167_s26   ;;  %s4167_s26 = sphi %s4215_s26, %s6376_s26   ;;  %s4163_s25 = sphi %s4213_s25, %s6375_s25   ;;  %s4159_s24 = sphi %s4211_s24, %s6374_s24   ;;  %s4155_s23 = sphi %s4209_s23, %s6373_s23  }
   0x6   : > { %s4232_s28 = sadd.s32 1, %s4167_s26   ;;  %s27_s29 = sadd.s32 1, %s4163_s25 }
   0x7   : > { %s24_s30 = ssub.s32 %s4167_s26, %s4232_s28  ;;  %p34_p0 = scmp.ne.s32.totalorder %s4163_s25, %s4159_s24 }
   0x8   : > { %p25_p1 = scmp.eq.s32.totalorder %s24_s30, 0  ;;  %p35_p2 = scmp.eq.s32.totalorder %s4167_s26, 0 }
   0x9   : > { %p169_p3 = scmp.eq.s32.totalorder %s3190_s5, 1  ;;  %p174_p4 = scmp.ne.s32.totalorder %s4159_s24, %s4155_s23 }
   0xa   : > { %s4245_s7 = scalar_select %p25_p1, %s4163_s25, %s27_s29  }
   0xb   : > { %p36_p5 = por %p35_p2, %p34_p0  ;;  %p4247_p6 = por %p169_p3, %p34_p0 }
   0xc   : > { %p175_p7 = scmp.eq.s32.totalorder %s3191_s27, 1  ;;  %p3193_p9 = scmp.ge.s32.totalorder %s4167_s26, 2 }
   0xe   : > { %p4251_p8 = por %p175_p7, %p174_p4  ;;  %206 = sbr.rel (%p3193_p9) target bundleno = 25 (0x19), region = 36 }
  0x13   : > { %209 = sbr.rel (!%p36_p5) target bundleno = 25 (0x19), region = 40  ;;  %s211_s10 = sand.u32 (%p36_p5), 1, %s4163_s25  }
  0x14   : > { %s3195_s11 = sshll.u32 (%p36_p5), %s4167_s26, 3  ;;  %s3194_s12 = sshll.u32 (%p36_p5), %s211_s10, 4 }
  0x15   : > { %s215_s15 = scalar_lea.vmem (%p36_p5), %s6364_s0, %s3195_s11  ;;  %s213_s16 = scalar_lea.vmem (%p36_p5), [#allocation4], %s3194_s12 }
  0x16   : > { %v246_v0 = vld [vmem:[%s215_s15] sm:$0xff] (%p36_p5)  ;;  %v248_v1 = vld [vmem:[%s215_s15 + $0x10] sm:$0xff] (%p36_p5) }
  0x17   : > { %247 = vst [vmem:[%s213_s16] sm:$0xff] (%p36_p5), %v246_v0 }
  0x18   : > { %249 = vst [vmem:[%s213_s16 + $0x8] sm:$0xff] %v248_v1 }
  0x19 PF: > { %p3196_p10 = scmp.ge.s32.totalorder %s4167_s26, 1  ;;  %p254_p11 = scmp.lt.s32.totalorder %s4167_s26, 3 }
  0x1b   : > { %p255_p12 = pnand %p3196_p10, %p254_p11 }
  0x1c   : > { %s4266_s17 = sand.u32 (!%p255_p12), 1, %s4159_s24   ;;  %s3113_s16 = sld [smem:[#allocation3]] (!%p255_p12) }
  0x1d   : > { %258 = sbr.rel (%p255_p12) target bundleno = 899 (0x383), region = 78  ;;  %s3197_s18 = sshll.u32 (!%p255_p12), %s4266_s17, 4 }
  0x1e   : > { %s4271_s19 = scalar_lea.vmem (!%p255_p12), [#allocation4], %s3197_s18  ;;  %s3126_s21 = scalar_lea.hbm (!%p255_p12), %s6370_s6, %s3190_s5 }
  0x1f   : > { %s288_s22 = scalar_lea.vmem (!%p255_p12), [#allocation5], %s4266_s17  ;;  %s3130_s29 = sshll.u32 (!%p255_p12), %s3126_s21, 4  ;;  %s3131_s29 = int_to_ptr.hbm [resolvable:$true] %s3130_s29 }
  0x20   : > { %s3128_s27 = sshll.u32 (!%p255_p12), %s288_s22, 4  ;;  %s3118_s30 = scalar_lea.sflag (!%p255_p12), [#allocation6], %s4266_s17  ;;  %s3129_s27 = int_to_ptr.vmem [resolvable:$true] %s3128_s27 }
  0x21   : > { %s4119_s10 = sshra.s32 (!%p255_p12), %s3131_s29, 4  ;;  %s4125_s12 = scalar_lea.hbm (!%p255_p12), %s6370_s6, 2  ;;  %s4120_s10 = int_to_ptr.hbm [resolvable:$true] %s4119_s10 }
  0x22   : > { %v290_v2 = vlaneseq  ;;  %v4274_v4 = vld [vmem:[%s4271_s19] ss:$0 sm:$0xff]  ;;  %v4283_v7 = vld [vmem:[%s4271_s19 + $0x1] ss:$0 sm:$0xff]  ;;  %v4292_v10 = vld [vmem:[%s4271_s19 + $0x2] ss:$0 sm:$0xff]  ;;  %p4126_p2 = scmp.lt.s32.totalorder %s4120_s10, %s6370_s6 }
  0x23   : > { %v4295_v11 = vld [vmem:[%s4271_s19 + $0x3] ss:$0 sm:$0xff]  ;;  %v4306_v12 = vld [vmem:[%s4271_s19 + $0x4] ss:$0 sm:$0xff]  ;;  %v4309_v13 = vld [vmem:[%s4271_s19 + $0x5] ss:$0 sm:$0xff] }
  0x24   : > { %v4269_v3 = vshrl.u32 %v290_v2, 7  ;;  %v4169_v14 = vmov 0.0   ;;  %v4326_v23 = vld [vmem:[%s4271_s19 + $0x6] ss:$0 sm:$0xff]  ;;  %v4331_v28 = vld [vmem:[%s4271_s19 + $0x7] ss:$0 sm:$0xff] }
  0x25   : > { %v4342_v29 = vld [vmem:[%s4271_s19 + $0x8] ss:$0 sm:$0xff]  ;;  %v4353_v36 = vld [vmem:[%s4271_s19 + $0x9] ss:$0 sm:$0xff]  ;;  %v4366_v41 = vld [vmem:[%s4271_s19 + $0xa] ss:$0 sm:$0xff] }
  0x26   : > { %v4277_v5 = vadd.s32 16, %v4269_v3  ;;  %v4280_v6 = vadd.s32 24, %v4269_v3  ;;  %v4369_v42 = vld [vmem:[%s4271_s19 + $0xb] ss:$0 sm:$0xff]  ;;  %v4378_v47 = vld [vmem:[%s4271_s19 + $0xc] ss:$0 sm:$0xff] }
  0x27   : > { %v4383_v52 = vld [vmem:[%s4271_s19 + $0xd] ss:$0 sm:$0xff]  ;;  %v4394_v53 = vld [vmem:[%s4271_s19 + $0xe] ss:$0 sm:$0xff]  ;;  %v4405_v60 = vld [vmem:[%s4271_s19 + $0xf] ss:$0 sm:$0xff] }
  0x28   : > { %v4286_v8 = vadd.s32 96, %v4277_v5  ;;  %v4289_v9 = vadd.s32 96, %v4280_v6  ;;  %s4121_s11 = scalar_lea.hbm %s4120_s10, 1 }
  0x29   : > { %p4122_p13 = scmp.ne.s32.totalorder %s4120_s10, %s4121_s11  ;;  %p4127_p3 = scmp.lt.s32.totalorder %s4125_s12, %s4121_s11 }
  0x2a   : > { %vm1199_vm0 = vcmp.eq.s32.totalorder %v4286_v8, %v4274_v4  ;;  %vm1200_vm1 = vcmp.eq.s32.totalorder %v4289_v9, %v4274_v4  ;;  %vm1217_vm2 = vcmp.eq.s32.totalorder %v4286_v8, %v4283_v7  ;;  %vm1218_vm3 = vcmp.eq.s32.totalorder %v4289_v9, %v4283_v7 }
  0x2b   : > { %v3392_v15 = vsel %vm1199_vm0, 1.0, %v4169_v14  ;;  %v3393_v16 = vsel %vm1200_vm1, 1.0, %v4169_v14  ;;  %v3396_v17 = vsel %vm1217_vm2, 1.0, %v4169_v14  ;;  %v3397_v18 = vsel %vm1218_vm3, 1.0, %v4169_v14  ;;  %p4123_p0 = pnand %p4122_p13, %p4247_p6  ;;  %p4128_p4 = por %p4127_p3, %p4126_p2 }
  0x2c   : > { %v1229_v19 = vadd.f32 %v3396_v17, %v3392_v15  ;;  %v1230_v20 = vadd.f32 %v3397_v18, %v3393_v16  ;;  %vm1235_vm4 = vcmp.eq.s32.totalorder %v4286_v8, %v4292_v10  ;;  %vm1236_vm5 = vcmp.eq.s32.totalorder %v4289_v9, %v4292_v10  ;;  %v4420_v17 = vld [vmem:[%s4271_s19] ss:$0 sm:$0xff] }
  0x2d   : > { %v3400_v21 = vsel %vm1235_vm4, 1.0, %v4169_v14  ;;  %v3401_v22 = vsel %vm1236_vm5, 1.0, %v4169_v14  ;;  %vm1253_vm6 = vcmp.eq.s32.totalorder %v4286_v8, %v4295_v11  ;;  %vm1254_vm7 = vcmp.eq.s32.totalorder %v4289_v9, %v4295_v11  ;;  %p4124_p1 = pneg %p4123_p0 }
  0x2e   : > { %v1247_v24 = vadd.f32 %v3400_v21, %v1229_v19  ;;  %v1248_v25 = vadd.f32 %v3401_v22, %v1230_v20  ;;  %v3404_v26 = vsel %vm1253_vm6, 1.0, %v4169_v14  ;;  %v3405_v27 = vsel %vm1254_vm7, 1.0, %v4169_v14  ;;  %v4429_v20 = vld [vmem:[%s4271_s19 + $0x1] ss:$0 sm:$0xff] }
  0x2f   : > { %vm1271_vm8 = vcmp.eq.s32.totalorder %v4286_v8, %v4306_v12  ;;  %vm1272_vm9 = vcmp.eq.s32.totalorder %v4289_v9, %v4306_v12  ;;  %vm1289_vm10 = vcmp.eq.s32.totalorder %v4286_v8, %v4309_v13  ;;  %vm1290_vm11 = vcmp.eq.s32.totalorder %v4289_v9, %v4309_v13  ;;  %p4129_p5 = pnand %p4128_p4, %p4124_p1 }
  0x30   : > { %v1265_v30 = vadd.f32 %v3404_v26, %v1247_v24  ;;  %v1266_v31 = vadd.f32 %v3405_v27, %v1248_v25  ;;  %v3408_v32 = vsel %vm1271_vm8, 1.0, %v4169_v14  ;;  %v3409_v33 = vsel %vm1272_vm9, 1.0, %v4169_v14  ;;  %v4434_v26 = vld [vmem:[%s4271_s19 + $0x2] ss:$0 sm:$0xff] }
  0x31   : > { %v3412_v34 = vsel %vm1289_vm10, 1.0, %v4169_v14  ;;  %v3413_v35 = vsel %vm1290_vm11, 1.0, %v4169_v14  ;;  %vm1307_vm12 = vcmp.eq.s32.totalorder %v4286_v8, %v4326_v23  ;;  %vm1308_vm13 = vcmp.eq.s32.totalorder %v4289_v9, %v4326_v23 }
  0x32   : > { %v1283_v37 = vadd.f32 %v3408_v32, %v1265_v30  ;;  %v1284_v38 = vadd.f32 %v3409_v33, %v1266_v31  ;;  %v3416_v39 = vsel %vm1307_vm12, 1.0, %v4169_v14  ;;  %v3417_v40 = vsel %vm1308_vm13, 1.0, %v4169_v14  ;;  %v4445_v33 = vld [vmem:[%s4271_s19 + $0x3] ss:$0 sm:$0xff] }
  0x33   : > { %vm1325_vm14 = vcmp.eq.s32.totalorder %v4286_v8, %v4331_v28  ;;  %vm1326_vm15 = vcmp.eq.s32.totalorder %v4289_v9, %v4331_v28  ;;  %vm1343_vm0 = vcmp.eq.s32.totalorder %v4286_v8, %v4342_v29  ;;  %vm1344_vm1 = vcmp.eq.s32.totalorder %v4289_v9, %v4342_v29 }
  0x34   : > { %v1301_v43 = vadd.f32 %v3412_v34, %v1283_v37  ;;  %v1302_v44 = vadd.f32 %v3413_v35, %v1284_v38  ;;  %v3420_v45 = vsel %vm1325_vm14, 1.0, %v4169_v14  ;;  %v3421_v46 = vsel %vm1326_vm15, 1.0, %v4169_v14  ;;  %v4462_v37 = vld [vmem:[%s4271_s19 + $0x4] ss:$0 sm:$0xff] }
  0x35   : > { %vm1361_vm2 = vcmp.eq.s32.totalorder %v4286_v8, %v4353_v36  ;;  %vm1362_vm3 = vcmp.eq.s32.totalorder %v4289_v9, %v4353_v36  ;;  %v3424_v50 = vsel %vm1343_vm0, 1.0, %v4169_v14  ;;  %v3425_v51 = vsel %vm1344_vm1, 1.0, %v4169_v14 }
  0x36   : > { %v1319_v48 = vadd.f32 %v3416_v39, %v1301_v43  ;;  %v1320_v49 = vadd.f32 %v3417_v40, %v1302_v44  ;;  %vm1379_vm4 = vcmp.eq.s32.totalorder %v4286_v8, %v4366_v41  ;;  %vm1380_vm5 = vcmp.eq.s32.totalorder %v4289_v9, %v4366_v41 }
  0x37   : > { %vm1397_vm6 = vcmp.eq.s32.totalorder %v4286_v8, %v4369_v42  ;;  %vm1398_vm7 = vcmp.eq.s32.totalorder %v4289_v9, %v4369_v42  ;;  %v3428_v56 = vsel %vm1361_vm2, 1.0, %v4169_v14  ;;  %v3429_v57 = vsel %vm1362_vm3, 1.0, %v4169_v14 }
  0x38   : > { %v1337_v54 = vadd.f32 %v3420_v45, %v1319_v48  ;;  %v1338_v55 = vadd.f32 %v3421_v46, %v1320_v49  ;;  %v3432_v58 = vsel %vm1379_vm4, 1.0, %v4169_v14  ;;  %v3433_v59 = vsel %vm1380_vm5, 1.0, %v4169_v14  ;;  %v4473_v46 = vld [vmem:[%s4271_s19 + $0x5] ss:$0 sm:$0xff] }
  0x39   : > { %vm1415_vm8 = vcmp.eq.s32.totalorder %v4286_v8, %v4378_v47  ;;  %vm1416_vm9 = vcmp.eq.s32.totalorder %v4289_v9, %v4378_v47  ;;  %v3436_v63 = vsel %vm1397_vm6, 1.0, %v4169_v14  ;;  %v3437_v0 = vsel %vm1398_vm7, 1.0, %v4169_v14 }
  0x3a   : > { %v1355_v61 = vadd.f32 %v3424_v50, %v1337_v54  ;;  %v1356_v62 = vadd.f32 %v3425_v51, %v1338_v55  ;;  %vm1433_vm10 = vcmp.eq.s32.totalorder %v4286_v8, %v4383_v52  ;;  %vm1434_vm11 = vcmp.eq.s32.totalorder %v4289_v9, %v4383_v52 }
  0x3b   : > { %vm1451_vm12 = vcmp.eq.s32.totalorder %v4286_v8, %v4394_v53  ;;  %vm1452_vm13 = vcmp.eq.s32.totalorder %v4289_v9, %v4394_v53  ;;  %v3440_v15 = vsel %vm1415_vm8, 1.0, %v4169_v14  ;;  %v3441_v16 = vsel %vm1416_vm9, 1.0, %v4169_v14 }
  0x3c   : > { %v1373_v1 = vadd.f32 %v3428_v56, %v1355_v61  ;;  %v1374_v2 = vadd.f32 %v3429_v57, %v1356_v62  ;;  %v3444_v18 = vsel %vm1433_vm10, 1.0, %v4169_v14  ;;  %v3445_v19 = vsel %vm1434_vm11, 1.0, %v4169_v14  ;;  %v4482_v56 = vld [vmem:[%s4271_s19 + $0x6] ss:$0 sm:$0xff]  ;;  %v4485_v57 = vld [vmem:[%s4271_s19 + $0x7] ss:$0 sm:$0xff] }
  0x3d   : > { %vm1469_vm14 = vcmp.eq.s32.totalorder %v4286_v8, %v4405_v60  ;;  %vm1470_vm15 = vcmp.eq.s32.totalorder %v4289_v9, %v4405_v60  ;;  %v3448_v24 = vsel %vm1451_vm12, 1.0, %v4169_v14  ;;  %v3449_v25 = vsel %vm1452_vm13, 1.0, %v4169_v14 }
  0x3e   : > { %v1391_v21 = vadd.f32 %v3432_v58, %v1373_v1  ;;  %v1392_v22 = vadd.f32 %v3433_v59, %v1374_v2  ;;  %v3452_v27 = vsel %vm1469_vm14, 1.0, %v4169_v14  ;;  %v3453_v30 = vsel %vm1470_vm15, 1.0, %v4169_v14  ;;  %v4494_v1 = vld [vmem:[%s4271_s19 + $0x8] ss:$0 sm:$0xff] }
  0x3f   : > { %v4439_v8 = vadd.s32 192, %v4277_v5  ;;  %v4442_v9 = vadd.s32 192, %v4280_v6  ;;  %v4448_v34 = vadd.s32 8, %v4269_v3  ;;  %v4451_v35 = vadd.s32 96, %v4269_v3 }
  0x40   : > { %v1409_v31 = vadd.f32 %v3436_v63, %v1391_v21  ;;  %v1410_v32 = vadd.f32 %v3437_v0, %v1392_v22  ;;  %v4503_v22 = vld [vmem:[%s4271_s19 + $0x9] ss:$0 sm:$0xff] }
  0x41   : > { %vm2099_vm0 = vcmp.eq.s32.totalorder %v4439_v8, %v4420_v17  ;;  %vm2100_vm1 = vcmp.eq.s32.totalorder %v4442_v9, %v4420_v17  ;;  %vm2117_vm2 = vcmp.eq.s32.totalorder %v4439_v8, %v4429_v20  ;;  %vm2118_vm3 = vcmp.eq.s32.totalorder %v4442_v9, %v4429_v20 }
  0x42   : > { %v1427_v38 = vadd.f32 %v3440_v15, %v1409_v31  ;;  %v1428_v39 = vadd.f32 %v3441_v16, %v1410_v32  ;;  %v3584_v40 = vsel %vm2099_vm0, 1.0, %v4169_v14  ;;  %v3585_v43 = vsel %vm2100_vm1, 1.0, %v4169_v14 }
  0x43   : > { %v3588_v44 = vsel %vm2117_vm2, 1.0, %v4169_v14  ;;  %v3589_v45 = vsel %vm2118_vm3, 1.0, %v4169_v14  ;;  %vm2135_vm4 = vcmp.eq.s32.totalorder %v4439_v8, %v4434_v26  ;;  %vm2136_vm5 = vcmp.eq.s32.totalorder %v4442_v9, %v4434_v26 }
  0x44   : > { %v1445_v48 = vadd.f32 %v3444_v18, %v1427_v38  ;;  %v1446_v49 = vadd.f32 %v3445_v19, %v1428_v39  ;;  %v2129_v50 = vadd.f32 %v3588_v44, %v3584_v40  ;;  %v2130_v51 = vadd.f32 %v3589_v45, %v3585_v43  ;;  %v4517_v38 = vld [vmem:[%s4271_s19 + $0xb] ss:$0 sm:$0xff] }
  0x45   : > { %v3592_v54 = vsel %vm2135_vm4, 1.0, %v4169_v14  ;;  %v3593_v55 = vsel %vm2136_vm5, 1.0, %v4169_v14  ;;  %vm2153_vm6 = vcmp.eq.s32.totalorder %v4439_v8, %v4445_v33  ;;  %vm2154_vm7 = vcmp.eq.s32.totalorder %v4442_v9, %v4445_v33 }
  0x46   : > { %v1463_v58 = vadd.f32 %v3448_v24, %v1445_v48  ;;  %v1464_v59 = vadd.f32 %v3449_v25, %v1446_v49  ;;  %v2147_v61 = vadd.f32 %v3592_v54, %v2129_v50  ;;  %v2148_v62 = vadd.f32 %v3593_v55, %v2130_v51  ;;  %v4506_v24 = vld [vmem:[%s4271_s19 + $0xa] ss:$0 sm:$0xff]  ;;  %v4529_v48 = vld [vmem:[%s4271_s19 + $0xc] ss:$0 sm:$0xff]  ;;  %v4532_v49 = vld [vmem:[%s4271_s19 + $0xd] ss:$0 sm:$0xff] }
  0x47   : > { %v3596_v63 = vsel %vm2153_vm6, 1.0, %v4169_v14  ;;  %v3597_v0 = vsel %vm2154_vm7, 1.0, %v4169_v14  ;;  %vm2171_vm8 = vcmp.eq.s32.totalorder %v4439_v8, %v4462_v37  ;;  %vm2172_vm9 = vcmp.eq.s32.totalorder %v4442_v9, %v4462_v37 }
  0x48   : > { %v1481_v2 = vadd.f32 %v3452_v27, %v1463_v58  ;;  %v1482_v15 = vadd.f32 %v3453_v30, %v1464_v59  ;;  %v2165_v16 = vadd.f32 %v3596_v63, %v2147_v61  ;;  %v2166_v18 = vadd.f32 %v3597_v0, %v2148_v62  ;;  %v4544_v59 = vld [vmem:[%s4271_s19 + $0xe] ss:$0 sm:$0xff] }
  0x49   : > { %v3600_v19 = vsel %vm2171_vm8, 1.0, %v4169_v14  ;;  %v3601_v21 = vsel %vm2172_vm9, 1.0, %v4169_v14  ;;  %vm2189_vm10 = vcmp.eq.s32.totalorder %v4439_v8, %v4473_v46  ;;  %vm2190_vm11 = vcmp.eq.s32.totalorder %v4442_v9, %v4473_v46 }
  0x4a   : > { %v3886_v25 = vpack.c.bf16 %v1482_v15, %v1481_v2  ;;  %v2183_v27 = vadd.f32 %v3600_v19, %v2165_v16  ;;  %v2184_v30 = vadd.f32 %v3601_v21, %v2166_v18  ;;  %v3604_v31 = vsel %vm2189_vm10, 1.0, %v4169_v14  ;;  %v4556_v15 = vld [vmem:[%s4271_s19 + $0xf] ss:$0 sm:$0xff] }
  0x4b   : > { %v3605_v32 = vsel %vm2190_vm11, 1.0, %v4169_v14  ;;  %vm2207_vm12 = vcmp.eq.s32.totalorder %v4439_v8, %v4482_v56  ;;  %vm2208_vm13 = vcmp.eq.s32.totalorder %v4442_v9, %v4482_v56  ;;  %vm2225_vm14 = vcmp.eq.s32.totalorder %v4439_v8, %v4485_v57 }
  0x4c   : > { %3924 = vst [vmem:[#allocation2 + $0x48] sm:$0xff] %v3886_v25   ;;  %v2201_v39 = vadd.f32 %v3604_v31, %v2183_v27  ;;  %v2202_v40 = vadd.f32 %v3605_v32, %v2184_v30  ;;  %v3608_v43 = vsel %vm2207_vm12, 1.0, %v4169_v14  ;;  %v3609_v44 = vsel %vm2208_vm13, 1.0, %v4169_v14 }
  0x4d   : > { %vm2226_vm15 = vcmp.eq.s32.totalorder %v4442_v9, %v4485_v57  ;;  %v3612_v45 = vsel %vm2225_vm14, 1.0, %v4169_v14  ;;  %vm2243_vm0 = vcmp.eq.s32.totalorder %v4439_v8, %v4494_v1  ;;  %vm2244_vm1 = vcmp.eq.s32.totalorder %v4442_v9, %v4494_v1 }
  0x4e   : > { %v2219_v50 = vadd.f32 %v3608_v43, %v2201_v39  ;;  %v2220_v51 = vadd.f32 %v3609_v44, %v2202_v40  ;;  %v3613_v54 = vsel %vm2226_vm15, 1.0, %v4169_v14  ;;  %v3616_v55 = vsel %vm2243_vm0, 1.0, %v4169_v14 }
  0x4f   : > { %v3617_v58 = vsel %vm2244_vm1, 1.0, %v4169_v14  ;;  %vm2261_vm2 = vcmp.eq.s32.totalorder %v4439_v8, %v4503_v22  ;;  %vm2262_vm3 = vcmp.eq.s32.totalorder %v4442_v9, %v4503_v22  ;;  %vm2279_vm4 = vcmp.eq.s32.totalorder %v4439_v8, %v4506_v24 }
  0x50   : > { %v2237_v61 = vadd.f32 %v3612_v45, %v2219_v50  ;;  %v2238_v62 = vadd.f32 %v3613_v54, %v2220_v51  ;;  %v3620_v63 = vsel %vm2261_vm2, 1.0, %v4169_v14  ;;  %v3621_v0 = vsel %vm2262_vm3, 1.0, %v4169_v14 }
  0x51   : > { %vm2280_vm5 = vcmp.eq.s32.totalorder %v4442_v9, %v4506_v24  ;;  %v3624_v2 = vsel %vm2279_vm4, 1.0, %v4169_v14  ;;  %vm2297_vm6 = vcmp.eq.s32.totalorder %v4439_v8, %v4517_v38  ;;  %vm2298_vm7 = vcmp.eq.s32.totalorder %v4442_v9, %v4517_v38 }
  0x52   : > { %v2255_v16 = vadd.f32 %v3616_v55, %v2237_v61  ;;  %v2256_v18 = vadd.f32 %v3617_v58, %v2238_v62  ;;  %v3625_v19 = vsel %vm2280_vm5, 1.0, %v4169_v14  ;;  %v3628_v21 = vsel %vm2297_vm6, 1.0, %v4169_v14 }
  0x53   : > { %v3833_v25 = vld [vmem:[#allocation2 + $0x48] sm:$0xff]  ;;  %v3629_v27 = vsel %vm2298_vm7, 1.0, %v4169_v14  ;;  %vm2315_vm8 = vcmp.eq.s32.totalorder %v4439_v8, %v4529_v48  ;;  %vm2316_vm9 = vcmp.eq.s32.totalorder %v4442_v9, %v4529_v48  ;;  %vm2333_vm10 = vcmp.eq.s32.totalorder %v4439_v8, %v4532_v49 }
  0x54   : > { %v2273_v30 = vadd.f32 %v3620_v63, %v2255_v16  ;;  %v2274_v31 = vadd.f32 %v3621_v0, %v2256_v18  ;;  %v3632_v32 = vsel %vm2315_vm8, 1.0, %v4169_v14  ;;  %v3633_v39 = vsel %vm2316_vm9, 1.0, %v4169_v14  ;;  %2633 = vmatpush.bf16.msra.mxu0 %v3833_v25  ;;  %3931 = vmatpush.bf16.msra.mxu3 %v3833_v25 }
  0x55   : > { %vm2334_vm11 = vcmp.eq.s32.totalorder %v4442_v9, %v4532_v49  ;;  %v3636_v40 = vsel %vm2333_vm10, 1.0, %v4169_v14  ;;  %vm2351_vm12 = vcmp.eq.s32.totalorder %v4439_v8, %v4544_v59  ;;  %vm2352_vm13 = vcmp.eq.s32.totalorder %v4442_v9, %v4544_v59 }
  0x56   : > { %v2291_v43 = vadd.f32 %v3624_v2, %v2273_v30  ;;  %v2292_v44 = vadd.f32 %v3625_v19, %v2274_v31  ;;  %v3637_v45 = vsel %vm2334_vm11, 1.0, %v4169_v14  ;;  %v3640_v50 = vsel %vm2351_vm12, 1.0, %v4169_v14 }
  0x57   : > { %v3641_v51 = vsel %vm2352_vm13, 1.0, %v4169_v14  ;;  %vm2369_vm14 = vcmp.eq.s32.totalorder %v4439_v8, %v4556_v15  ;;  %vm2370_vm15 = vcmp.eq.s32.totalorder %v4442_v9, %v4556_v15  ;;  %v4584_v54 = vadd.s32 96, %v4448_v34 }
  0x58   : > { %v2309_v55 = vadd.f32 %v3628_v21, %v2291_v43  ;;  %v2310_v58 = vadd.f32 %v3629_v27, %v2292_v44  ;;  %v3644_v61 = vsel %vm2369_vm14, 1.0, %v4169_v14  ;;  %v3645_v62 = vsel %vm2370_vm15, 1.0, %v4169_v14 }
  0x59   : > { %vm1197_vm0 = vcmp.eq.s32.totalorder %v4451_v35, %v4274_v4  ;;  %vm1198_vm1 = vcmp.eq.s32.totalorder %v4584_v54, %v4274_v4  ;;  %vm1215_vm2 = vcmp.eq.s32.totalorder %v4451_v35, %v4283_v7  ;;  %vm1216_vm3 = vcmp.eq.s32.totalorder %v4584_v54, %v4283_v7 }
  0x5a   : > { %v2327_v8 = vadd.f32 %v3632_v32, %v2309_v55  ;;  %v2328_v9 = vadd.f32 %v3633_v39, %v2310_v58  ;;  %v3390_v63 = vsel %vm1197_vm0, 1.0, %v4169_v14  ;;  %v3391_v0 = vsel %vm1198_vm1, 1.0, %v4169_v14 }
  0x5b   : > { %v3394_v2 = vsel %vm1215_vm2, 1.0, %v4169_v14  ;;  %v3395_v16 = vsel %vm1216_vm3, 1.0, %v4169_v14  ;;  %vm1233_vm4 = vcmp.eq.s32.totalorder %v4451_v35, %v4292_v10  ;;  %vm1234_vm5 = vcmp.eq.s32.totalorder %v4584_v54, %v4292_v10 }
  0x5c   : > { %v2345_v4 = vadd.f32 %v3636_v40, %v2327_v8  ;;  %v2346_v18 = vadd.f32 %v3637_v45, %v2328_v9  ;;  %v1227_v19 = vadd.f32 %v3394_v2, %v3390_v63  ;;  %v1228_v7 = vadd.f32 %v3395_v16, %v3391_v0 }
  0x5d   : > { %v3398_v21 = vsel %vm1233_vm4, 1.0, %v4169_v14  ;;  %v3399_v25 = vsel %vm1234_vm5, 1.0, %v4169_v14  ;;  %vm1251_vm6 = vcmp.eq.s32.totalorder %v4451_v35, %v4295_v11  ;;  %vm1252_vm7 = vcmp.eq.s32.totalorder %v4584_v54, %v4295_v11 }
  0x5e   : > { %v2363_v27 = vadd.f32 %v3640_v50, %v2345_v4  ;;  %v2364_v30 = vadd.f32 %v3641_v51, %v2346_v18  ;;  %v1245_v31 = vadd.f32 %v3398_v21, %v1227_v19  ;;  %v1246_v32 = vadd.f32 %v3399_v25, %v1228_v7 }
  0x5f   : > { %v3402_v10 = vsel %vm1251_vm6, 1.0, %v4169_v14  ;;  %v3403_v39 = vsel %vm1252_vm7, 1.0, %v4169_v14  ;;  %vm1269_vm8 = vcmp.eq.s32.totalorder %v4451_v35, %v4306_v12  ;;  %vm1270_vm9 = vcmp.eq.s32.totalorder %v4584_v54, %v4306_v12 }
  0x60   : > { %v2381_v40 = vadd.f32 %v3644_v61, %v2363_v27  ;;  %v2382_v43 = vadd.f32 %v3645_v62, %v2364_v30  ;;  %v1263_v44 = vadd.f32 %v3402_v10, %v1245_v31  ;;  %v1264_v45 = vadd.f32 %v3403_v39, %v1246_v32 }
  0x61   : > { %v3406_v11 = vsel %vm1269_vm8, 1.0, %v4169_v14  ;;  %v3407_v50 = vsel %vm1270_vm9, 1.0, %v4169_v14  ;;  %vm1287_vm10 = vcmp.eq.s32.totalorder %v4451_v35, %v4309_v13  ;;  %vm1288_vm11 = vcmp.eq.s32.totalorder %v4584_v54, %v4309_v13 }
  0x62   : > { %v3916_v51 = vpack.c.bf16 %v2382_v43, %v2381_v40  ;;  %v1281_v55 = vadd.f32 %v3406_v11, %v1263_v44  ;;  %v1282_v58 = vadd.f32 %v3407_v50, %v1264_v45  ;;  %v3410_v8 = vsel %vm1287_vm10, 1.0, %v4169_v14 }
  0x63   : > { %v3411_v12 = vsel %vm1288_vm11, 1.0, %v4169_v14  ;;  %vm1305_vm12 = vcmp.eq.s32.totalorder %v4451_v35, %v4326_v23  ;;  %vm1306_vm13 = vcmp.eq.s32.totalorder %v4584_v54, %v4326_v23  ;;  %vm1323_vm14 = vcmp.eq.s32.totalorder %v4451_v35, %v4331_v28 }
  0x64   : > { %3930 = vst [vmem:[#allocation2 + $0x28] sm:$0xff] %v3916_v51   ;;  %v1299_v61 = vadd.f32 %v3410_v8, %v1281_v55  ;;  %v1300_v62 = vadd.f32 %v3411_v12, %v1282_v58  ;;  %v3414_v13 = vsel %vm1305_vm12, 1.0, %v4169_v14  ;;  %v3415_v9 = vsel %vm1306_vm13, 1.0, %v4169_v14 }
  0x65   : > { %vm1324_vm15 = vcmp.eq.s32.totalorder %v4584_v54, %v4331_v28  ;;  %v3418_v63 = vsel %vm1323_vm14, 1.0, %v4169_v14  ;;  %vm1341_vm0 = vcmp.eq.s32.totalorder %v4451_v35, %v4342_v29  ;;  %vm1342_vm1 = vcmp.eq.s32.totalorder %v4584_v54, %v4342_v29 }
  0x66   : > { %v1317_v23 = vadd.f32 %v3414_v13, %v1299_v61  ;;  %v1318_v0 = vadd.f32 %v3415_v9, %v1300_v62  ;;  %v3419_v2 = vsel %vm1324_vm15, 1.0, %v4169_v14  ;;  %v3422_v16 = vsel %vm1341_vm0, 1.0, %v4169_v14 }
  0x67   : > { %v3423_v4 = vsel %vm1342_vm1, 1.0, %v4169_v14  ;;  %vm1359_vm2 = vcmp.eq.s32.totalorder %v4451_v35, %v4353_v36  ;;  %vm1360_vm3 = vcmp.eq.s32.totalorder %v4584_v54, %v4353_v36  ;;  %vm1377_vm4 = vcmp.eq.s32.totalorder %v4451_v35, %v4366_v41 }
  0x68   : > { %v1335_v28 = vadd.f32 %v3418_v63, %v1317_v23  ;;  %v1336_v18 = vadd.f32 %v3419_v2, %v1318_v0  ;;  %v3426_v29 = vsel %vm1359_vm2, 1.0, %v4169_v14  ;;  %v3427_v19 = vsel %vm1360_vm3, 1.0, %v4169_v14 }
  0x69   : > { %vm1378_vm5 = vcmp.eq.s32.totalorder %v4584_v54, %v4366_v41  ;;  %v3430_v7 = vsel %vm1377_vm4, 1.0, %v4169_v14  ;;  %vm1395_vm6 = vcmp.eq.s32.totalorder %v4451_v35, %v4369_v42  ;;  %vm1396_vm7 = vcmp.eq.s32.totalorder %v4584_v54, %v4369_v42 }
  0x6a   : > { %v1353_v36 = vadd.f32 %v3422_v16, %v1335_v28  ;;  %v1354_v21 = vadd.f32 %v3423_v4, %v1336_v18  ;;  %v3431_v25 = vsel %vm1378_vm5, 1.0, %v4169_v14  ;;  %v3434_v27 = vsel %vm1395_vm6, 1.0, %v4169_v14 }
  0x6b   : > { %v3839_v30 = vld [vmem:[#allocation2 + $0x28] sm:$0xff]  ;;  %v3435_v31 = vsel %vm1396_vm7, 1.0, %v4169_v14  ;;  %vm1413_vm8 = vcmp.eq.s32.totalorder %v4451_v35, %v4378_v47  ;;  %vm1414_vm9 = vcmp.eq.s32.totalorder %v4584_v54, %v4378_v47  ;;  %vm1431_vm10 = vcmp.eq.s32.totalorder %v4451_v35, %v4383_v52 }
  0x6c   : > { %v1371_v41 = vadd.f32 %v3426_v29, %v1353_v36  ;;  %v1372_v42 = vadd.f32 %v3427_v19, %v1354_v21  ;;  %v3438_v32 = vsel %vm1413_vm8, 1.0, %v4169_v14  ;;  %v3439_v10 = vsel %vm1414_vm9, 1.0, %v4169_v14  ;;  %2684 = vmatpush.bf16.msra.mxu1 %v3839_v30 }
  0x6d   : > { %vm1432_vm11 = vcmp.eq.s32.totalorder %v4584_v54, %v4383_v52  ;;  %v3442_v39 = vsel %vm1431_vm10, 1.0, %v4169_v14  ;;  %vm1449_vm12 = vcmp.eq.s32.totalorder %v4451_v35, %v4394_v53  ;;  %vm1450_vm13 = vcmp.eq.s32.totalorder %v4584_v54, %v4394_v53 }
  0x6e   : > { %v1389_v47 = vadd.f32 %v3430_v7, %v1371_v41  ;;  %v1390_v40 = vadd.f32 %v3431_v25, %v1372_v42  ;;  %v3443_v43 = vsel %vm1432_vm11, 1.0, %v4169_v14  ;;  %v3446_v44 = vsel %vm1449_vm12, 1.0, %v4169_v14 }
  0x6f   : > { %v3447_v45 = vsel %vm1450_vm13, 1.0, %v4169_v14  ;;  %vm1467_vm14 = vcmp.eq.s32.totalorder %v4451_v35, %v4405_v60  ;;  %vm1468_vm15 = vcmp.eq.s32.totalorder %v4584_v54, %v4405_v60  ;;  %v4683_v52 = vadd.s32 192, %v4269_v3 }
  0x70   : > { %v1407_v11 = vadd.f32 %v3434_v27, %v1389_v47  ;;  %v1408_v50 = vadd.f32 %v3435_v31, %v1390_v40  ;;  %v3450_v53 = vsel %vm1467_vm14, 1.0, %v4169_v14  ;;  %v3451_v51 = vsel %vm1468_vm15, 1.0, %v4169_v14 }
  0x71   : > { %v4688_v55 = vadd.s32 192, %v4448_v34  ;;  %vm2097_vm0 = vcmp.eq.s32.totalorder %v4683_v52, %v4420_v17  ;;  %vm2115_vm1 = vcmp.eq.s32.totalorder %v4683_v52, %v4429_v20  ;;  %vm2133_vm2 = vcmp.eq.s32.totalorder %v4683_v52, %v4434_v26 }
  0x72   : > { %v1425_v60 = vadd.f32 %v3438_v32, %v1407_v11  ;;  %v1426_v35 = vadd.f32 %v3439_v10, %v1408_v50  ;;  %v3582_v54 = vsel %vm2097_vm0, 1.0, %v4169_v14  ;;  %v3586_v58 = vsel %vm2115_vm1, 1.0, %v4169_v14 }
  0x73   : > { %vm2098_vm3 = vcmp.eq.s32.totalorder %v4688_v55, %v4420_v17  ;;  %vm2116_vm4 = vcmp.eq.s32.totalorder %v4688_v55, %v4429_v20  ;;  %v2127_v8 = vadd.f32 %v3586_v58, %v3582_v54  ;;  %vm2134_vm5 = vcmp.eq.s32.totalorder %v4688_v55, %v4434_v26 }
  0x74   : > { %v1443_v12 = vadd.f32 %v3442_v39, %v1425_v60  ;;  %v1444_v61 = vadd.f32 %v3443_v43, %v1426_v35  ;;  %v3583_v62 = vsel %vm2098_vm3, 1.0, %v4169_v14  ;;  %v3587_v13 = vsel %vm2116_vm4, 1.0, %v4169_v14 }
  0x75   : > { %v2128_v9 = vadd.f32 %v3587_v13, %v3583_v62  ;;  %v3590_v63 = vsel %vm2133_vm2, 1.0, %v4169_v14  ;;  %v3591_v23 = vsel %vm2134_vm5, 1.0, %v4169_v14  ;;  %vm2151_vm6 = vcmp.eq.s32.totalorder %v4683_v52, %v4445_v33 }
  0x76   : > { %v1461_v17 = vadd.f32 %v3446_v44, %v1443_v12  ;;  %v1462_v20 = vadd.f32 %v3447_v45, %v1444_v61  ;;  %v2145_v0 = vadd.f32 %v3590_v63, %v2127_v8  ;;  %vm2152_vm7 = vcmp.eq.s32.totalorder %v4688_v55, %v4445_v33  ;;  %v4783_v12 = vld [vmem:[%s4271_s19 + $0x1] ss:$0 sm:$0xff]  ;;  %v4786_v61 = vld [vmem:[%s4271_s19 + $0x2] ss:$0 sm:$0xff] }
  0x77   : > { %v2146_v26 = vadd.f32 %v3591_v23, %v2128_v9  ;;  %v3594_v2 = vsel %vm2151_vm6, 1.0, %v4169_v14  ;;  %v3595_v16 = vsel %vm2152_vm7, 1.0, %v4169_v14  ;;  %vm2169_vm8 = vcmp.eq.s32.totalorder %v4683_v52, %v4462_v37 }
  0x78   : > { %v1479_v4 = vadd.f32 %v3450_v53, %v1461_v17  ;;  %v1480_v28 = vadd.f32 %v3451_v51, %v1462_v20  ;;  %v2163_v18 = vadd.f32 %v3594_v2, %v2145_v0  ;;  %vm2170_vm9 = vcmp.eq.s32.totalorder %v4688_v55, %v4462_v37 }
  0x79   : > { %v2164_v29 = vadd.f32 %v3595_v16, %v2146_v26  ;;  %v3598_v19 = vsel %vm2169_vm8, 1.0, %v4169_v14  ;;  %v3599_v7 = vsel %vm2170_vm9, 1.0, %v4169_v14  ;;  %vm2187_vm10 = vcmp.eq.s32.totalorder %v4683_v52, %v4473_v46 }
  0x7a   : > { %v3881_v33 = vpack.c.bf16 %v1480_v28, %v1479_v4  ;;  %v2181_v36 = vadd.f32 %v3598_v19, %v2163_v18  ;;  %vm2188_vm11 = vcmp.eq.s32.totalorder %v4688_v55, %v4473_v46  ;;  %v3602_v21 = vsel %vm2187_vm10, 1.0, %v4169_v14  ;;  %v4825_v18 = vld [vmem:[%s4271_s19 + $0x4] ss:$0 sm:$0xff] }
  0x7b   : > { %v2182_v25 = vadd.f32 %v3599_v7, %v2164_v29  ;;  %v3603_v27 = vsel %vm2188_vm11, 1.0, %v4169_v14  ;;  %vm2205_vm12 = vcmp.eq.s32.totalorder %v4683_v52, %v4482_v56  ;;  %vm2206_vm13 = vcmp.eq.s32.totalorder %v4688_v55, %v4482_v56 }
  0x7c   : > { %3923 = vst [vmem:[#allocation2 + $0x8] sm:$0xff] %v3881_v33   ;;  %v2199_v37 = vadd.f32 %v3602_v21, %v2181_v36  ;;  %v3606_v30 = vsel %vm2205_vm12, 1.0, %v4169_v14  ;;  %v3607_v31 = vsel %vm2206_vm13, 1.0, %v4169_v14  ;;  %vm2223_vm14 = vcmp.eq.s32.totalorder %v4683_v52, %v4485_v57 }
  0x7d   : > { %v2200_v46 = vadd.f32 %v3603_v27, %v2182_v25  ;;  %vm2224_vm15 = vcmp.eq.s32.totalorder %v4688_v55, %v4485_v57  ;;  %v3610_v41 = vsel %vm2223_vm14, 1.0, %v4169_v14  ;;  %vm2241_vm0 = vcmp.eq.s32.totalorder %v4683_v52, %v4494_v1  ;;  %v4837_v25 = vld [vmem:[%s4271_s19 + $0x5] ss:$0 sm:$0xff] }
  0x7e   : > { %v2217_v42 = vadd.f32 %v3606_v30, %v2199_v37  ;;  %v3611_v56 = vsel %vm2224_vm15, 1.0, %v4169_v14  ;;  %vm2242_vm1 = vcmp.eq.s32.totalorder %v4688_v55, %v4494_v1  ;;  %v3614_v32 = vsel %vm2241_vm0, 1.0, %v4169_v14 }
  0x7f   : > { %v2218_v10 = vadd.f32 %v3607_v31, %v2200_v46  ;;  %v3615_v39 = vsel %vm2242_vm1, 1.0, %v4169_v14  ;;  %vm2259_vm2 = vcmp.eq.s32.totalorder %v4683_v52, %v4503_v22  ;;  %vm2260_vm3 = vcmp.eq.s32.totalorder %v4688_v55, %v4503_v22 }
  0x80   : > { %v2235_v57 = vadd.f32 %v3610_v41, %v2217_v42  ;;  %v3618_v47 = vsel %vm2259_vm2, 1.0, %v4169_v14  ;;  %v3619_v40 = vsel %vm2260_vm3, 1.0, %v4169_v14  ;;  %vm2277_vm4 = vcmp.eq.s32.totalorder %v4683_v52, %v4506_v24  ;;  %v4846_v42 = vld [vmem:[%s4271_s19 + $0x6] ss:$0 sm:$0xff] }
  0x81   : > { %v2236_v1 = vadd.f32 %v3611_v56, %v2218_v10  ;;  %vm2278_vm5 = vcmp.eq.s32.totalorder %v4688_v55, %v4506_v24  ;;  %v3622_v43 = vsel %vm2277_vm4, 1.0, %v4169_v14  ;;  %vm2295_vm6 = vcmp.eq.s32.totalorder %v4683_v52, %v4517_v38  ;;  %v4849_v56 = vld [vmem:[%s4271_s19 + $0x7] ss:$0 sm:$0xff] }
  0x82   : > { %v2253_v44 = vadd.f32 %v3614_v32, %v2235_v57  ;;  %v3623_v22 = vsel %vm2278_vm5, 1.0, %v4169_v14  ;;  %vm2296_vm7 = vcmp.eq.s32.totalorder %v4688_v55, %v4517_v38  ;;  %v3626_v45 = vsel %vm2295_vm6, 1.0, %v4169_v14 }
  0x83   : > { %v3832_v11 = vld [vmem:[#allocation2 + $0x8] sm:$0xff]  ;;  %v2254_v50 = vadd.f32 %v3615_v39, %v2236_v1  ;;  %v3627_v53 = vsel %vm2296_vm7, 1.0, %v4169_v14  ;;  %vm2313_vm8 = vcmp.eq.s32.totalorder %v4683_v52, %v4529_v48  ;;  %vm2314_vm9 = vcmp.eq.s32.totalorder %v4688_v55, %v4529_v48  ;;  %v4776_v48 = vld [vmem:[%s4271_s19] ss:$0 sm:$0xff] }
  0x84   : > { %v2271_v24 = vadd.f32 %v3618_v47, %v2253_v44  ;;  %v3630_v51 = vsel %vm2313_vm8, 1.0, %v4169_v14  ;;  %v3631_v38 = vsel %vm2314_vm9, 1.0, %v4169_v14  ;;  %vm2331_vm10 = vcmp.eq.s32.totalorder %v4683_v52, %v4532_v49  ;;  %2634 = vmatpush.bf16.msra.mxu0 %v3832_v11  ;;  %3932 = vmatpush.bf16.msra.mxu3 %v3832_v11  ;;  %v4871_v11 = vld [vmem:[%s4271_s19 + $0x9] ss:$0 sm:$0xff] }
  0x85   : > { %v2272_v60 = vadd.f32 %v3619_v40, %v2254_v50  ;;  %vm2332_vm11 = vcmp.eq.s32.totalorder %v4688_v55, %v4532_v49  ;;  %v3634_v35 = vsel %vm2331_vm10, 1.0, %v4169_v14  ;;  %vm2349_vm12 = vcmp.eq.s32.totalorder %v4683_v52, %v4544_v59  ;;  %v4860_v40 = vld [vmem:[%s4271_s19 + $0x8] ss:$0 sm:$0xff]  ;;  %v4874_v50 = vld [vmem:[%s4271_s19 + $0xa] ss:$0 sm:$0xff] }
  0x86   : > { %v2289_v54 = vadd.f32 %v3622_v43, %v2271_v24  ;;  %v3635_v58 = vsel %vm2332_vm11, 1.0, %v4169_v14  ;;  %vm2350_vm13 = vcmp.eq.s32.totalorder %v4688_v55, %v4544_v59  ;;  %v3638_v8 = vsel %vm2349_vm12, 1.0, %v4169_v14 }
  0x87   : > { %v2290_v49 = vadd.f32 %v3623_v22, %v2272_v60  ;;  %v3639_v62 = vsel %vm2350_vm13, 1.0, %v4169_v14  ;;  %vm2367_vm14 = vcmp.eq.s32.totalorder %v4683_v52, %v4556_v15  ;;  %vm2368_vm15 = vcmp.eq.s32.totalorder %v4688_v55, %v4556_v15  ;;  %v4814_v55 = vld [vmem:[%s4271_s19 + $0x3] ss:$0 sm:$0xff] }
  0x88   : > { %v2307_v13 = vadd.f32 %v3626_v45, %v2289_v54  ;;  %v3642_v9 = vsel %vm2367_vm14, 1.0, %v4169_v14  ;;  %v3643_v59 = vsel %vm2368_vm15, 1.0, %v4169_v14  ;;  %v4796_v63 = vadd.s32 64, %v4277_v5 }
  0x89   : > { %v2308_v23 = vadd.f32 %v3627_v53, %v2290_v49  ;;  %v4799_v17 = vadd.s32 64, %v4280_v6  ;;  %v4802_v20 = vadd.s32 160, %v4277_v5  ;;  %v4805_v52 = vadd.s32 160, %v4280_v6 }
  0x8a   : > { %v2325_v15 = vadd.f32 %v3630_v51, %v2307_v13  ;;  %vm899_vm0 = vcmp.eq.s32.totalorder %v4796_v63, %v4776_v48  ;;  %vm917_vm1 = vcmp.eq.s32.totalorder %v4796_v63, %v4783_v12  ;;  %vm935_vm2 = vcmp.eq.s32.totalorder %v4796_v63, %v4786_v61  ;;  %v4898_v13 = vld [vmem:[%s4271_s19 + $0xc] ss:$0 sm:$0xff] }
  0x8b   : > { %v2326_v0 = vadd.f32 %v3631_v38, %v2308_v23  ;;  %vm900_vm3 = vcmp.eq.s32.totalorder %v4799_v17, %v4776_v48  ;;  %v3328_v26 = vsel %vm899_vm0, 1.0, %v4169_v14  ;;  %vm918_vm4 = vcmp.eq.s32.totalorder %v4799_v17, %v4783_v12 }
  0x8c   : > { %v2343_v2 = vadd.f32 %v3634_v35, %v2325_v15  ;;  %v3329_v16 = vsel %vm900_vm3, 1.0, %v4169_v14  ;;  %v3332_v4 = vsel %vm917_vm1, 1.0, %v4169_v14  ;;  %v3333_v28 = vsel %vm918_vm4, 1.0, %v4169_v14  ;;  %v4886_v35 = vld [vmem:[%s4271_s19 + $0xb] ss:$0 sm:$0xff] }
  0x8d   : > { %v2344_v29 = vadd.f32 %v3635_v58, %v2326_v0  ;;  %v929_v19 = vadd.f32 %v3332_v4, %v3328_v26  ;;  %v930_v7 = vadd.f32 %v3333_v28, %v3329_v16  ;;  %vm936_vm5 = vcmp.eq.s32.totalorder %v4799_v17, %v4786_v61 }
  0x8e   : > { %v2361_v33 = vadd.f32 %v3638_v8, %v2343_v2  ;;  %v3336_v36 = vsel %vm935_vm2, 1.0, %v4169_v14  ;;  %v3337_v21 = vsel %vm936_vm5, 1.0, %v4169_v14  ;;  %vm953_vm6 = vcmp.eq.s32.totalorder %v4796_v63, %v4814_v55  ;;  %v4913_v2 = vld [vmem:[%s4271_s19 + $0xe] ss:$0 sm:$0xff] }
  0x8f   : > { %v2362_v27 = vadd.f32 %v3639_v62, %v2344_v29  ;;  %v947_v37 = vadd.f32 %v3336_v36, %v929_v19  ;;  %v948_v30 = vadd.f32 %v3337_v21, %v930_v7  ;;  %vm954_vm7 = vcmp.eq.s32.totalorder %v4799_v17, %v4814_v55  ;;  %v4928_v36 = vld [vmem:[%s4271_s19] ss:$0 sm:$0xff] }
  0x90   : > { %v2379_v31 = vadd.f32 %v3642_v9, %v2361_v33  ;;  %v3340_v46 = vsel %vm953_vm6, 1.0, %v4169_v14  ;;  %v3341_v41 = vsel %vm954_vm7, 1.0, %v4169_v14  ;;  %vm971_vm8 = vcmp.eq.s32.totalorder %v4796_v63, %v4825_v18  ;;  %v4901_v9 = vld [vmem:[%s4271_s19 + $0xd] ss:$0 sm:$0xff]  ;;  %v4925_v33 = vld [vmem:[%s4271_s19 + $0xf] ss:$0 sm:$0xff] }
  0x91   : > { %v2380_v32 = vadd.f32 %v3643_v59, %v2362_v27  ;;  %v965_v10 = vadd.f32 %v3340_v46, %v947_v37  ;;  %v966_v39 = vadd.f32 %v3341_v41, %v948_v30  ;;  %vm972_vm9 = vcmp.eq.s32.totalorder %v4799_v17, %v4825_v18  ;;  %v4940_v46 = vld [vmem:[%s4271_s19 + $0x1] ss:$0 sm:$0xff] }
  0x92   : > { %v3344_v57 = vsel %vm971_vm8, 1.0, %v4169_v14  ;;  %v3345_v47 = vsel %vm972_vm9, 1.0, %v4169_v14  ;;  %vm989_vm10 = vcmp.eq.s32.totalorder %v4796_v63, %v4837_v25  ;;  %vm990_vm11 = vcmp.eq.s32.totalorder %v4799_v17, %v4837_v25 }
  0x93   : > { %v3911_v1 = vpack.c.bf16 %v2380_v32, %v2379_v31  ;;  %v983_v43 = vadd.f32 %v3344_v57, %v965_v10  ;;  %v984_v44 = vadd.f32 %v3345_v47, %v966_v39  ;;  %v3348_v22 = vsel %vm989_vm10, 1.0, %v4169_v14  ;;  %v4952_v47 = vld [vmem:[%s4271_s19 + $0x2] ss:$0 sm:$0xff] }
  0x94   : > { %v3349_v45 = vsel %vm990_vm11, 1.0, %v4169_v14  ;;  %vm1007_vm12 = vcmp.eq.s32.totalorder %v4796_v63, %v4846_v42  ;;  %vm1008_vm13 = vcmp.eq.s32.totalorder %v4799_v17, %v4846_v42  ;;  %vm1025_vm14 = vcmp.eq.s32.totalorder %v4796_v63, %v4849_v56 }
  0x95   : > { %3929 = vst [vmem:[#allocation2 + $0x60] sm:$0xff] %v3911_v1   ;;  %v1001_v53 = vadd.f32 %v3348_v22, %v983_v43  ;;  %v1002_v24 = vadd.f32 %v3349_v45, %v984_v44  ;;  %v3352_v51 = vsel %vm1007_vm12, 1.0, %v4169_v14  ;;  %v3353_v38 = vsel %vm1008_vm13, 1.0, %v4169_v14 }
  0x96   : > { %vm1026_vm15 = vcmp.eq.s32.totalorder %v4799_v17, %v4849_v56  ;;  %v3356_v60 = vsel %vm1025_vm14, 1.0, %v4169_v14  ;;  %vm1043_vm0 = vcmp.eq.s32.totalorder %v4796_v63, %v4860_v40  ;;  %vm1044_vm1 = vcmp.eq.s32.totalorder %v4799_v17, %v4860_v40 }
  0x97   : > { %v1019_v54 = vadd.f32 %v3352_v51, %v1001_v53  ;;  %v1020_v58 = vadd.f32 %v3353_v38, %v1002_v24  ;;  %v3357_v8 = vsel %vm1026_vm15, 1.0, %v4169_v14  ;;  %v3360_v49 = vsel %vm1043_vm0, 1.0, %v4169_v14 }
  0x98   : > { %v3361_v62 = vsel %vm1044_vm1, 1.0, %v4169_v14  ;;  %vm1061_vm2 = vcmp.eq.s32.totalorder %v4796_v63, %v4871_v11  ;;  %vm1062_vm3 = vcmp.eq.s32.totalorder %v4799_v17, %v4871_v11  ;;  %vm1079_vm4 = vcmp.eq.s32.totalorder %v4796_v63, %v4874_v50 }
  0x99   : > { %v1037_v59 = vadd.f32 %v3356_v60, %v1019_v54  ;;  %v1038_v23 = vadd.f32 %v3357_v8, %v1020_v58  ;;  %v3364_v15 = vsel %vm1061_vm2, 1.0, %v4169_v14  ;;  %v3365_v0 = vsel %vm1062_vm3, 1.0, %v4169_v14  ;;  %v4974_v54 = vld [vmem:[%s4271_s19 + $0x4] ss:$0 sm:$0xff] }
  0x9a   : > { %vm1080_vm5 = vcmp.eq.s32.totalorder %v4799_v17, %v4874_v50  ;;  %v3368_v26 = vsel %vm1079_vm4, 1.0, %v4169_v14  ;;  %vm1097_vm6 = vcmp.eq.s32.totalorder %v4796_v63, %v4886_v35  ;;  %vm1098_vm7 = vcmp.eq.s32.totalorder %v4799_v17, %v4886_v35 }
  0x9b   : > { %v1055_v16 = vadd.f32 %v3360_v49, %v1037_v59  ;;  %v1056_v4 = vadd.f32 %v3361_v62, %v1038_v23  ;;  %v3369_v28 = vsel %vm1080_vm5, 1.0, %v4169_v14  ;;  %v3372_v29 = vsel %vm1097_vm6, 1.0, %v4169_v14 }
  0x9c   : > { %v3838_v19 = vld [vmem:[#allocation2 + $0x60] sm:$0xff]  ;;  %v3373_v7 = vsel %vm1098_vm7, 1.0, %v4169_v14  ;;  %vm1115_vm8 = vcmp.eq.s32.totalorder %v4796_v63, %v4898_v13  ;;  %vm1116_vm9 = vcmp.eq.s32.totalorder %v4799_v17, %v4898_v13  ;;  %vm1133_vm10 = vcmp.eq.s32.totalorder %v4796_v63, %v4901_v9 }
  0x9d   : > { %v1073_v21 = vadd.f32 %v3364_v15, %v1055_v16  ;;  %v1074_v27 = vadd.f32 %v3365_v0, %v1056_v4  ;;  %v3376_v37 = vsel %vm1115_vm8, 1.0, %v4169_v14  ;;  %v3377_v30 = vsel %vm1116_vm9, 1.0, %v4169_v14  ;;  %2685 = vmatpush.bf16.msra.mxu1 %v3838_v19  ;;  %v4983_v15 = vld [vmem:[%s4271_s19 + $0x5] ss:$0 sm:$0xff]  ;;  %v4992_v19 = vld [vmem:[%s4271_s19 + $0x6] ss:$0 sm:$0xff] }
  0x9e   : > { %vm1134_vm11 = vcmp.eq.s32.totalorder %v4799_v17, %v4901_v9  ;;  %v3380_v31 = vsel %vm1133_vm10, 1.0, %v4169_v14  ;;  %vm1151_vm12 = vcmp.eq.s32.totalorder %v4796_v63, %v4913_v2  ;;  %vm1152_vm13 = vcmp.eq.s32.totalorder %v4799_v17, %v4913_v2 }
  0x9f   : > { %v1091_v41 = vadd.f32 %v3368_v26, %v1073_v21  ;;  %v1092_v32 = vadd.f32 %v3369_v28, %v1074_v27  ;;  %v3381_v10 = vsel %vm1134_vm11, 1.0, %v4169_v14  ;;  %v3384_v39 = vsel %vm1151_vm12, 1.0, %v4169_v14 }
  0xa0   : > { %v3385_v57 = vsel %vm1152_vm13, 1.0, %v4169_v14  ;;  %vm1169_vm14 = vcmp.eq.s32.totalorder %v4796_v63, %v4925_v33  ;;  %vm1170_vm15 = vcmp.eq.s32.totalorder %v4799_v17, %v4925_v33  ;;  %vm1799_vm0 = vcmp.eq.s32.totalorder %v4802_v20, %v4928_v36  ;;  %v4964_v17 = vld [vmem:[%s4271_s19 + $0x3] ss:$0 sm:$0xff] }
  0xa1   : > { %v1109_v1 = vadd.f32 %v3372_v29, %v1091_v41  ;;  %v1110_v43 = vadd.f32 %v3373_v7, %v1092_v32  ;;  %v3388_v44 = vsel %vm1169_vm14, 1.0, %v4169_v14  ;;  %v3389_v22 = vsel %vm1170_vm15, 1.0, %v4169_v14  ;;  %v4995_v7 = vld [vmem:[%s4271_s19 + $0x7] ss:$0 sm:$0xff]  ;;  %v5004_v32 = vld [vmem:[%s4271_s19 + $0x8] ss:$0 sm:$0xff] }
  0xa2   : > { %vm1800_vm1 = vcmp.eq.s32.totalorder %v4805_v52, %v4928_v36  ;;  %v3520_v63 = vsel %vm1799_vm0, 1.0, %v4169_v14  ;;  %vm1817_vm2 = vcmp.eq.s32.totalorder %v4802_v20, %v4940_v46  ;;  %vm1818_vm3 = vcmp.eq.s32.totalorder %v4805_v52, %v4940_v46 }
  0xa3   : > { %v1127_v45 = vadd.f32 %v3376_v37, %v1109_v1  ;;  %v1128_v53 = vadd.f32 %v3377_v30, %v1110_v43  ;;  %v3521_v24 = vsel %vm1800_vm1, 1.0, %v4169_v14  ;;  %v3524_v51 = vsel %vm1817_vm2, 1.0, %v4169_v14  ;;  %v5009_v43 = vld [vmem:[%s4271_s19 + $0x9] ss:$0 sm:$0xff] }
  0xa4   : > { %v3525_v38 = vsel %vm1818_vm3, 1.0, %v4169_v14  ;;  %v1829_v60 = vadd.f32 %v3524_v51, %v3520_v63  ;;  %vm1835_vm4 = vcmp.eq.s32.totalorder %v4802_v20, %v4952_v47  ;;  %vm1836_vm5 = vcmp.eq.s32.totalorder %v4805_v52, %v4952_v47 }
  0xa5   : > { %v1145_v58 = vadd.f32 %v3380_v31, %v1127_v45  ;;  %v1146_v8 = vadd.f32 %v3381_v10, %v1128_v53  ;;  %v1830_v49 = vadd.f32 %v3525_v38, %v3521_v24  ;;  %v3528_v62 = vsel %vm1835_vm4, 1.0, %v4169_v14  ;;  %v5022_v53 = vld [vmem:[%s4271_s19 + $0xa] ss:$0 sm:$0xff] }
  0xa6   : > { %v3529_v59 = vsel %vm1836_vm5, 1.0, %v4169_v14  ;;  %v1847_v23 = vadd.f32 %v3528_v62, %v1829_v60  ;;  %vm1853_vm6 = vcmp.eq.s32.totalorder %v4802_v20, %v4964_v17  ;;  %vm1854_vm7 = vcmp.eq.s32.totalorder %v4805_v52, %v4964_v17  ;;  %v5029_v60 = vld [vmem:[%s4271_s19 + $0xb] ss:$0 sm:$0xff] }
  0xa7   : > { %v1163_v0 = vadd.f32 %v3384_v39, %v1145_v58  ;;  %v1164_v26 = vadd.f32 %v3385_v57, %v1146_v8  ;;  %v1848_v16 = vadd.f32 %v3529_v59, %v1830_v49  ;;  %v3532_v4 = vsel %vm1853_vm6, 1.0, %v4169_v14  ;;  %v5037_v49 = vld [vmem:[%s4271_s19 + $0xc] ss:$0 sm:$0xff] }
  0xa8   : > { %v3533_v28 = vsel %vm1854_vm7, 1.0, %v4169_v14  ;;  %v1865_v29 = vadd.f32 %v3532_v4, %v1847_v23  ;;  %vm1871_vm8 = vcmp.eq.s32.totalorder %v4802_v20, %v4974_v54  ;;  %vm1872_vm9 = vcmp.eq.s32.totalorder %v4805_v52, %v4974_v54 }
  0xa9   : > { %v1181_v21 = vadd.f32 %v3388_v44, %v1163_v0  ;;  %v1182_v27 = vadd.f32 %v3389_v22, %v1164_v26  ;;  %v1866_v37 = vadd.f32 %v3533_v28, %v1848_v16  ;;  %v3536_v30 = vsel %vm1871_vm8, 1.0, %v4169_v14  ;;  %v5049_v16 = vld [vmem:[%s4271_s19 + $0xd] ss:$0 sm:$0xff] }
  0xaa   : > { %v3537_v31 = vsel %vm1872_vm9, 1.0, %v4169_v14  ;;  %v1883_v41 = vadd.f32 %v3536_v30, %v1865_v29  ;;  %vm1889_vm10 = vcmp.eq.s32.totalorder %v4802_v20, %v4983_v15  ;;  %vm1890_vm11 = vcmp.eq.s32.totalorder %v4805_v52, %v4983_v15  ;;  %v5064_v30 = vld [vmem:[%s4271_s19 + $0xf] ss:$0 sm:$0xff] }
  0xab   : > { %v3876_v10 = vpack.c.bf16 %v1182_v27, %v1181_v21  ;;  %v1884_v39 = vadd.f32 %v3537_v31, %v1866_v37  ;;  %v3540_v57 = vsel %vm1889_vm10, 1.0, %v4169_v14  ;;  %v3541_v1 = vsel %vm1890_vm11, 1.0, %v4169_v14  ;;  %v5056_v21 = vld [vmem:[%s4271_s19 + $0xe] ss:$0 sm:$0xff] }
  0xac   : > { %v1901_v44 = vadd.f32 %v3540_v57, %v1883_v41  ;;  %vm1907_vm12 = vcmp.eq.s32.totalorder %v4802_v20, %v4992_v19  ;;  %vm1908_vm13 = vcmp.eq.s32.totalorder %v4805_v52, %v4992_v19  ;;  %vm1925_vm14 = vcmp.eq.s32.totalorder %v4802_v20, %v4995_v7 }
  0xad   : > { %3922 = vst [vmem:[#allocation2 + $0x68] sm:$0xff] %v3876_v10   ;;  %v1902_v22 = vadd.f32 %v3541_v1, %v1884_v39  ;;  %v3544_v63 = vsel %vm1907_vm12, 1.0, %v4169_v14  ;;  %v3545_v45 = vsel %vm1908_vm13, 1.0, %v4169_v14  ;;  %vm1926_vm15 = vcmp.eq.s32.totalorder %v4805_v52, %v4995_v7 }
  0xae   : > { %v1919_v24 = vadd.f32 %v3544_v63, %v1901_v44  ;;  %v3548_v51 = vsel %vm1925_vm14, 1.0, %v4169_v14  ;;  %v3549_v38 = vsel %vm1926_vm15, 1.0, %v4169_v14  ;;  %vm1943_vm0 = vcmp.eq.s32.totalorder %v4802_v20, %v5004_v32 }
  0xaf   : > { %v1920_v58 = vadd.f32 %v3545_v45, %v1902_v22  ;;  %vm1944_vm1 = vcmp.eq.s32.totalorder %v4805_v52, %v5004_v32  ;;  %v3552_v8 = vsel %vm1943_vm0, 1.0, %v4169_v14  ;;  %vm1961_vm2 = vcmp.eq.s32.totalorder %v4802_v20, %v5009_v43 }
  0xb0   : > { %v1937_v62 = vadd.f32 %v3548_v51, %v1919_v24  ;;  %v3553_v59 = vsel %vm1944_vm1, 1.0, %v4169_v14  ;;  %vm1962_vm3 = vcmp.eq.s32.totalorder %v4805_v52, %v5009_v43  ;;  %v3556_v23 = vsel %vm1961_vm2, 1.0, %v4169_v14 }
  0xb1   : > { %v1938_v0 = vadd.f32 %v3549_v38, %v1920_v58  ;;  %v3557_v26 = vsel %vm1962_vm3, 1.0, %v4169_v14  ;;  %vm1979_vm4 = vcmp.eq.s32.totalorder %v4802_v20, %v5022_v53  ;;  %vm1980_vm5 = vcmp.eq.s32.totalorder %v4805_v52, %v5022_v53 }
  0xb2   : > { %v1955_v4 = vadd.f32 %v3552_v8, %v1937_v62  ;;  %v3560_v28 = vsel %vm1979_vm4, 1.0, %v4169_v14  ;;  %v3561_v29 = vsel %vm1980_vm5, 1.0, %v4169_v14  ;;  %vm1997_vm6 = vcmp.eq.s32.totalorder %v4802_v20, %v5029_v60 }
  0xb3   : > { %v1956_v27 = vadd.f32 %v3553_v59, %v1938_v0  ;;  %vm1998_vm7 = vcmp.eq.s32.totalorder %v4805_v52, %v5029_v60  ;;  %v3564_v37 = vsel %vm1997_vm6, 1.0, %v4169_v14  ;;  %vm2015_vm8 = vcmp.eq.s32.totalorder %v4802_v20, %v5037_v49 }
  0xb4   : > { %v3831_v31 = vld [vmem:[#allocation2 + $0x68] sm:$0xff]  ;;  %v1973_v41 = vadd.f32 %v3556_v23, %v1955_v4  ;;  %v3565_v10 = vsel %vm1998_vm7, 1.0, %v4169_v14  ;;  %vm2016_vm9 = vcmp.eq.s32.totalorder %v4805_v52, %v5037_v49  ;;  %v3568_v39 = vsel %vm2015_vm8, 1.0, %v4169_v14 }
  0xb5   : > { %v1974_v57 = vadd.f32 %v3557_v26, %v1956_v27  ;;  %v3569_v1 = vsel %vm2016_vm9, 1.0, %v4169_v14  ;;  %vm2033_vm10 = vcmp.eq.s32.totalorder %v4802_v20, %v5049_v16  ;;  %vm2034_vm11 = vcmp.eq.s32.totalorder %v4805_v52, %v5049_v16  ;;  %2635 = vmatpush.bf16.msra.mxu0 %v3831_v31  ;;  %3933 = vmatpush.bf16.msra.mxu3 %v3831_v31 }
  0xb6   : > { %v1991_v44 = vadd.f32 %v3560_v28, %v1973_v41  ;;  %v3572_v22 = vsel %vm2033_vm10, 1.0, %v4169_v14  ;;  %v3573_v63 = vsel %vm2034_vm11, 1.0, %v4169_v14  ;;  %vm2051_vm12 = vcmp.eq.s32.totalorder %v4802_v20, %v5056_v21 }
  0xb7   : > { %v1992_v45 = vadd.f32 %v3561_v29, %v1974_v57  ;;  %vm2052_vm13 = vcmp.eq.s32.totalorder %v4805_v52, %v5056_v21  ;;  %v3576_v24 = vsel %vm2051_vm12, 1.0, %v4169_v14  ;;  %vm2069_vm14 = vcmp.eq.s32.totalorder %v4802_v20, %v5064_v30 }
  0xb8   : > { %v2009_v51 = vadd.f32 %v3564_v37, %v1991_v44  ;;  %v3577_v38 = vsel %vm2052_vm13, 1.0, %v4169_v14  ;;  %vm2070_vm15 = vcmp.eq.s32.totalorder %v4805_v52, %v5064_v30  ;;  %v3580_v58 = vsel %vm2069_vm14, 1.0, %v4169_v14 }
  0xb9   : > { %v2010_v8 = vadd.f32 %v3565_v10, %v1992_v45  ;;  %v3581_v62 = vsel %vm2070_vm15, 1.0, %v4169_v14  ;;  %v5090_v59 = vadd.s32 64, %v4269_v3  ;;  %v5093_v23 = vadd.s32 64, %v4448_v34 }
  0xba   : > { %v2027_v0 = vadd.f32 %v3568_v39, %v2009_v51  ;;  %v5096_v20 = vadd.s32 160, %v4269_v3  ;;  %v5099_v26 = vadd.s32 160, %v4448_v34  ;;  %v5102_v52 = vadd.s32 32, %v4277_v5 }
  0xbb   : > { %v2028_v4 = vadd.f32 %v3569_v1, %v2010_v8  ;;  %vm897_vm0 = vcmp.eq.s32.totalorder %v5090_v59, %v4776_v48  ;;  %vm898_vm1 = vcmp.eq.s32.totalorder %v5093_v23, %v4776_v48  ;;  %vm915_vm2 = vcmp.eq.s32.totalorder %v5090_v59, %v4783_v12 }
  0xbc   : > { %v2045_v28 = vadd.f32 %v3572_v22, %v2027_v0  ;;  %v3326_v29 = vsel %vm897_vm0, 1.0, %v4169_v14  ;;  %v3327_v27 = vsel %vm898_vm1, 1.0, %v4169_v14  ;;  %vm916_vm3 = vcmp.eq.s32.totalorder %v5093_v23, %v4783_v12 }
  0xbd   : > { %v2046_v37 = vadd.f32 %v3573_v63, %v2028_v4  ;;  %v3330_v31 = vsel %vm915_vm2, 1.0, %v4169_v14  ;;  %v3331_v41 = vsel %vm916_vm3, 1.0, %v4169_v14  ;;  %vm933_vm4 = vcmp.eq.s32.totalorder %v5090_v59, %v4786_v61 }
  0xbe   : > { %v2063_v48 = vadd.f32 %v3576_v24, %v2045_v28  ;;  %v927_v10 = vadd.f32 %v3330_v31, %v3326_v29  ;;  %v928_v39 = vadd.f32 %v3331_v41, %v3327_v27  ;;  %vm934_vm5 = vcmp.eq.s32.totalorder %v5093_v23, %v4786_v61 }
  0xbf   : > { %v2064_v57 = vadd.f32 %v3577_v38, %v2046_v37  ;;  %v3334_v1 = vsel %vm933_vm4, 1.0, %v4169_v14  ;;  %v3335_v44 = vsel %vm934_vm5, 1.0, %v4169_v14  ;;  %vm951_vm6 = vcmp.eq.s32.totalorder %v5090_v59, %v4814_v55 }
  0xc0   : > { %v2081_v12 = vadd.f32 %v3580_v58, %v2063_v48  ;;  %v945_v22 = vadd.f32 %v3334_v1, %v927_v10  ;;  %v946_v63 = vadd.f32 %v3335_v44, %v928_v39  ;;  %vm952_vm7 = vcmp.eq.s32.totalorder %v5093_v23, %v4814_v55 }
  0xc1   : > { %v2082_v45 = vadd.f32 %v3581_v62, %v2064_v57  ;;  %v3338_v24 = vsel %vm951_vm6, 1.0, %v4169_v14  ;;  %v3339_v51 = vsel %vm952_vm7, 1.0, %v4169_v14  ;;  %vm969_vm8 = vcmp.eq.s32.totalorder %v5090_v59, %v4825_v18 }
  0xc2   : > { %v963_v61 = vadd.f32 %v3338_v24, %v945_v22  ;;  %v964_v38 = vadd.f32 %v3339_v51, %v946_v63  ;;  %vm970_vm9 = vcmp.eq.s32.totalorder %v5093_v23, %v4825_v18  ;;  %v3342_v58 = vsel %vm969_vm8, 1.0, %v4169_v14 }
  0xc3   : > { %v3906_v8 = vpack.c.bf16 %v2082_v45, %v2081_v12  ;;  %v3343_v0 = vsel %vm970_vm9, 1.0, %v4169_v14  ;;  %vm987_vm10 = vcmp.eq.s32.totalorder %v5090_v59, %v4837_v25  ;;  %vm988_vm11 = vcmp.eq.s32.totalorder %v5093_v23, %v4837_v25 }
  0xc4   : > { %v981_v55 = vadd.f32 %v3342_v58, %v963_v61  ;;  %v982_v62 = vadd.f32 %v3343_v0, %v964_v38  ;;  %v3346_v4 = vsel %vm987_vm10, 1.0, %v4169_v14  ;;  %v3347_v28 = vsel %vm988_vm11, 1.0, %v4169_v14 }
  0xc5   : > { %3928 = vst [vmem:[#allocation2 + $0x38] sm:$0xff] %v3906_v8   ;;  %vm1005_vm12 = vcmp.eq.s32.totalorder %v5090_v59, %v4846_v42  ;;  %vm1006_vm13 = vcmp.eq.s32.totalorder %v5093_v23, %v4846_v42  ;;  %vm1023_vm14 = vcmp.eq.s32.totalorder %v5090_v59, %v4849_v56  ;;  %vm1024_vm15 = vcmp.eq.s32.totalorder %v5093_v23, %v4849_v56 }
  0xc6   : > { %v999_v18 = vadd.f32 %v3346_v4, %v981_v55  ;;  %v1000_v25 = vadd.f32 %v3347_v28, %v982_v62  ;;  %v3350_v29 = vsel %vm1005_vm12, 1.0, %v4169_v14  ;;  %v3351_v27 = vsel %vm1006_vm13, 1.0, %v4169_v14 }
  0xc7   : > { %v3354_v37 = vsel %vm1023_vm14, 1.0, %v4169_v14  ;;  %v3355_v31 = vsel %vm1024_vm15, 1.0, %v4169_v14  ;;  %vm1041_vm0 = vcmp.eq.s32.totalorder %v5090_v59, %v4860_v40  ;;  %vm1042_vm1 = vcmp.eq.s32.totalorder %v5093_v23, %v4860_v40 }
  0xc8   : > { %v1017_v42 = vadd.f32 %v3350_v29, %v999_v18  ;;  %v1018_v41 = vadd.f32 %v3351_v27, %v1000_v25  ;;  %v3358_v56 = vsel %vm1041_vm0, 1.0, %v4169_v14  ;;  %v3359_v48 = vsel %vm1042_vm1, 1.0, %v4169_v14 }
  0xc9   : > { %vm1059_vm2 = vcmp.eq.s32.totalorder %v5090_v59, %v4871_v11  ;;  %vm1060_vm3 = vcmp.eq.s32.totalorder %v5093_v23, %v4871_v11  ;;  %vm1077_vm4 = vcmp.eq.s32.totalorder %v5090_v59, %v4874_v50  ;;  %vm1078_vm5 = vcmp.eq.s32.totalorder %v5093_v23, %v4874_v50 }
  0xca   : > { %v1035_v10 = vadd.f32 %v3354_v37, %v1017_v42  ;;  %v1036_v40 = vadd.f32 %v3355_v31, %v1018_v41  ;;  %v3362_v39 = vsel %vm1059_vm2, 1.0, %v4169_v14  ;;  %v3363_v57 = vsel %vm1060_vm3, 1.0, %v4169_v14 }
  0xcb   : > { %v3366_v1 = vsel %vm1077_vm4, 1.0, %v4169_v14  ;;  %v3367_v44 = vsel %vm1078_vm5, 1.0, %v4169_v14  ;;  %vm1095_vm6 = vcmp.eq.s32.totalorder %v5090_v59, %v4886_v35  ;;  %vm1096_vm7 = vcmp.eq.s32.totalorder %v5093_v23, %v4886_v35 }
  0xcc   : > { %v3837_v11 = vld [vmem:[#allocation2 + $0x38] sm:$0xff]  ;;  %v1053_v12 = vadd.f32 %v3358_v56, %v1035_v10  ;;  %v1054_v22 = vadd.f32 %v3359_v48, %v1036_v40  ;;  %v3370_v50 = vsel %vm1095_vm6, 1.0, %v4169_v14  ;;  %v3371_v63 = vsel %vm1096_vm7, 1.0, %v4169_v14 }
  0xcd   : > { %vm1113_vm8 = vcmp.eq.s32.totalorder %v5090_v59, %v4898_v13  ;;  %vm1114_vm9 = vcmp.eq.s32.totalorder %v5093_v23, %v4898_v13  ;;  %vm1131_vm10 = vcmp.eq.s32.totalorder %v5090_v59, %v4901_v9  ;;  %vm1132_vm11 = vcmp.eq.s32.totalorder %v5093_v23, %v4901_v9  ;;  %2686 = vmatpush.bf16.msra.mxu1 %v3837_v11 }
  0xce   : > { %v1071_v35 = vadd.f32 %v3362_v39, %v1053_v12  ;;  %v1072_v45 = vadd.f32 %v3363_v57, %v1054_v22  ;;  %v3374_v24 = vsel %vm1113_vm8, 1.0, %v4169_v14  ;;  %v3375_v51 = vsel %vm1114_vm9, 1.0, %v4169_v14 }
  0xcf   : > { %v3378_v61 = vsel %vm1131_vm10, 1.0, %v4169_v14  ;;  %v3379_v38 = vsel %vm1132_vm11, 1.0, %v4169_v14  ;;  %vm1149_vm12 = vcmp.eq.s32.totalorder %v5090_v59, %v4913_v2  ;;  %vm1150_vm13 = vcmp.eq.s32.totalorder %v5093_v23, %v4913_v2 }
  0xd0   : > { %v1089_v13 = vadd.f32 %v3366_v1, %v1071_v35  ;;  %v1090_v58 = vadd.f32 %v3367_v44, %v1072_v45  ;;  %v3382_v9 = vsel %vm1149_vm12, 1.0, %v4169_v14  ;;  %v3383_v8 = vsel %vm1150_vm13, 1.0, %v4169_v14 }
  0xd1   : > { %vm1167_vm14 = vcmp.eq.s32.totalorder %v5090_v59, %v4925_v33  ;;  %vm1168_vm15 = vcmp.eq.s32.totalorder %v5093_v23, %v4925_v33  ;;  %vm1797_vm0 = vcmp.eq.s32.totalorder %v5096_v20, %v4928_v36  ;;  %vm1798_vm1 = vcmp.eq.s32.totalorder %v5099_v26, %v4928_v36 }
  0xd2   : > { %v1107_v0 = vadd.f32 %v3370_v50, %v1089_v13  ;;  %v1108_v2 = vadd.f32 %v3371_v63, %v1090_v58  ;;  %v3386_v55 = vsel %vm1167_vm14, 1.0, %v4169_v14  ;;  %v3387_v62 = vsel %vm1168_vm15, 1.0, %v4169_v14 }
  0xd3   : > { %v3518_v4 = vsel %vm1797_vm0, 1.0, %v4169_v14  ;;  %v3519_v28 = vsel %vm1798_vm1, 1.0, %v4169_v14  ;;  %vm1815_vm2 = vcmp.eq.s32.totalorder %v5096_v20, %v4940_v46  ;;  %vm1816_vm3 = vcmp.eq.s32.totalorder %v5099_v26, %v4940_v46 }
  0xd4   : > { %v1125_v33 = vadd.f32 %v3374_v24, %v1107_v0  ;;  %v1126_v59 = vadd.f32 %v3375_v51, %v1108_v2  ;;  %v3522_v36 = vsel %vm1815_vm2, 1.0, %v4169_v14  ;;  %v3523_v23 = vsel %vm1816_vm3, 1.0, %v4169_v14 }
  0xd5   : > { %v1827_v18 = vadd.f32 %v3522_v36, %v3518_v4  ;;  %v1828_v25 = vadd.f32 %v3523_v23, %v3519_v28  ;;  %vm1833_vm4 = vcmp.eq.s32.totalorder %v5096_v20, %v4952_v47  ;;  %vm1834_vm5 = vcmp.eq.s32.totalorder %v5099_v26, %v4952_v47 }
  0xd6   : > { %v1143_v29 = vadd.f32 %v3378_v61, %v1125_v33  ;;  %v1144_v27 = vadd.f32 %v3379_v38, %v1126_v59  ;;  %v3526_v37 = vsel %vm1833_vm4, 1.0, %v4169_v14  ;;  %v3527_v46 = vsel %vm1834_vm5, 1.0, %v4169_v14 }
  0xd7   : > { %v1845_v31 = vadd.f32 %v3526_v37, %v1827_v18  ;;  %v1846_v42 = vadd.f32 %v3527_v46, %v1828_v25  ;;  %vm1851_vm6 = vcmp.eq.s32.totalorder %v5096_v20, %v4964_v17  ;;  %vm1852_vm7 = vcmp.eq.s32.totalorder %v5099_v26, %v4964_v17  ;;  %v5300_v25 = vld [vmem:[%s4271_s19 + $0x2] ss:$0 sm:$0xff] }
  0xd8   : > { %v1161_v41 = vadd.f32 %v3382_v9, %v1143_v29  ;;  %v1162_v56 = vadd.f32 %v3383_v8, %v1144_v27  ;;  %v3530_v48 = vsel %vm1851_vm6, 1.0, %v4169_v14  ;;  %v3531_v47 = vsel %vm1852_vm7, 1.0, %v4169_v14 }
  0xd9   : > { %v1863_v10 = vadd.f32 %v3530_v48, %v1845_v31  ;;  %v1864_v40 = vadd.f32 %v3531_v47, %v1846_v42  ;;  %vm1869_vm8 = vcmp.eq.s32.totalorder %v5096_v20, %v4974_v54  ;;  %vm1870_vm9 = vcmp.eq.s32.totalorder %v5099_v26, %v4974_v54  ;;  %v5324_v48 = vld [vmem:[%s4271_s19 + $0x4] ss:$0 sm:$0xff] }
  0xda   : > { %v1179_v39 = vadd.f32 %v3386_v55, %v1161_v41  ;;  %v1180_v57 = vadd.f32 %v3387_v62, %v1162_v56  ;;  %v3534_v1 = vsel %vm1869_vm8, 1.0, %v4169_v14  ;;  %v3535_v17 = vsel %vm1870_vm9, 1.0, %v4169_v14 }
  0xdb   : > { %v1881_v44 = vadd.f32 %v3534_v1, %v1863_v10  ;;  %v1882_v11 = vadd.f32 %v3535_v17, %v1864_v40  ;;  %vm1887_vm10 = vcmp.eq.s32.totalorder %v5096_v20, %v4983_v15  ;;  %vm1888_vm11 = vcmp.eq.s32.totalorder %v5099_v26, %v4983_v15  ;;  %v5334_v17 = vld [vmem:[%s4271_s19 + $0x5] ss:$0 sm:$0xff] }
  0xdc   : > { %v3871_v12 = vpack.c.bf16 %v1180_v57, %v1179_v39  ;;  %v3538_v22 = vsel %vm1887_vm10, 1.0, %v4169_v14  ;;  %v3539_v50 = vsel %vm1888_vm11, 1.0, %v4169_v14  ;;  %vm1905_vm12 = vcmp.eq.s32.totalorder %v5096_v20, %v4992_v19 }
  0xdd   : > { %v1899_v54 = vadd.f32 %v3538_v22, %v1881_v44  ;;  %v1900_v63 = vadd.f32 %v3539_v50, %v1882_v11  ;;  %vm1906_vm13 = vcmp.eq.s32.totalorder %v5099_v26, %v4992_v19  ;;  %v3542_v35 = vsel %vm1905_vm12, 1.0, %v4169_v14 }
  0xde   : > { %3921 = vst [vmem:[#allocation2 + $0x50] sm:$0xff] %v3871_v12   ;;  %v3543_v45 = vsel %vm1906_vm13, 1.0, %v4169_v14  ;;  %vm1923_vm14 = vcmp.eq.s32.totalorder %v5096_v20, %v4995_v7  ;;  %vm1924_vm15 = vcmp.eq.s32.totalorder %v5099_v26, %v4995_v7  ;;  %vm1941_vm0 = vcmp.eq.s32.totalorder %v5096_v20, %v5004_v32 }
  0xdf   : > { %v1917_v15 = vadd.f32 %v3542_v35, %v1899_v54  ;;  %v1918_v24 = vadd.f32 %v3543_v45, %v1900_v63  ;;  %v3546_v51 = vsel %vm1923_vm14, 1.0, %v4169_v14  ;;  %v3547_v19 = vsel %vm1924_vm15, 1.0, %v4169_v14  ;;  %v5343_v63 = vld [vmem:[%s4271_s19 + $0x6] ss:$0 sm:$0xff] }
  0xe0   : > { %vm1942_vm1 = vcmp.eq.s32.totalorder %v5099_v26, %v5004_v32  ;;  %v3550_v61 = vsel %vm1941_vm0, 1.0, %v4169_v14  ;;  %vm1959_vm2 = vcmp.eq.s32.totalorder %v5096_v20, %v5009_v43  ;;  %vm1960_vm3 = vcmp.eq.s32.totalorder %v5099_v26, %v5009_v43 }
  0xe1   : > { %v1935_v7 = vadd.f32 %v3546_v51, %v1917_v15  ;;  %v1936_v38 = vadd.f32 %v3547_v19, %v1918_v24  ;;  %v3551_v13 = vsel %vm1942_vm1, 1.0, %v4169_v14  ;;  %v3554_v58 = vsel %vm1959_vm2, 1.0, %v4169_v14  ;;  %v5347_v51 = vld [vmem:[%s4271_s19 + $0x7] ss:$0 sm:$0xff] }
  0xe2   : > { %v3555_v9 = vsel %vm1960_vm3, 1.0, %v4169_v14  ;;  %vm1977_vm4 = vcmp.eq.s32.totalorder %v5096_v20, %v5022_v53  ;;  %vm1978_vm5 = vcmp.eq.s32.totalorder %v5099_v26, %v5022_v53  ;;  %vm1995_vm6 = vcmp.eq.s32.totalorder %v5096_v20, %v5029_v60 }
  0xe3   : > { %v1953_v32 = vadd.f32 %v3550_v61, %v1935_v7  ;;  %v1954_v8 = vadd.f32 %v3551_v13, %v1936_v38  ;;  %v3558_v43 = vsel %vm1977_vm4, 1.0, %v4169_v14  ;;  %v3559_v0 = vsel %vm1978_vm5, 1.0, %v4169_v14 }
  0xe4   : > { %vm1996_vm7 = vcmp.eq.s32.totalorder %v5099_v26, %v5029_v60  ;;  %v3562_v2 = vsel %vm1995_vm6, 1.0, %v4169_v14  ;;  %vm2013_vm8 = vcmp.eq.s32.totalorder %v5096_v20, %v5037_v49  ;;  %vm2014_vm9 = vcmp.eq.s32.totalorder %v5099_v26, %v5037_v49  ;;  %v5285_v60 = vld [vmem:[%s4271_s19] ss:$0 sm:$0xff]  ;;  %v5288_v49 = vld [vmem:[%s4271_s19 + $0x1] ss:$0 sm:$0xff] }
  0xe5   : > { %v3830_v53 = vld [vmem:[#allocation2 + $0x50] sm:$0xff]  ;;  %v1971_v55 = vadd.f32 %v3554_v58, %v1953_v32  ;;  %v1972_v62 = vadd.f32 %v3555_v9, %v1954_v8  ;;  %v3563_v4 = vsel %vm1996_vm7, 1.0, %v4169_v14  ;;  %v3566_v28 = vsel %vm2013_vm8, 1.0, %v4169_v14  ;;  %v5358_v58 = vld [vmem:[%s4271_s19 + $0x8] ss:$0 sm:$0xff] }
  0xe6   : > { %v3567_v33 = vsel %vm2014_vm9, 1.0, %v4169_v14  ;;  %vm2031_vm10 = vcmp.eq.s32.totalorder %v5096_v20, %v5049_v16  ;;  %vm2032_vm11 = vcmp.eq.s32.totalorder %v5099_v26, %v5049_v16  ;;  %vm2049_vm12 = vcmp.eq.s32.totalorder %v5096_v20, %v5056_v21  ;;  %2636 = vmatpush.bf16.msra.mxu0 %v3830_v53  ;;  %3934 = vmatpush.bf16.msra.mxu3 %v3830_v53  ;;  %v5373_v53 = vld [vmem:[%s4271_s19 + $0xa] ss:$0 sm:$0xff] }
  0xe7   : > { %v1989_v59 = vadd.f32 %v3558_v43, %v1971_v55  ;;  %v1990_v36 = vadd.f32 %v3559_v0, %v1972_v62  ;;  %v3570_v23 = vsel %vm2031_vm10, 1.0, %v4169_v14  ;;  %v3571_v18 = vsel %vm2032_vm11, 1.0, %v4169_v14  ;;  %v5365_v43 = vld [vmem:[%s4271_s19 + $0x9] ss:$0 sm:$0xff] }
  0xe8   : > { %vm2050_vm13 = vcmp.eq.s32.totalorder %v5099_v26, %v5056_v21  ;;  %v3574_v16 = vsel %vm2049_vm12, 1.0, %v4169_v14  ;;  %vm2067_vm14 = vcmp.eq.s32.totalorder %v5096_v20, %v5064_v30  ;;  %vm2068_vm15 = vcmp.eq.s32.totalorder %v5099_v26, %v5064_v30  ;;  %v5313_v30 = vld [vmem:[%s4271_s19 + $0x3] ss:$0 sm:$0xff] }
  0xe9   : > { %v2007_v29 = vadd.f32 %v3562_v2, %v1989_v59  ;;  %v2008_v27 = vadd.f32 %v3563_v4, %v1990_v36  ;;  %v3575_v37 = vsel %vm2050_vm13, 1.0, %v4169_v14  ;;  %v3578_v46 = vsel %vm2067_vm14, 1.0, %v4169_v14  ;;  %v5385_v59 = vld [vmem:[%s4271_s19 + $0xb] ss:$0 sm:$0xff] }
  0xea   : > { %v3579_v31 = vsel %vm2068_vm15, 1.0, %v4169_v14  ;;  %v5306_v21 = vadd.s32 32, %v4280_v6  ;;  %vm599_vm0 = vcmp.eq.s32.totalorder %v5102_v52, %v5285_v60  ;;  %vm617_vm1 = vcmp.eq.s32.totalorder %v5102_v52, %v5288_v49 }
  0xeb   : > { %v2025_v20 = vadd.f32 %v3566_v28, %v2007_v29  ;;  %v2026_v26 = vadd.f32 %v3567_v33, %v2008_v27  ;;  %v3264_v42 = vsel %vm599_vm0, 1.0, %v4169_v14  ;;  %v3268_v41 = vsel %vm617_vm1, 1.0, %v4169_v14 }
  0xec   : > { %vm600_vm2 = vcmp.eq.s32.totalorder %v5306_v21, %v5285_v60  ;;  %vm618_vm3 = vcmp.eq.s32.totalorder %v5306_v21, %v5288_v49  ;;  %v629_v56 = vadd.f32 %v3268_v41, %v3264_v42  ;;  %vm635_vm4 = vcmp.eq.s32.totalorder %v5102_v52, %v5300_v25  ;;  %v5412_v41 = vld [vmem:[%s4271_s19 + $0xe] ss:$0 sm:$0xff] }
  0xed   : > { %v2043_v47 = vadd.f32 %v3570_v23, %v2025_v20  ;;  %v2044_v10 = vadd.f32 %v3571_v18, %v2026_v26  ;;  %v3265_v40 = vsel %vm600_vm2, 1.0, %v4169_v14  ;;  %v3269_v39 = vsel %vm618_vm3, 1.0, %v4169_v14 }
  0xee   : > { %v630_v57 = vadd.f32 %v3269_v39, %v3265_v40  ;;  %vm636_vm5 = vcmp.eq.s32.totalorder %v5306_v21, %v5300_v25  ;;  %v3272_v1 = vsel %vm635_vm4, 1.0, %v4169_v14  ;;  %vm653_vm6 = vcmp.eq.s32.totalorder %v5102_v52, %v5313_v30  ;;  %v5419_v39 = vld [vmem:[%s4271_s19 + $0xf] ss:$0 sm:$0xff] }
  0xef   : > { %v2061_v44 = vadd.f32 %v3574_v16, %v2043_v47  ;;  %v2062_v11 = vadd.f32 %v3575_v37, %v2044_v10  ;;  %v3273_v12 = vsel %vm636_vm5, 1.0, %v4169_v14  ;;  %v647_v22 = vadd.f32 %v3272_v1, %v629_v56  ;;  %v5392_v16 = vld [vmem:[%s4271_s19 + $0xc] ss:$0 sm:$0xff]  ;;  %v5400_v37 = vld [vmem:[%s4271_s19 + $0xd] ss:$0 sm:$0xff] }
  0xf0   : > { %v648_v50 = vadd.f32 %v3273_v12, %v630_v57  ;;  %vm654_vm7 = vcmp.eq.s32.totalorder %v5306_v21, %v5313_v30  ;;  %v3276_v54 = vsel %vm653_vm6, 1.0, %v4169_v14  ;;  %vm671_vm8 = vcmp.eq.s32.totalorder %v5102_v52, %v5324_v48 }
  0xf1   : > { %v2079_v35 = vadd.f32 %v3578_v46, %v2061_v44  ;;  %v2080_v45 = vadd.f32 %v3579_v31, %v2062_v11  ;;  %v3277_v15 = vsel %vm654_vm7, 1.0, %v4169_v14  ;;  %v665_v24 = vadd.f32 %v3276_v54, %v647_v22  ;;  %v5431_v22 = vld [vmem:[%s4271_s19] ss:$0 sm:$0xff] }
  0xf2   : > { %v666_v19 = vadd.f32 %v3277_v15, %v648_v50  ;;  %vm672_vm9 = vcmp.eq.s32.totalorder %v5306_v21, %v5324_v48  ;;  %v3280_v61 = vsel %vm671_vm8, 1.0, %v4169_v14  ;;  %vm689_vm10 = vcmp.eq.s32.totalorder %v5102_v52, %v5334_v17 }
  0xf3   : > { %v3901_v7 = vpack.c.bf16 %v2080_v45, %v2079_v35  ;;  %v3281_v38 = vsel %vm672_vm9, 1.0, %v4169_v14  ;;  %v683_v13 = vadd.f32 %v3280_v61, %v665_v24  ;;  %vm690_vm11 = vcmp.eq.s32.totalorder %v5306_v21, %v5334_v17  ;;  %v5439_v35 = vld [vmem:[%s4271_s19 + $0x1] ss:$0 sm:$0xff]  ;;  %v5442_v45 = vld [vmem:[%s4271_s19 + $0x2] ss:$0 sm:$0xff] }
  0xf4   : > { %v684_v9 = vadd.f32 %v3281_v38, %v666_v19  ;;  %v3284_v32 = vsel %vm689_vm10, 1.0, %v4169_v14  ;;  %v3285_v8 = vsel %vm690_vm11, 1.0, %v4169_v14  ;;  %vm707_vm12 = vcmp.eq.s32.totalorder %v5102_v52, %v5343_v63 }
  0xf5   : > { %3927 = vst [vmem:[#allocation2 + $0x10] sm:$0xff] %v3901_v7   ;;  %v701_v0 = vadd.f32 %v3284_v32, %v683_v13  ;;  %vm708_vm13 = vcmp.eq.s32.totalorder %v5306_v21, %v5343_v63  ;;  %v3288_v2 = vsel %vm707_vm12, 1.0, %v4169_v14  ;;  %vm725_vm14 = vcmp.eq.s32.totalorder %v5102_v52, %v5347_v51 }
  0xf6   : > { %v702_v55 = vadd.f32 %v3285_v8, %v684_v9  ;;  %v3289_v62 = vsel %vm708_vm13, 1.0, %v4169_v14  ;;  %vm726_vm15 = vcmp.eq.s32.totalorder %v5306_v21, %v5347_v51  ;;  %v3292_v4 = vsel %vm725_vm14, 1.0, %v4169_v14 }
  0xf7   : > { %v719_v28 = vadd.f32 %v3288_v2, %v701_v0  ;;  %v3293_v33 = vsel %vm726_vm15, 1.0, %v4169_v14  ;;  %vm743_vm0 = vcmp.eq.s32.totalorder %v5102_v52, %v5358_v58  ;;  %vm744_vm1 = vcmp.eq.s32.totalorder %v5306_v21, %v5358_v58 }
  0xf8   : > { %v720_v36 = vadd.f32 %v3289_v62, %v702_v55  ;;  %v3296_v23 = vsel %vm743_vm0, 1.0, %v4169_v14  ;;  %v3297_v18 = vsel %vm744_vm1, 1.0, %v4169_v14  ;;  %vm761_vm2 = vcmp.eq.s32.totalorder %v5102_v52, %v5365_v43 }
  0xf9   : > { %v737_v29 = vadd.f32 %v3292_v4, %v719_v28  ;;  %vm762_vm3 = vcmp.eq.s32.totalorder %v5306_v21, %v5365_v43  ;;  %v3300_v27 = vsel %vm761_vm2, 1.0, %v4169_v14  ;;  %vm779_vm4 = vcmp.eq.s32.totalorder %v5102_v52, %v5373_v53 }
  0xfa   : > { %v738_v46 = vadd.f32 %v3293_v33, %v720_v36  ;;  %v3301_v31 = vsel %vm762_vm3, 1.0, %v4169_v14  ;;  %vm780_vm5 = vcmp.eq.s32.totalorder %v5306_v21, %v5373_v53  ;;  %v3304_v20 = vsel %vm779_vm4, 1.0, %v4169_v14  ;;  %v5479_v33 = vld [vmem:[%s4271_s19 + $0x4] ss:$0 sm:$0xff] }
  0xfb   : > { %v755_v26 = vadd.f32 %v3296_v23, %v737_v29  ;;  %v3305_v42 = vsel %vm780_vm5, 1.0, %v4169_v14  ;;  %vm797_vm6 = vcmp.eq.s32.totalorder %v5102_v52, %v5385_v59  ;;  %vm798_vm7 = vcmp.eq.s32.totalorder %v5306_v21, %v5385_v59 }
  0xfc   : > { %v3836_v56 = vld [vmem:[#allocation2 + $0x10] sm:$0xff]  ;;  %v756_v47 = vadd.f32 %v3297_v18, %v738_v46  ;;  %v3308_v10 = vsel %vm797_vm6, 1.0, %v4169_v14  ;;  %v3309_v40 = vsel %vm798_vm7, 1.0, %v4169_v14  ;;  %vm815_vm8 = vcmp.eq.s32.totalorder %v5102_v52, %v5392_v16 }
  0xfd   : > { %v773_v57 = vadd.f32 %v3300_v27, %v755_v26  ;;  %vm816_vm9 = vcmp.eq.s32.totalorder %v5306_v21, %v5392_v16  ;;  %v3312_v1 = vsel %vm815_vm8, 1.0, %v4169_v14  ;;  %vm833_vm10 = vcmp.eq.s32.totalorder %v5102_v52, %v5400_v37  ;;  %2687 = vmatpush.bf16.msra.mxu1 %v3836_v56 }
  0xfe   : > { %v774_v44 = vadd.f32 %v3301_v31, %v756_v47  ;;  %v3313_v11 = vsel %vm816_vm9, 1.0, %v4169_v14  ;;  %vm834_vm11 = vcmp.eq.s32.totalorder %v5306_v21, %v5400_v37  ;;  %v3316_v12 = vsel %vm833_vm10, 1.0, %v4169_v14  ;;  %v5491_v31 = vld [vmem:[%s4271_s19 + $0x5] ss:$0 sm:$0xff] }
  0xff   : > { %v791_v50 = vadd.f32 %v3304_v20, %v773_v57  ;;  %v3317_v54 = vsel %vm834_vm11, 1.0, %v4169_v14  ;;  %vm851_vm12 = vcmp.eq.s32.totalorder %v5102_v52, %v5412_v41  ;;  %vm852_vm13 = vcmp.eq.s32.totalorder %v5306_v21, %v5412_v41  ;;  %v5503_v57 = vld [vmem:[%s4271_s19 + $0x7] ss:$0 sm:$0xff] }
 0x100   : > { %v792_v15 = vadd.f32 %v3305_v42, %v774_v44  ;;  %v3320_v24 = vsel %vm851_vm12, 1.0, %v4169_v14  ;;  %v3321_v19 = vsel %vm852_vm13, 1.0, %v4169_v14  ;;  %vm869_vm14 = vcmp.eq.s32.totalorder %v5102_v52, %v5419_v39 }
 0x101   : > { %v809_v61 = vadd.f32 %v3308_v10, %v791_v50  ;;  %vm870_vm15 = vcmp.eq.s32.totalorder %v5306_v21, %v5419_v39  ;;  %v3324_v7 = vsel %vm869_vm14, 1.0, %v4169_v14  ;;  %v5452_v38 = vadd.s32 128, %v4277_v5  ;;  %v5468_v21 = vld [vmem:[%s4271_s19 + $0x3] ss:$0 sm:$0xff] }
 0x102   : > { %v810_v13 = vadd.f32 %v3309_v40, %v792_v15  ;;  %v3325_v9 = vsel %vm870_vm15, 1.0, %v4169_v14  ;;  %v5456_v32 = vadd.s32 128, %v4280_v6  ;;  %v5459_v8 = vadd.s32 32, %v4269_v3  ;;  %v5500_v40 = vld [vmem:[%s4271_s19 + $0x6] ss:$0 sm:$0xff] }
 0x103   : > { %v827_v52 = vadd.f32 %v3312_v1, %v809_v61  ;;  %vm1499_vm0 = vcmp.eq.s32.totalorder %v5452_v38, %v5431_v22  ;;  %vm1517_vm1 = vcmp.eq.s32.totalorder %v5452_v38, %v5439_v35  ;;  %vm1535_vm2 = vcmp.eq.s32.totalorder %v5452_v38, %v5442_v45 }
 0x104   : > { %v828_v0 = vadd.f32 %v3313_v11, %v810_v13  ;;  %vm1500_vm3 = vcmp.eq.s32.totalorder %v5456_v32, %v5431_v22  ;;  %v3456_v2 = vsel %vm1499_vm0, 1.0, %v4169_v14  ;;  %vm1518_vm4 = vcmp.eq.s32.totalorder %v5456_v32, %v5439_v35  ;;  %v5525_v13 = vld [vmem:[%s4271_s19 + $0x9] ss:$0 sm:$0xff] }
 0x105   : > { %v845_v55 = vadd.f32 %v3316_v12, %v827_v52  ;;  %v3457_v62 = vsel %vm1500_vm3, 1.0, %v4169_v14  ;;  %v3460_v4 = vsel %vm1517_vm1, 1.0, %v4169_v14  ;;  %v3461_v28 = vsel %vm1518_vm4, 1.0, %v4169_v14 }
 0x106   : > { %v846_v36 = vadd.f32 %v3317_v54, %v828_v0  ;;  %v1529_v23 = vadd.f32 %v3460_v4, %v3456_v2  ;;  %v1530_v18 = vadd.f32 %v3461_v28, %v3457_v62  ;;  %vm1536_vm5 = vcmp.eq.s32.totalorder %v5456_v32, %v5442_v45  ;;  %v5514_v54 = vld [vmem:[%s4271_s19 + $0x8] ss:$0 sm:$0xff]  ;;  %v5540_v4 = vld [vmem:[%s4271_s19 + $0xb] ss:$0 sm:$0xff] }
 0x107   : > { %v863_v29 = vadd.f32 %v3320_v24, %v845_v55  ;;  %v3464_v27 = vsel %vm1535_vm2, 1.0, %v4169_v14  ;;  %v3465_v46 = vsel %vm1536_vm5, 1.0, %v4169_v14  ;;  %vm1553_vm6 = vcmp.eq.s32.totalorder %v5452_v38, %v5468_v21 }
 0x108   : > { %v864_v20 = vadd.f32 %v3321_v19, %v846_v36  ;;  %v1547_v26 = vadd.f32 %v3464_v27, %v1529_v23  ;;  %v1548_v42 = vadd.f32 %v3465_v46, %v1530_v18  ;;  %vm1554_vm7 = vcmp.eq.s32.totalorder %v5456_v32, %v5468_v21  ;;  %v5552_v27 = vld [vmem:[%s4271_s19 + $0xc] ss:$0 sm:$0xff]  ;;  %v5555_v46 = vld [vmem:[%s4271_s19 + $0xd] ss:$0 sm:$0xff] }
 0x109   : > { %v881_v56 = vadd.f32 %v3324_v7, %v863_v29  ;;  %v3468_v47 = vsel %vm1553_vm6, 1.0, %v4169_v14  ;;  %v3469_v10 = vsel %vm1554_vm7, 1.0, %v4169_v14  ;;  %vm1571_vm8 = vcmp.eq.s32.totalorder %v5452_v38, %v5479_v33 }
 0x10a   : > { %v882_v1 = vadd.f32 %v3325_v9, %v864_v20  ;;  %v1565_v44 = vadd.f32 %v3468_v47, %v1547_v26  ;;  %v1566_v11 = vadd.f32 %v3469_v10, %v1548_v42  ;;  %vm1572_vm9 = vcmp.eq.s32.totalorder %v5456_v32, %v5479_v33  ;;  %v5528_v9 = vld [vmem:[%s4271_s19 + $0xa] ss:$0 sm:$0xff]  ;;  %v5567_v10 = vld [vmem:[%s4271_s19 + $0xe] ss:$0 sm:$0xff] }
 0x10b   : > { %v3472_v12 = vsel %vm1571_vm8, 1.0, %v4169_v14  ;;  %v3473_v50 = vsel %vm1572_vm9, 1.0, %v4169_v14  ;;  %vm1589_vm10 = vcmp.eq.s32.totalorder %v5452_v38, %v5491_v31  ;;  %vm1590_vm11 = vcmp.eq.s32.totalorder %v5456_v32, %v5491_v31 }
 0x10c   : > { %v3866_v15 = vpack.c.bf16 %v882_v1, %v881_v56  ;;  %v1583_v24 = vadd.f32 %v3472_v12, %v1565_v44  ;;  %v1584_v19 = vadd.f32 %v3473_v50, %v1566_v11  ;;  %v3476_v61 = vsel %vm1589_vm10, 1.0, %v4169_v14 }
 0x10d   : > { %v3477_v7 = vsel %vm1590_vm11, 1.0, %v4169_v14  ;;  %vm1607_vm12 = vcmp.eq.s32.totalorder %v5452_v38, %v5500_v40  ;;  %vm1608_vm13 = vcmp.eq.s32.totalorder %v5456_v32, %v5500_v40  ;;  %vm1625_vm14 = vcmp.eq.s32.totalorder %v5452_v38, %v5503_v57 }
 0x10e   : > { %3920 = vst [vmem:[#allocation2 + $0x18] sm:$0xff] %v3866_v15   ;;  %v1601_v52 = vadd.f32 %v3476_v61, %v1583_v24  ;;  %v1602_v0 = vadd.f32 %v3477_v7, %v1584_v19  ;;  %v3480_v2 = vsel %vm1607_vm12, 1.0, %v4169_v14  ;;  %v3481_v55 = vsel %vm1608_vm13, 1.0, %v4169_v14  ;;  %v5579_v24 = vld [vmem:[%s4271_s19 + $0xf] ss:$0 sm:$0xff] }
 0x10f   : > { %vm1626_vm15 = vcmp.eq.s32.totalorder %v5456_v32, %v5503_v57  ;;  %v3484_v62 = vsel %vm1625_vm14, 1.0, %v4169_v14  ;;  %vm1643_vm0 = vcmp.eq.s32.totalorder %v5452_v38, %v5514_v54  ;;  %vm1644_vm1 = vcmp.eq.s32.totalorder %v5456_v32, %v5514_v54 }
 0x110   : > { %v1619_v28 = vadd.f32 %v3480_v2, %v1601_v52  ;;  %v1620_v36 = vadd.f32 %v3481_v55, %v1602_v0  ;;  %v3485_v23 = vsel %vm1626_vm15, 1.0, %v4169_v14  ;;  %v3488_v18 = vsel %vm1643_vm0, 1.0, %v4169_v14 }
 0x111   : > { %v3489_v29 = vsel %vm1644_vm1, 1.0, %v4169_v14  ;;  %vm1661_vm2 = vcmp.eq.s32.totalorder %v5452_v38, %v5525_v13  ;;  %vm1662_vm3 = vcmp.eq.s32.totalorder %v5456_v32, %v5525_v13  ;;  %vm1679_vm4 = vcmp.eq.s32.totalorder %v5452_v38, %v5528_v9 }
 0x112   : > { %v1637_v20 = vadd.f32 %v3484_v62, %v1619_v28  ;;  %v1638_v26 = vadd.f32 %v3485_v23, %v1620_v36  ;;  %v3492_v42 = vsel %vm1661_vm2, 1.0, %v4169_v14  ;;  %v3493_v56 = vsel %vm1662_vm3, 1.0, %v4169_v14 }
 0x113   : > { %vm1680_vm5 = vcmp.eq.s32.totalorder %v5456_v32, %v5528_v9  ;;  %v3496_v47 = vsel %vm1679_vm4, 1.0, %v4169_v14  ;;  %vm1697_vm6 = vcmp.eq.s32.totalorder %v5452_v38, %v5540_v4  ;;  %vm1698_vm7 = vcmp.eq.s32.totalorder %v5456_v32, %v5540_v4 }
 0x114   : > { %v1655_v1 = vadd.f32 %v3488_v18, %v1637_v20  ;;  %v1656_v44 = vadd.f32 %v3489_v29, %v1638_v26  ;;  %v3497_v11 = vsel %vm1680_vm5, 1.0, %v4169_v14  ;;  %v3500_v12 = vsel %vm1697_vm6, 1.0, %v4169_v14 }
 0x115   : > { %v3829_v50 = vld [vmem:[#allocation2 + $0x18] sm:$0xff]  ;;  %v3501_v15 = vsel %vm1698_vm7, 1.0, %v4169_v14  ;;  %vm1715_vm8 = vcmp.eq.s32.totalorder %v5452_v38, %v5552_v27  ;;  %vm1716_vm9 = vcmp.eq.s32.totalorder %v5456_v32, %v5552_v27  ;;  %vm1733_vm10 = vcmp.eq.s32.totalorder %v5452_v38, %v5555_v46 }
 0x116   : > { %v1673_v19 = vadd.f32 %v3492_v42, %v1655_v1  ;;  %v1674_v61 = vadd.f32 %v3493_v56, %v1656_v44  ;;  %v3504_v7 = vsel %vm1715_vm8, 1.0, %v4169_v14  ;;  %v3505_v52 = vsel %vm1716_vm9, 1.0, %v4169_v14  ;;  %2637 = vmatpush.bf16.msra.mxu0 %v3829_v50  ;;  %3935 = vmatpush.bf16.msra.mxu3 %v3829_v50 }
 0x117   : > { %vm1734_vm11 = vcmp.eq.s32.totalorder %v5456_v32, %v5555_v46  ;;  %v3508_v0 = vsel %vm1733_vm10, 1.0, %v4169_v14  ;;  %vm1751_vm12 = vcmp.eq.s32.totalorder %v5452_v38, %v5567_v10  ;;  %vm1752_vm13 = vcmp.eq.s32.totalorder %v5456_v32, %v5567_v10 }
 0x118   : > { %v1691_v2 = vadd.f32 %v3496_v47, %v1673_v19  ;;  %v1692_v55 = vadd.f32 %v3497_v11, %v1674_v61  ;;  %v3509_v62 = vsel %vm1734_vm11, 1.0, %v4169_v14  ;;  %v3512_v28 = vsel %vm1751_vm12, 1.0, %v4169_v14 }
 0x119   : > { %v3513_v36 = vsel %vm1752_vm13, 1.0, %v4169_v14  ;;  %vm1769_vm14 = vcmp.eq.s32.totalorder %v5452_v38, %v5579_v24  ;;  %vm1770_vm15 = vcmp.eq.s32.totalorder %v5456_v32, %v5579_v24  ;;  %v5598_v23 = vadd.s32 32, %v4448_v34 }
 0x11a   : > { %v1709_v18 = vadd.f32 %v3500_v12, %v1691_v2  ;;  %v1710_v29 = vadd.f32 %v3501_v15, %v1692_v55  ;;  %v3516_v20 = vsel %vm1769_vm14, 1.0, %v4169_v14  ;;  %v3517_v26 = vsel %vm1770_vm15, 1.0, %v4169_v14 }
 0x11b   : > { %vm597_vm0 = vcmp.eq.s32.totalorder %v5459_v8, %v5285_v60  ;;  %vm598_vm1 = vcmp.eq.s32.totalorder %v5598_v23, %v5285_v60  ;;  %vm615_vm2 = vcmp.eq.s32.totalorder %v5459_v8, %v5288_v49  ;;  %vm616_vm3 = vcmp.eq.s32.totalorder %v5598_v23, %v5288_v49 }
 0x11c   : > { %v1727_v38 = vadd.f32 %v3504_v7, %v1709_v18  ;;  %v1728_v32 = vadd.f32 %v3505_v52, %v1710_v29  ;;  %v3262_v42 = vsel %vm597_vm0, 1.0, %v4169_v14  ;;  %v3263_v56 = vsel %vm598_vm1, 1.0, %v4169_v14 }
 0x11d   : > { %v3266_v47 = vsel %vm615_vm2, 1.0, %v4169_v14  ;;  %v3267_v1 = vsel %vm616_vm3, 1.0, %v4169_v14  ;;  %vm633_vm4 = vcmp.eq.s32.totalorder %v5459_v8, %v5300_v25  ;;  %vm634_vm5 = vcmp.eq.s32.totalorder %v5598_v23, %v5300_v25 }
 0x11e   : > { %v1745_v60 = vadd.f32 %v3508_v0, %v1727_v38  ;;  %v1746_v44 = vadd.f32 %v3509_v62, %v1728_v32  ;;  %v627_v11 = vadd.f32 %v3266_v47, %v3262_v42  ;;  %v628_v49 = vadd.f32 %v3267_v1, %v3263_v56 }
 0x11f   : > { %v3270_v12 = vsel %vm633_vm4, 1.0, %v4169_v14  ;;  %v3271_v50 = vsel %vm634_vm5, 1.0, %v4169_v14  ;;  %vm651_vm6 = vcmp.eq.s32.totalorder %v5459_v8, %v5313_v30  ;;  %vm652_vm7 = vcmp.eq.s32.totalorder %v5598_v23, %v5313_v30 }
 0x120   : > { %v1763_v15 = vadd.f32 %v3512_v28, %v1745_v60  ;;  %v1764_v19 = vadd.f32 %v3513_v36, %v1746_v44  ;;  %v645_v61 = vadd.f32 %v3270_v12, %v627_v11  ;;  %v646_v7 = vadd.f32 %v3271_v50, %v628_v49 }
 0x121   : > { %v3274_v25 = vsel %vm651_vm6, 1.0, %v4169_v14  ;;  %v3275_v52 = vsel %vm652_vm7, 1.0, %v4169_v14  ;;  %vm669_vm8 = vcmp.eq.s32.totalorder %v5459_v8, %v5324_v48  ;;  %vm670_vm9 = vcmp.eq.s32.totalorder %v5598_v23, %v5324_v48 }
 0x122   : > { %v1781_v0 = vadd.f32 %v3516_v20, %v1763_v15  ;;  %v1782_v2 = vadd.f32 %v3517_v26, %v1764_v19  ;;  %v663_v55 = vadd.f32 %v3274_v25, %v645_v61  ;;  %v664_v62 = vadd.f32 %v3275_v52, %v646_v7 }
 0x123   : > { %v3278_v30 = vsel %vm669_vm8, 1.0, %v4169_v14  ;;  %v3279_v28 = vsel %vm670_vm9, 1.0, %v4169_v14  ;;  %vm687_vm10 = vcmp.eq.s32.totalorder %v5459_v8, %v5334_v17  ;;  %vm688_vm11 = vcmp.eq.s32.totalorder %v5598_v23, %v5334_v17 }
 0x124   : > { %v3896_v36 = vpack.c.bf16 %v1782_v2, %v1781_v0  ;;  %v681_v18 = vadd.f32 %v3278_v30, %v663_v55  ;;  %v682_v29 = vadd.f32 %v3279_v28, %v664_v62  ;;  %v3282_v38 = vsel %vm687_vm10, 1.0, %v4169_v14 }
 0x125   : > { %v3283_v48 = vsel %vm688_vm11, 1.0, %v4169_v14  ;;  %vm705_vm12 = vcmp.eq.s32.totalorder %v5459_v8, %v5343_v63  ;;  %vm706_vm13 = vcmp.eq.s32.totalorder %v5598_v23, %v5343_v63  ;;  %vm723_vm14 = vcmp.eq.s32.totalorder %v5459_v8, %v5347_v51 }
 0x126   : > { %3926 = vst [vmem:[#allocation2 + $0x20] sm:$0xff] %v3896_v36   ;;  %v699_v20 = vadd.f32 %v3282_v38, %v681_v18  ;;  %v700_v26 = vadd.f32 %v3283_v48, %v682_v29  ;;  %v3286_v17 = vsel %vm705_vm12, 1.0, %v4169_v14  ;;  %v3287_v32 = vsel %vm706_vm13, 1.0, %v4169_v14 }
 0x127   : > { %vm724_vm15 = vcmp.eq.s32.totalorder %v5598_v23, %v5347_v51  ;;  %v3290_v42 = vsel %vm723_vm14, 1.0, %v4169_v14  ;;  %vm741_vm0 = vcmp.eq.s32.totalorder %v5459_v8, %v5358_v58  ;;  %vm742_vm1 = vcmp.eq.s32.totalorder %v5598_v23, %v5358_v58 }
 0x128   : > { %v717_v63 = vadd.f32 %v3286_v17, %v699_v20  ;;  %v718_v56 = vadd.f32 %v3287_v32, %v700_v26  ;;  %v3291_v47 = vsel %vm724_vm15, 1.0, %v4169_v14  ;;  %v3294_v1 = vsel %vm741_vm0, 1.0, %v4169_v14 }
 0x129   : > { %v3295_v60 = vsel %vm742_vm1, 1.0, %v4169_v14  ;;  %vm759_vm2 = vcmp.eq.s32.totalorder %v5459_v8, %v5365_v43  ;;  %vm760_vm3 = vcmp.eq.s32.totalorder %v5598_v23, %v5365_v43  ;;  %vm777_vm4 = vcmp.eq.s32.totalorder %v5459_v8, %v5373_v53 }
 0x12a   : > { %v735_v51 = vadd.f32 %v3290_v42, %v717_v63  ;;  %v736_v44 = vadd.f32 %v3291_v47, %v718_v56  ;;  %v3298_v58 = vsel %vm759_vm2, 1.0, %v4169_v14  ;;  %v3299_v11 = vsel %vm760_vm3, 1.0, %v4169_v14 }
 0x12b   : > { %vm778_vm5 = vcmp.eq.s32.totalorder %v5598_v23, %v5373_v53  ;;  %v3302_v49 = vsel %vm777_vm4, 1.0, %v4169_v14  ;;  %vm795_vm6 = vcmp.eq.s32.totalorder %v5459_v8, %v5385_v59  ;;  %vm796_vm7 = vcmp.eq.s32.totalorder %v5598_v23, %v5385_v59 }
 0x12c   : > { %v753_v43 = vadd.f32 %v3294_v1, %v735_v51  ;;  %v754_v12 = vadd.f32 %v3295_v60, %v736_v44  ;;  %v3303_v50 = vsel %vm778_vm5, 1.0, %v4169_v14  ;;  %v3306_v15 = vsel %vm795_vm6, 1.0, %v4169_v14 }
 0x12d   : > { %v3835_v19 = vld [vmem:[#allocation2 + $0x20] sm:$0xff]  ;;  %v3307_v61 = vsel %vm796_vm7, 1.0, %v4169_v14  ;;  %vm813_vm8 = vcmp.eq.s32.totalorder %v5459_v8, %v5392_v16  ;;  %vm814_vm9 = vcmp.eq.s32.totalorder %v5598_v23, %v5392_v16  ;;  %vm831_vm10 = vcmp.eq.s32.totalorder %v5459_v8, %v5400_v37 }
 0x12e   : > { %v771_v53 = vadd.f32 %v3298_v58, %v753_v43  ;;  %v772_v59 = vadd.f32 %v3299_v11, %v754_v12  ;;  %v3310_v7 = vsel %vm813_vm8, 1.0, %v4169_v14  ;;  %v3311_v25 = vsel %vm814_vm9, 1.0, %v4169_v14  ;;  %2688 = vmatpush.bf16.msra.mxu1 %v3835_v19 }
 0x12f   : > { %vm832_vm11 = vcmp.eq.s32.totalorder %v5598_v23, %v5400_v37  ;;  %v3314_v52 = vsel %vm831_vm10, 1.0, %v4169_v14  ;;  %vm849_vm12 = vcmp.eq.s32.totalorder %v5459_v8, %v5412_v41  ;;  %vm850_vm13 = vcmp.eq.s32.totalorder %v5598_v23, %v5412_v41 }
 0x130   : > { %v789_v16 = vadd.f32 %v3302_v49, %v771_v53  ;;  %v790_v0 = vadd.f32 %v3303_v50, %v772_v59  ;;  %v3315_v2 = vsel %vm832_vm11, 1.0, %v4169_v14  ;;  %v3318_v55 = vsel %vm849_vm12, 1.0, %v4169_v14 }
 0x131   : > { %v3319_v62 = vsel %vm850_vm13, 1.0, %v4169_v14  ;;  %vm867_vm14 = vcmp.eq.s32.totalorder %v5459_v8, %v5419_v39  ;;  %vm868_vm15 = vcmp.eq.s32.totalorder %v5598_v23, %v5419_v39  ;;  %v5697_v37 = vadd.s32 128, %v4269_v3 }
 0x132   : > { %v807_v30 = vadd.f32 %v3306_v15, %v789_v16  ;;  %v808_v28 = vadd.f32 %v3307_v61, %v790_v0  ;;  %v3322_v41 = vsel %vm867_vm14, 1.0, %v4169_v14  ;;  %v3323_v36 = vsel %vm868_vm15, 1.0, %v4169_v14 }
 0x133   : > { %v5702_v18 = vadd.s32 128, %v4448_v34  ;;  %vm1497_vm0 = vcmp.eq.s32.totalorder %v5697_v37, %v5431_v22  ;;  %vm1515_vm1 = vcmp.eq.s32.totalorder %v5697_v37, %v5439_v35  ;;  %vm1533_vm2 = vcmp.eq.s32.totalorder %v5697_v37, %v5442_v45 }
 0x134   : > { %v825_v39 = vadd.f32 %v3310_v7, %v807_v30  ;;  %v826_v8 = vadd.f32 %v3311_v25, %v808_v28  ;;  %v3454_v23 = vsel %vm1497_vm0, 1.0, %v4169_v14  ;;  %v3458_v29 = vsel %vm1515_vm1, 1.0, %v4169_v14 }
 0x135   : > { %vm1498_vm3 = vcmp.eq.s32.totalorder %v5702_v18, %v5431_v22  ;;  %vm1516_vm4 = vcmp.eq.s32.totalorder %v5702_v18, %v5439_v35  ;;  %v1527_v38 = vadd.f32 %v3458_v29, %v3454_v23  ;;  %vm1534_vm5 = vcmp.eq.s32.totalorder %v5702_v18, %v5442_v45 }
 0x136   : > { %v843_v48 = vadd.f32 %v3314_v52, %v825_v39  ;;  %v844_v20 = vadd.f32 %v3315_v2, %v826_v8  ;;  %v3455_v26 = vsel %vm1498_vm3, 1.0, %v4169_v14  ;;  %v3459_v17 = vsel %vm1516_vm4, 1.0, %v4169_v14  ;;  %v5792_v8 = vld [vmem:[%s4271_s19 + $0x1] ss:$0 sm:$0xff] }
 0x137   : > { %v1528_v32 = vadd.f32 %v3459_v17, %v3455_v26  ;;  %v3462_v42 = vsel %vm1533_vm2, 1.0, %v4169_v14  ;;  %v3463_v63 = vsel %vm1534_vm5, 1.0, %v4169_v14  ;;  %vm1551_vm6 = vcmp.eq.s32.totalorder %v5697_v37, %v5468_v21 }
 0x138   : > { %v861_v22 = vadd.f32 %v3318_v55, %v843_v48  ;;  %v862_v35 = vadd.f32 %v3319_v62, %v844_v20  ;;  %v1545_v56 = vadd.f32 %v3462_v42, %v1527_v38  ;;  %vm1552_vm7 = vcmp.eq.s32.totalorder %v5702_v18, %v5468_v21  ;;  %v5806_v48 = vld [vmem:[%s6365_s1 + $0x8] sm:$0xf0] }
 0x139   : > { %v1546_v45 = vadd.f32 %v3463_v63, %v1528_v32  ;;  %v3466_v47 = vsel %vm1551_vm6, 1.0, %v4169_v14  ;;  %v3467_v1 = vsel %vm1552_vm7, 1.0, %v4169_v14  ;;  %vm1569_vm8 = vcmp.eq.s32.totalorder %v5697_v37, %v5479_v33 }
 0x13a   : > { %v879_v60 = vadd.f32 %v3322_v41, %v861_v22  ;;  %v880_v51 = vadd.f32 %v3323_v36, %v862_v35  ;;  %v1563_v44 = vadd.f32 %v3466_v47, %v1545_v56  ;;  %vm1570_vm9 = vcmp.eq.s32.totalorder %v5702_v18, %v5479_v33  ;;  %v5830_v56 = vld [vmem:[%s4271_s19 + $0x3] ss:$0 sm:$0xff] }
 0x13b   : > { %v1564_v58 = vadd.f32 %v3467_v1, %v1546_v45  ;;  %v3470_v11 = vsel %vm1569_vm8, 1.0, %v4169_v14  ;;  %v3471_v49 = vsel %vm1570_vm9, 1.0, %v4169_v14  ;;  %vm1587_vm10 = vcmp.eq.s32.totalorder %v5697_v37, %v5491_v31 }
 0x13c   : > { %v3861_v21 = vpack.c.bf16 %v880_v51, %v879_v60  ;;  %v1581_v43 = vadd.f32 %v3470_v11, %v1563_v44  ;;  %vm1588_vm11 = vcmp.eq.s32.totalorder %v5702_v18, %v5491_v31  ;;  %v3474_v12 = vsel %vm1587_vm10, 1.0, %v4169_v14  ;;  %v5841_v44 = vld [vmem:[%s4271_s19 + $0x4] ss:$0 sm:$0xff] }
 0x13d   : > { %v1582_v50 = vadd.f32 %v3471_v49, %v1564_v58  ;;  %v3475_v15 = vsel %vm1588_vm11, 1.0, %v4169_v14  ;;  %vm1605_vm12 = vcmp.eq.s32.totalorder %v5697_v37, %v5500_v40  ;;  %vm1606_vm13 = vcmp.eq.s32.totalorder %v5702_v18, %v5500_v40 }
 0x13e   : > { %3919 = vst [vmem:[#allocation2 + $0x58] sm:$0xff] %v3861_v21   ;;  %v1599_v33 = vadd.f32 %v3474_v12, %v1581_v43  ;;  %v3478_v19 = vsel %vm1605_vm12, 1.0, %v4169_v14  ;;  %v3479_v61 = vsel %vm1606_vm13, 1.0, %v4169_v14  ;;  %vm1623_vm14 = vcmp.eq.s32.totalorder %v5697_v37, %v5503_v57 }
 0x13f   : > { %v1600_v31 = vadd.f32 %v3475_v15, %v1582_v50  ;;  %vm1624_vm15 = vcmp.eq.s32.totalorder %v5702_v18, %v5503_v57  ;;  %v3482_v53 = vsel %vm1623_vm14, 1.0, %v4169_v14  ;;  %vm1641_vm0 = vcmp.eq.s32.totalorder %v5697_v37, %v5514_v54  ;;  %v5850_v50 = vld [vmem:[%s4271_s19 + $0x5] ss:$0 sm:$0xff]  ;;  %v5853_v15 = vld [vmem:[%s4271_s19 + $0x6] ss:$0 sm:$0xff] }
 0x140   : > { %v1617_v59 = vadd.f32 %v3478_v19, %v1599_v33  ;;  %v3483_v40 = vsel %vm1624_vm15, 1.0, %v4169_v14  ;;  %vm1642_vm1 = vcmp.eq.s32.totalorder %v5702_v18, %v5514_v54  ;;  %v3486_v25 = vsel %vm1641_vm0, 1.0, %v4169_v14 }
 0x141   : > { %v1618_v7 = vadd.f32 %v3479_v61, %v1600_v31  ;;  %vm1659_vm2 = vcmp.eq.s32.totalorder %v5697_v37, %v5525_v13  ;;  %vm1660_vm3 = vcmp.eq.s32.totalorder %v5702_v18, %v5525_v13  ;;  %v3487_v52 = vsel %vm1642_vm1, 1.0, %v4169_v14 }
 0x142   : > { %v1635_v57 = vadd.f32 %v3482_v53, %v1617_v59  ;;  %v3490_v16 = vsel %vm1659_vm2, 1.0, %v4169_v14  ;;  %vm1677_vm4 = vcmp.eq.s32.totalorder %v5697_v37, %v5528_v9  ;;  %v3491_v54 = vsel %vm1660_vm3, 1.0, %v4169_v14 }
 0x143   : > { %v1636_v0 = vadd.f32 %v3483_v40, %v1618_v7  ;;  %vm1678_vm5 = vcmp.eq.s32.totalorder %v5702_v18, %v5528_v9  ;;  %vm1695_vm6 = vcmp.eq.s32.totalorder %v5697_v37, %v5540_v4  ;;  %v3494_v13 = vsel %vm1677_vm4, 1.0, %v4169_v14  ;;  %v5862_v40 = vld [vmem:[%s4271_s19 + $0x7] ss:$0 sm:$0xff] }
 0x144   : > { %v1653_v2 = vadd.f32 %v3486_v25, %v1635_v57  ;;  %v3495_v55 = vsel %vm1678_vm5, 1.0, %v4169_v14  ;;  %vm1696_vm7 = vcmp.eq.s32.totalorder %v5702_v18, %v5540_v4  ;;  %v3498_v28 = vsel %vm1695_vm6, 1.0, %v4169_v14 }
 0x145   : > { %v3828_v62 = vld [vmem:[#allocation2 + $0x58] sm:$0xff]  ;;  %v1654_v30 = vadd.f32 %v3487_v52, %v1636_v0  ;;  %vm1713_vm8 = vcmp.eq.s32.totalorder %v5697_v37, %v5552_v27  ;;  %vm1714_vm9 = vcmp.eq.s32.totalorder %v5702_v18, %v5552_v27  ;;  %v3499_v41 = vsel %vm1696_vm7, 1.0, %v4169_v14  ;;  %v5789_v27 = vld [vmem:[%s4271_s19] ss:$0 sm:$0xff] }
 0x146   : > { %v1671_v9 = vadd.f32 %v3490_v16, %v1653_v2  ;;  %v3502_v36 = vsel %vm1713_vm8, 1.0, %v4169_v14  ;;  %vm1731_vm10 = vcmp.eq.s32.totalorder %v5697_v37, %v5555_v46  ;;  %2638 = vmatpush.bf16.msra.mxu0 %v3828_v62  ;;  %v3503_v39 = vsel %vm1714_vm9, 1.0, %v4169_v14  ;;  %3936 = vmatpush.bf16.msra.mxu3 %v3828_v62  ;;  %v5873_v0 = vld [vmem:[%s4271_s19 + $0x8] ss:$0 sm:$0xff]  ;;  %v5878_v62 = vld [vmem:[%s4271_s19 + $0x9] ss:$0 sm:$0xff] }
 0x147   : > { %v1672_v4 = vadd.f32 %v3491_v54, %v1654_v30  ;;  %vm1732_vm11 = vcmp.eq.s32.totalorder %v5702_v18, %v5555_v46  ;;  %vm1749_vm12 = vcmp.eq.s32.totalorder %v5697_v37, %v5567_v10  ;;  %v3506_v29 = vsel %vm1731_vm10, 1.0, %v4169_v14  ;;  %v5801_v46 = vld [vmem:[%s6365_s1 + $0x4] sm:$0xf] }
 0x148   : > { %v1689_v23 = vadd.f32 %v3494_v13, %v1671_v9  ;;  %v3507_v38 = vsel %vm1732_vm11, 1.0, %v4169_v14  ;;  %vm1750_vm13 = vcmp.eq.s32.totalorder %v5702_v18, %v5567_v10  ;;  %v3510_v26 = vsel %vm1749_vm12, 1.0, %v4169_v14  ;;  %v5814_v10 = vld [vmem:[%s4271_s19 + $0x2] ss:$0 sm:$0xff]  ;;  %v5886_v9 = vld [vmem:[%s4271_s19 + $0xa] ss:$0 sm:$0xff] }
 0x149   : > { %v1690_v20 = vadd.f32 %v3495_v55, %v1672_v4  ;;  %vm1767_vm14 = vcmp.eq.s32.totalorder %v5697_v37, %v5579_v24  ;;  %vm1768_vm15 = vcmp.eq.s32.totalorder %v5702_v18, %v5579_v24  ;;  %v3511_v32 = vsel %vm1750_vm13, 1.0, %v4169_v14 }
 0x14a   : > { %v1707_v17 = vadd.f32 %v3498_v28, %v1689_v23  ;;  %v3514_v42 = vsel %vm1767_vm14, 1.0, %v4169_v14  ;;  %v3515_v63 = vsel %vm1768_vm15, 1.0, %v4169_v14  ;;  %v3655_v35 = vor.u32 %v5801_v46, %v5806_v48 }
 0x14b   : > { %v1708_v22 = vadd.f32 %v3499_v41, %v1690_v20  ;;  %vm299_vm0 = vcmp.eq.s32.totalorder %v4277_v5, %v5789_v27  ;;  %vm300_vm1 = vcmp.eq.s32.totalorder %v4280_v6, %v5789_v27  ;;  %vm317_vm2 = vcmp.eq.s32.totalorder %v4277_v5, %v5792_v8 }
 0x14c   : > { %v1725_v24 = vadd.f32 %v3502_v36, %v1707_v17  ;;  %v3200_v37 = vsel %vm299_vm0, 1.0, %v4169_v14  ;;  %v3201_v18 = vsel %vm300_vm1, 1.0, %v4169_v14  ;;  %vm318_vm3 = vcmp.eq.s32.totalorder %v4280_v6, %v5792_v8  ;;  %v5905_v17 = vld [vmem:[%s4271_s19 + $0xc] ss:$0 sm:$0xff] }
 0x14d   : > { %v1726_v45 = vadd.f32 %v3503_v39, %v1708_v22  ;;  %v3204_v47 = vsel %vm317_vm2, 1.0, %v4169_v14  ;;  %vm335_vm4 = vcmp.eq.s32.totalorder %v4277_v5, %v5814_v10  ;;  %v3205_v60 = vsel %vm318_vm3, 1.0, %v4169_v14 }
 0x14e   : > { %v1743_v1 = vadd.f32 %v3506_v29, %v1725_v24  ;;  %v329_v51 = vadd.f32 %v3204_v47, %v3200_v37  ;;  %vm336_vm5 = vcmp.eq.s32.totalorder %v4280_v6, %v5814_v10  ;;  %v330_v11 = vadd.f32 %v3205_v60, %v3201_v18  ;;  %v5898_v29 = vld [vmem:[%s4271_s19 + $0xb] ss:$0 sm:$0xff]  ;;  %v5925_v47 = vld [vmem:[%s4271_s19 + $0xe] ss:$0 sm:$0xff] }
 0x14f   : > { %v1744_v58 = vadd.f32 %v3507_v38, %v1726_v45  ;;  %v3208_v49 = vsel %vm335_vm4, 1.0, %v4169_v14  ;;  %v3209_v21 = vsel %vm336_vm5, 1.0, %v4169_v14  ;;  %vm353_vm6 = vcmp.eq.s32.totalorder %v4277_v5, %v5830_v56 }
 0x150   : > { %v1761_v43 = vadd.f32 %v3510_v26, %v1743_v1  ;;  %v347_v12 = vadd.f32 %v3208_v49, %v329_v51  ;;  %vm354_vm7 = vcmp.eq.s32.totalorder %v4280_v6, %v5830_v56  ;;  %v348_v19 = vadd.f32 %v3209_v21, %v330_v11 }
 0x151   : > { %v1762_v33 = vadd.f32 %v3511_v32, %v1744_v58  ;;  %v3212_v61 = vsel %vm353_vm6, 1.0, %v4169_v14  ;;  %v3213_v31 = vsel %vm354_vm7, 1.0, %v4169_v14  ;;  %vm371_vm8 = vcmp.eq.s32.totalorder %v4277_v5, %v5841_v44  ;;  %v5932_v58 = vld [vmem:[%s4271_s19 + $0xf] ss:$0 sm:$0xff] }
 0x152   : > { %v1779_v53 = vadd.f32 %v3514_v42, %v1761_v43  ;;  %v365_v59 = vadd.f32 %v3212_v61, %v347_v12  ;;  %vm372_vm9 = vcmp.eq.s32.totalorder %v4280_v6, %v5841_v44  ;;  %v366_v25 = vadd.f32 %v3213_v31, %v348_v19 }
 0x153   : > { %v1780_v7 = vadd.f32 %v3515_v63, %v1762_v33  ;;  %v3216_v57 = vsel %vm371_vm8, 1.0, %v4169_v14  ;;  %v3217_v52 = vsel %vm372_vm9, 1.0, %v4169_v14  ;;  %vm389_vm10 = vcmp.eq.s32.totalorder %v4277_v5, %v5850_v50  ;;  %v5913_v63 = vld [vmem:[%s4271_s19 + $0xd] ss:$0 sm:$0xff] }
 0x154   : > { %v383_v16 = vadd.f32 %v3216_v57, %v365_v59  ;;  %vm390_vm11 = vcmp.eq.s32.totalorder %v4280_v6, %v5850_v50  ;;  %vm407_vm12 = vcmp.eq.s32.totalorder %v4277_v5, %v5853_v15  ;;  %v384_v2 = vadd.f32 %v3217_v52, %v366_v25 }
 0x155   : > { %v3891_v54 = vpack.c.bf16 %v1780_v7, %v1779_v53  ;;  %v3220_v13 = vsel %vm389_vm10, 1.0, %v4169_v14  ;;  %v3221_v55 = vsel %vm390_vm11, 1.0, %v4169_v14  ;;  %vm408_vm13 = vcmp.eq.s32.totalorder %v4280_v6, %v5853_v15 }
 0x156   : > { %v401_v30 = vadd.f32 %v3220_v13, %v383_v16  ;;  %v3224_v28 = vsel %vm407_vm12, 1.0, %v4169_v14  ;;  %vm425_vm14 = vcmp.eq.s32.totalorder %v4277_v5, %v5862_v40  ;;  %v402_v41 = vadd.f32 %v3221_v55, %v384_v2 }
 0x157   : > { %3925 = vst [vmem:[#allocation2 + $0x40] sm:$0xff] %v3891_v54   ;;  %v3225_v36 = vsel %vm408_vm13, 1.0, %v4169_v14  ;;  %vm426_vm15 = vcmp.eq.s32.totalorder %v4280_v6, %v5862_v40  ;;  %v3228_v4 = vsel %vm425_vm14, 1.0, %v4169_v14  ;;  %vm2608_vm0 = vcmask 785408  }
 0x158   : > { %v419_v39 = vadd.f32 %v3224_v28, %v401_v30  ;;  %v3229_v23 = vsel %vm426_vm15, 1.0, %v4169_v14  ;;  %vm443_vm1 = vcmp.eq.s32.totalorder %v4277_v5, %v5873_v0  ;;  %vm444_vm2 = vcmp.eq.s32.totalorder %v4280_v6, %v5873_v0 }
 0x159   : > { %v420_v38 = vadd.f32 %v3225_v36, %v402_v41  ;;  %v3232_v20 = vsel %vm443_vm1, 1.0, %v4169_v14  ;;  %v3233_v26 = vsel %vm444_vm2, 1.0, %v4169_v14  ;;  %vm461_vm3 = vcmp.eq.s32.totalorder %v4277_v5, %v5878_v62 }
 0x15a   : > { %v437_v32 = vadd.f32 %v3228_v4, %v419_v39  ;;  %vm462_vm4 = vcmp.eq.s32.totalorder %v4280_v6, %v5878_v62  ;;  %v3236_v42 = vsel %vm461_vm3, 1.0, %v4169_v14  ;;  %vm479_vm5 = vcmp.eq.s32.totalorder %v4277_v5, %v5886_v9 }
 0x15b   : > { %v438_v22 = vadd.f32 %v3229_v23, %v420_v38  ;;  %v3237_v24 = vsel %vm462_vm4, 1.0, %v4169_v14  ;;  %vm480_vm6 = vcmp.eq.s32.totalorder %v4280_v6, %v5886_v9  ;;  %v3240_v37 = vsel %vm479_vm5, 1.0, %v4169_v14 }
 0x15c   : > { %v455_v18 = vadd.f32 %v3232_v20, %v437_v32  ;;  %v3241_v45 = vsel %vm480_vm6, 1.0, %v4169_v14  ;;  %vm497_vm7 = vcmp.eq.s32.totalorder %v4277_v5, %v5898_v29  ;;  %vm498_vm8 = vcmp.eq.s32.totalorder %v4280_v6, %v5898_v29 }
 0x15d   : > { %v456_v1 = vadd.f32 %v3233_v26, %v438_v22  ;;  %v3244_v60 = vsel %vm497_vm7, 1.0, %v4169_v14  ;;  %v3245_v51 = vsel %vm498_vm8, 1.0, %v4169_v14  ;;  %vm515_vm9 = vcmp.eq.s32.totalorder %v4277_v5, %v5905_v17 }
 0x15e   : > { %v3834_v11 = vld [vmem:[#allocation2 + $0x40] sm:$0xff]  ;;  %v473_v49 = vadd.f32 %v3236_v42, %v455_v18  ;;  %vm516_vm10 = vcmp.eq.s32.totalorder %v4280_v6, %v5905_v17  ;;  %v3248_v21 = vsel %vm515_vm9, 1.0, %v4169_v14  ;;  %vm533_vm11 = vcmp.eq.s32.totalorder %v4277_v5, %v5913_v63 }
 0x15f   : > { %v474_v43 = vadd.f32 %v3237_v24, %v456_v1  ;;  %v3249_v12 = vsel %vm516_vm10, 1.0, %v4169_v14  ;;  %vm534_vm12 = vcmp.eq.s32.totalorder %v4280_v6, %v5913_v63  ;;  %v3252_v33 = vsel %vm533_vm11, 1.0, %v4169_v14  ;;  %2689 = vmatpush.bf16.msra.mxu1 %v3834_v11 }
 0x160   : > { %v491_v19 = vadd.f32 %v3240_v37, %v473_v49  ;;  %v3253_v61 = vsel %vm534_vm12, 1.0, %v4169_v14  ;;  %vm551_vm13 = vcmp.eq.s32.totalorder %v4277_v5, %v5925_v47  ;;  %vm552_vm14 = vcmp.eq.s32.totalorder %v4280_v6, %v5925_v47 }
 0x161   : > { %v492_v31 = vadd.f32 %v3241_v45, %v474_v43  ;;  %v3256_v53 = vsel %vm551_vm13, 1.0, %v4169_v14  ;;  %v3257_v59 = vsel %vm552_vm14, 1.0, %v4169_v14  ;;  %vm569_vm15 = vcmp.eq.s32.totalorder %v4277_v5, %v5932_v58 }
 0x162   : > { %v509_v7 = vadd.f32 %v3244_v60, %v491_v19  ;;  %vm570_vm1 = vcmp.eq.s32.totalorder %v4280_v6, %v5932_v58  ;;  %v3260_v25 = vsel %vm569_vm15, 1.0, %v4169_v14  ;;  %vm297_vm2 = vcmp.eq.s32.totalorder %v4269_v3, %v5789_v27  ;;  %3768 = vmatmul.msk.bf16.vlgmr.msra.gmra.mxu1 %vm2608_vm0, %v3655_v35 }
 0x163   : > { %v510_v57 = vadd.f32 %v3245_v51, %v492_v31  ;;  %v3261_v52 = vsel %vm570_vm1, 1.0, %v4169_v14  ;;  %vm298_vm3 = vcmp.eq.s32.totalorder %v4448_v34, %v5789_v27  ;;  %v3198_v5 = vsel %vm297_vm2, 1.0, %v4169_v14 }
 0x164   : > { %v527_v16 = vadd.f32 %v3248_v21, %v509_v7  ;;  %v3199_v6 = vsel %vm298_vm3, 1.0, %v4169_v14  ;;  %vm315_vm4 = vcmp.eq.s32.totalorder %v4269_v3, %v5792_v8  ;;  %vm316_vm5 = vcmp.eq.s32.totalorder %v4448_v34, %v5792_v8 }
 0x165   : > { %v528_v46 = vadd.f32 %v3249_v12, %v510_v57  ;;  %v3202_v48 = vsel %vm315_vm4, 1.0, %v4169_v14  ;;  %v3203_v35 = vsel %vm316_vm5, 1.0, %v4169_v14  ;;  %vm333_vm6 = vcmp.eq.s32.totalorder %v4269_v3, %v5814_v10 }
 0x166   : > { %v545_v27 = vadd.f32 %v3252_v33, %v527_v16  ;;  %v327_v54 = vadd.f32 %v3202_v48, %v3198_v5  ;;  %v328_v2 = vadd.f32 %v3203_v35, %v3199_v6  ;;  %vm334_vm7 = vcmp.eq.s32.totalorder %v4448_v34, %v5814_v10 }
 0x167   : > { %v546_v13 = vadd.f32 %v3253_v61, %v528_v46  ;;  %v3206_v55 = vsel %vm333_vm6, 1.0, %v4169_v14  ;;  %v3207_v30 = vsel %vm334_vm7, 1.0, %v4169_v14  ;;  %vm351_vm8 = vcmp.eq.s32.totalorder %v4269_v3, %v5830_v56 }
 0x168   : > { %v563_v8 = vadd.f32 %v3256_v53, %v545_v27  ;;  %v345_v28 = vadd.f32 %v3206_v55, %v327_v54  ;;  %v346_v41 = vadd.f32 %v3207_v30, %v328_v2  ;;  %vm352_vm9 = vcmp.eq.s32.totalorder %v4448_v34, %v5830_v56 }
 0x169   : > { %v564_v36 = vadd.f32 %v3257_v59, %v546_v13  ;;  %v3210_v4 = vsel %vm351_vm8, 1.0, %v4169_v14  ;;  %v3211_v39 = vsel %vm352_vm9, 1.0, %v4169_v14  ;;  %vm369_vm10 = vcmp.eq.s32.totalorder %v4269_v3, %v5841_v44 }
 0x16a   : > { %v581_v10 = vadd.f32 %v3260_v25, %v563_v8  ;;  %v363_v23 = vadd.f32 %v3210_v4, %v345_v28  ;;  %v364_v38 = vadd.f32 %v3211_v39, %v346_v41  ;;  %vm370_vm11 = vcmp.eq.s32.totalorder %v4448_v34, %v5841_v44  ;;  %v3812_v25 = vld [vmem:[%s6365_s1 + $0x14] sm:$0xf]  ;;  %v3650_v4 = vld [vmem:[%s6365_s1] sm:$0xf]  ;;  %v3811_v39 = vld [vmem:[%s6365_s1 + $0x4] sm:$0xf0] }
 0x16b   : > { %v582_v20 = vadd.f32 %v3261_v52, %v564_v36  ;;  %v3214_v26 = vsel %vm369_vm10, 1.0, %v4169_v14  ;;  %v3215_v32 = vsel %vm370_vm11, 1.0, %v4169_v14  ;;  %vm387_vm12 = vcmp.eq.s32.totalorder %v4269_v3, %v5850_v50 }
 0x16c   : > { %v381_v56 = vadd.f32 %v3214_v26, %v363_v23  ;;  %v382_v42 = vadd.f32 %v3215_v32, %v364_v38  ;;  %vm388_vm13 = vcmp.eq.s32.totalorder %v4448_v34, %v5850_v50  ;;  %v3218_v22 = vsel %vm387_vm12, 1.0, %v4169_v14  ;;  %v3816_v38 = vld [vmem:[%s6365_s1 + $0x34] sm:$0xf]  ;;  %v3658_v32 = vld [vmem:[%s6365_s1 + $0x10] sm:$0xf] }
 0x16d   : > { %v3856_v24 = vpack.c.bf16 %v582_v20, %v581_v10  ;;  %v3219_v37 = vsel %vm388_vm13, 1.0, %v4169_v14  ;;  %vm405_vm14 = vcmp.eq.s32.totalorder %v4269_v3, %v5853_v15  ;;  %vm406_vm15 = vcmp.eq.s32.totalorder %v4448_v34, %v5853_v15  ;;  %v3676_v20 = vld [vmem:[%s6365_s1 + $0x38] sm:$0xf0] }
 0x16e   : > { %v399_v44 = vadd.f32 %v3218_v22, %v381_v56  ;;  %v400_v18 = vadd.f32 %v3219_v37, %v382_v42  ;;  %v3222_v45 = vsel %vm405_vm14, 1.0, %v4169_v14  ;;  %v3223_v1 = vsel %vm406_vm15, 1.0, %v4169_v14  ;;  %v3813_v56 = vld [vmem:[%s6365_s1 + $0x14] sm:$0xf0]  ;;  %v3818_v22 = vld [vmem:[%s6365_s1 + $0x44] sm:$0xf] }
 0x16f   : > { %3918 = vst [vmem:[#allocation2] sm:$0xff] %v3856_v24   ;;  %vm423_vm1 = vcmp.eq.s32.totalorder %v4269_v3, %v5862_v40  ;;  %vm424_vm2 = vcmp.eq.s32.totalorder %v4448_v34, %v5862_v40  ;;  %vm441_vm3 = vcmp.eq.s32.totalorder %v4269_v3, %v5873_v0  ;;  %vm442_vm4 = vcmp.eq.s32.totalorder %v4448_v34, %v5873_v0  ;;  %v3684_v24 = vld [vmem:[%s6365_s1 + $0x48] sm:$0xf0] }
 0x170   : > { %v417_v50 = vadd.f32 %v3222_v45, %v399_v44  ;;  %v418_v15 = vadd.f32 %v3223_v1, %v400_v18  ;;  %v3226_v60 = vsel %vm423_vm1, 1.0, %v4169_v14  ;;  %v3227_v51 = vsel %vm424_vm2, 1.0, %v4169_v14  ;;  %v3666_v44 = vld [vmem:[%s6365_s1 + $0x20] sm:$0xf]  ;;  %v3815_v18 = vld [vmem:[%s6365_s1 + $0x24] sm:$0xf0] }
 0x171   : > { %v3230_v11 = vsel %vm441_vm3, 1.0, %v4169_v14  ;;  %v3231_v49 = vsel %vm442_vm4, 1.0, %v4169_v14  ;;  %vm459_vm5 = vcmp.eq.s32.totalorder %v4269_v3, %v5878_v62  ;;  %vm460_vm6 = vcmp.eq.s32.totalorder %v4448_v34, %v5878_v62  ;;  %v3698_v1 = vld [vmem:[%s6365_s1 + $0x60] sm:$0xf] }
 0x172   : > { %v435_v40 = vadd.f32 %v3226_v60, %v417_v50  ;;  %v436_v21 = vadd.f32 %v3227_v51, %v418_v15  ;;  %v3234_v0 = vsel %vm459_vm5, 1.0, %v4169_v14  ;;  %v3235_v43 = vsel %vm460_vm6, 1.0, %v4169_v14  ;;  %v3823_v50 = vld [vmem:[%s6365_s1 + $0x64] sm:$0xf0]  ;;  %v3820_v60 = vld [vmem:[%s6365_s1 + $0x54] sm:$0xf] }
 0x173   : > { %vm477_vm7 = vcmp.eq.s32.totalorder %v4269_v3, %v5886_v9  ;;  %vm478_vm8 = vcmp.eq.s32.totalorder %v4448_v34, %v5886_v9  ;;  %vm495_vm9 = vcmp.eq.s32.totalorder %v4269_v3, %v5898_v29  ;;  %vm496_vm10 = vcmp.eq.s32.totalorder %v4448_v34, %v5898_v29  ;;  %v3692_v51 = vld [vmem:[%s6365_s1 + $0x58] sm:$0xf0] }
 0x174   : > { %v453_v12 = vadd.f32 %v3230_v11, %v435_v40  ;;  %v454_v33 = vadd.f32 %v3231_v49, %v436_v21  ;;  %v3238_v62 = vsel %vm477_vm7, 1.0, %v4169_v14  ;;  %v3239_v19 = vsel %vm478_vm8, 1.0, %v4169_v14  ;;  %v3674_v49 = vld [vmem:[%s6365_s1 + $0x30] sm:$0xf]  ;;  %v3817_v40 = vld [vmem:[%s6365_s1 + $0x34] sm:$0xf0] }
 0x175   : > { %vm513_vm11 = vcmp.eq.s32.totalorder %v4269_v3, %v5905_v17  ;;  %vm514_vm12 = vcmp.eq.s32.totalorder %v4448_v34, %v5905_v17  ;;  %v3242_v9 = vsel %vm495_vm9, 1.0, %v4169_v14  ;;  %v3243_v59 = vsel %vm496_vm10, 1.0, %v4169_v14  ;;  %v3660_v17 = vld [vmem:[%s6365_s1 + $0x18] sm:$0xf0] }
 0x176   : > { %v3827_v61 = vld [vmem:[#allocation2] sm:$0xff]  ;;  %v471_v31 = vadd.f32 %v3234_v0, %v453_v12  ;;  %v472_v53 = vadd.f32 %v3235_v43, %v454_v33  ;;  %vm531_vm13 = vcmp.eq.s32.totalorder %v4269_v3, %v5913_v63  ;;  %vm532_vm14 = vcmp.eq.s32.totalorder %v4448_v34, %v5913_v63  ;;  %v3706_v0 = vld [vmem:[%s6365_s1 + $0x70] sm:$0xf]  ;;  %v3825_v43 = vld [vmem:[%s6365_s1 + $0x74] sm:$0xf0] }
 0x177   : > { %2639 = vmatpush.bf16.msra.mxu0 %v3827_v61  ;;  %3937 = vmatpush.bf16.msra.mxu3 %v3827_v61  ;;  %v3246_v57 = vsel %vm513_vm11, 1.0, %v4169_v14  ;;  %v3247_v52 = vsel %vm514_vm12, 1.0, %v4169_v14  ;;  %vm549_vm15 = vcmp.eq.s32.totalorder %v4269_v3, %v5925_v47  ;;  %vm550_vm1 = vcmp.eq.s32.totalorder %v4448_v34, %v5925_v47  ;;  %v3822_v33 = vld [vmem:[%s6365_s1 + $0x64] sm:$0xf]  ;;  %v3682_v61 = vld [vmem:[%s6365_s1 + $0x40] sm:$0xf] }
 0x178   : > { %v489_v29 = vadd.f32 %v3238_v62, %v471_v31  ;;  %v490_v7 = vadd.f32 %v3239_v19, %v472_v53  ;;  %v3250_v63 = vsel %vm531_vm13, 1.0, %v4169_v14  ;;  %v3251_v6 = vsel %vm532_vm14, 1.0, %v4169_v14  ;;  %v3700_v62 = vld [vmem:[%s6365_s1 + $0x68] sm:$0xf0]  ;;  %v3819_v31 = vld [vmem:[%s6365_s1 + $0x44] sm:$0xf0] }
 0x179   : > { %v3663_v46 = vor.u32 %v3812_v25, %v3660_v17  ;;  %vm567_vm2 = vcmp.eq.s32.totalorder %v4269_v3, %v5932_v58  ;;  %vm568_vm3 = vcmp.eq.s32.totalorder %v4448_v34, %v5932_v58  ;;  %v3254_v27 = vsel %vm549_vm15, 1.0, %v4169_v14  ;;  %v3814_v34 = vld [vmem:[%s6365_s1 + $0x24] sm:$0xf]  ;;  %v3668_v58 = vld [vmem:[%s6365_s1 + $0x28] sm:$0xf0] }
 0x17a   : > { %v507_v5 = vadd.f32 %v3242_v9, %v489_v29  ;;  %v508_v16 = vadd.f32 %v3243_v59, %v490_v7  ;;  %v3255_v54 = vsel %vm550_vm1, 1.0, %v4169_v14  ;;  %v3258_v13 = vsel %vm567_vm2, 1.0, %v4169_v14  ;;  %v3824_v9 = vld [vmem:[%s6365_s1 + $0x74] sm:$0xf]  ;;  %v3708_v59 = vld [vmem:[%s6365_s1 + $0x78] sm:$0xf0] }
 0x17b   : > { %3769 = vmatmul.msk.bf16.gmra.mxu1 %vm2608_vm0, %v3663_v46  ;;  %v3259_v55 = vsel %vm568_vm3, 1.0, %v4169_v14  ;;  %v3671_v36 = vor.u32 %v3814_v34, %v3668_v58  ;;  %v3651_v23 = vor.u32 %v3811_v39, %v3650_v4  ;;  %v3679_v26 = vor.u32 %v3816_v38, %v3676_v20  ;;  %v3690_v7 = vld [vmem:[%s6365_s1 + $0x50] sm:$0xf]  ;;  %v3821_v25 = vld [vmem:[%s6365_s1 + $0x54] sm:$0xf0] }
 0x17c   : > { %v525_v48 = vadd.f32 %v3246_v57, %v507_v5  ;;  %v526_v35 = vadd.f32 %v3247_v52, %v508_v16  ;;  %v3659_v42 = vor.u32 %v3813_v56, %v3658_v32  ;;  %v3687_v37 = vor.u32 %v3818_v22, %v3684_v24  ;;  %v2391_v52 = vld [vmem:[%s4271_s19] sm:$0xff]  ;;  %v2392_v5 = vld [vmem:[%s4271_s19 + $0x8] sm:$0xff] }
 0x17d   : > { %v3667_v45 = vor.u32 %v3815_v18, %v3666_v44  ;;  %v3699_v15 = vor.u32 %v3823_v50, %v3698_v1  ;;  %v3695_v11 = vor.u32 %v3820_v60, %v3692_v51  ;;  %v3675_v21 = vor.u32 %v3817_v40, %v3674_v49 }
 0x17e   : > { %v543_v47 = vadd.f32 %v3250_v63, %v525_v48  ;;  %v544_v2 = vadd.f32 %v3251_v6, %v526_v35  ;;  %v3707_v12 = vor.u32 %v3825_v43, %v3706_v0  ;;  %v3703_v19 = vor.u32 %v3822_v33, %v3700_v62 }
 0x17f   : > { %v3683_v53 = vor.u32 %v3819_v31, %v3682_v61  ;;  %v3711_v29 = vor.u32 %v3824_v9, %v3708_v59  ;;  %v3691_v17 = vor.u32 %v3821_v25, %v3690_v7  ;;  %vm2393_vm4 = vcmp.ge.s32.totalorder %v2391_v52, 0  ;;  %v2773_v61 = vld [vmem:[%s6367_s3 + $0x10] sm:$0xff]  ;;  %v2774_v7 = vld [vmem:[%s6367_s3 + $0x18] sm:$0xff] }
 0x180   : > { %v561_v30 = vadd.f32 %v3254_v27, %v543_v47  ;;  %v562_v8 = vadd.f32 %v3255_v54, %v544_v2  ;;  %vm2394_vm5 = vcmp.ge.s32.totalorder %v2392_v5, 0  ;;  %v3646_v16 = vsel %vm2393_vm4, 1.0, %v4169_v14  ;;  %v2777_v52 = vld [vmem:[%s6367_s3 + $0x30] sm:$0xff]  ;;  %v2778_v5 = vld [vmem:[%s6367_s3 + $0x38] sm:$0xff] }
 0x181   : > { %v3647_v63 = vsel %vm2394_vm5, 1.0, %v4169_v14  ;;  %v4170_v31 = vmov 0  }
 0x182   : > { %v579_v28 = vadd.f32 %v3258_v13, %v561_v30  ;;  %v580_v41 = vadd.f32 %v3259_v55, %v562_v8  ;;  %v2399_v46 = vadd.f32 %v3647_v63, %v3646_v16  ;;  %3988 = vset.pattern.permute.xlu0 %v4170_v31  ;;  %3989 = vset.pattern.permute.xlu1 %v4170_v31  ;;  %v2775_v63 = vld [vmem:[%s6367_s3 + $0x20] sm:$0xff] }
 0x183   : > { %2799 = vperm.xlu1 %3989, %v2773_v61   ;;  %3990 = vset.pattern.permute.xlu2 %v4170_v31  ;;  %v2995_v61 = vld [vmem:[%s6368_s4 + $0x78] sm:$0xff]  ;;  %v2990_v31 = vld [vmem:[%s6368_s4 + $0x50] sm:$0xff] }
 0x184   : > { %v3851_v3 = vpack.c.bf16 %v580_v41, %v579_v28  ;;  %v2400_v48 = vrot.slane %v2399_v46, 4  ;;  %2809 = vperm.xlu2 %3990, %v2775_v63  }
 0x186   : > { %3852 = vst [vmem:[#allocation2 + $0x30] sm:$0xff] %v3851_v3   ;;  %v2401_v35 = vadd.f32 %v2400_v48, %v2399_v46  ;;  %v2780_v48 = vld [vmem:[%s6367_s3 + $0x48] sm:$0xff] }
 0x188   : > { %v2402_v54 = vrot.slane %v2401_v35, 2 }
 0x18a   : > { %v2403_v47 = vadd.f32 %v2402_v54, %v2401_v35  ;;  %v2781_v35 = vld [vmem:[%s6367_s3 + $0x50] sm:$0xff] }
 0x18b   : > { %3770 = vmatmul.msk.bf16.gmra.mxu1 %vm2608_vm0, %v3671_v36  ;;  %2804 = vperm.xlu1 %3989, %v2774_v7   ;;  %v3845_v7 = vld [vmem:[%s6366_s2 + $0x28] sm:$0xff] }
 0x18c   : > { %v2404_v13 = vrot.slane %v2403_v47, 1 }
 0x18d   : > { %v3826_v10 = vld [vmem:[#allocation2 + $0x30] sm:$0xff] }
 0x18e   : > { %2640 = vmatpush.bf16.msra.mxu0 %v3826_v10  ;;  %3938 = vmatpush.bf16.msra.mxu3 %v3826_v10  ;;  %v2405_v55 = vadd.f32 %v2404_v13, %v2403_v47 }
 0x190   : > { %v2406_v8 = vmax.f32 %v2405_v55, 1.0 }
 0x191   : > { %2641 = vmatmul.bf16.vlgmr.msra.gmra.mxu0 %v3651_v23  ;;  %2671 = vmatmul.bf16.vlgmr.msra.gmra.mxu3 %v3699_v15 }
 0x192   : > { %4103 = vrcp.f32 %v2406_v8 }
 0x193   : > { %2824 = vperm.xlu1 %3989, %v2778_v5  }
 0x198   : > { %v6157_v34 = vpop.eup %4103 }
 0x19b   : > { %3771 = vmatmul.msk.bf16.gmra.mxu1 %vm2608_vm0, %v3679_v26  ;;  %2839 = vperm.xlu1 %3989, %v2781_v35  }
 0x1a1   : > { %2646 = vmatmul.bf16.gmra.mxu0 %v3659_v42  ;;  %2676 = vmatmul.bf16.gmra.mxu3 %v3707_v12 }
 0x1ab   : > { %3772 = vmatmul.msk.bf16.gmra.mxu1 %vm2608_vm0, %v3687_v37 }
 0x1b1   : > { %2651 = vmatmul.bf16.gmra.mxu0 %v3667_v45 }
 0x1bb   : > { %3773 = vmatmul.msk.bf16.gmra.mxu1 %vm2608_vm0, %v3695_v11 }
 0x1c1   : > { %2656 = vmatmul.bf16.gmra.mxu0 %v3675_v21 }
 0x1cb   : > { %3774 = vmatmul.msk.bf16.gmra.mxu1 %vm2608_vm0, %v3703_v19  ;;  %v2771_v19 = vld [vmem:[%s6367_s3] sm:$0xff] }
 0x1cc   : > { %2789 = vperm.xlu0 %3988, %v2771_v19   ;;  %v2994_v19 = vld [vmem:[%s6368_s4 + $0x70] sm:$0xff] }
 0x1d1   : > { %2661 = vmatmul.bf16.gmra.mxu0 %v3683_v53 }
 0x1db   : > { %3775 = vmatmul.msk.bf16.gmra.mxu1 %vm2608_vm0, %v3711_v29  ;;  %v2772_v29 = vld [vmem:[%s6367_s3 + $0x8] sm:$0xff] }
 0x1dc   : > { %2794 = vperm.xlu0 %3988, %v2772_v29   ;;  %v3844_v29 = vld [vmem:[%s6366_s2 + $0x20] sm:$0xff] }
 0x1df   : > { %v2691_v57 = vpop.f32.mrf.mxu1 }
 0x1e1   : > { %2666 = vmatmul.bf16.gmra.mxu0 %v3691_v17 }
 0x1e4   : > { %2819 = vperm.xlu0 %3988, %v2777_v52   ;;  %v2810_v52 = vpop.permute.xlu2 %2809 }
 0x1e7   : > { %v2693_v6 = vpop.f32.mrf.mxu1 }
 0x1ec   : > { %2834 = vperm.xlu0 %3988, %v2780_v48  }
 0x1f8   : > { %v2696_v27 = vpop.f32.mrf.mxu1 }
 0x200   : > { %v2698_v2 = vpop.f32.mrf.mxu1 }
 0x208   : > { %v2701_v30 = vpop.f32.mrf.mxu1 }
 0x20e   : > { %v2642_v28 = vpop.f32.mrf.mxu0 }
 0x20f   : > { %v2692_v41 = vadd.f32 %v2691_v57, %v2642_v28 }
 0x210   : > { %v2703_v3 = vpop.f32.mrf.mxu1 }
 0x211   : > { %v2731_v36 = vmul.f32 %v6157_v34, %v2692_v41 }
 0x214   : > { %v2672_v40 = vpop.f32.mrf.mxu3 }
 0x216   : > { %v2644_v58 = vpop.f32.mrf.mxu0 }
 0x217   : > { %v2694_v14 = vadd.f32 %v2693_v6, %v2644_v58  ;;  %v2776_v58 = vld [vmem:[%s6367_s3 + $0x28] sm:$0xff] }
 0x218   : > { %v2706_v39 = vpop.f32.mrf.mxu1  ;;  %2814 = vperm.xlu2 %3990, %v2776_v58  }
 0x219   : > { %v2732_v4 = vmul.f32 %v6157_v34, %v2694_v14 }
 0x21b   : > { %v6161_v10 = vpack.c.bf16 %v2732_v4, %v2731_v36  ;;  %v2783_v4 = vld [vmem:[%s6367_s3 + $0x60] sm:$0xff] }
 0x21c   : > { %v2674_v9 = vpop.f32.mrf.mxu3  ;;  %2849 = vperm.xlu0 %3988, %v2783_v4  }
 0x21e   : > { %v2647_v23 = vpop.f32.mrf.mxu0 }
 0x21f   : > { %v2697_v38 = vadd.f32 %v2696_v27, %v2647_v23 }
 0x220   : > { %v2708_v20 = vpop.f32.mrf.mxu1 }
 0x221   : > { %v2733_v56 = vmul.f32 %v6157_v34, %v2697_v38 }
 0x224   : > { %v2677_v57 = vpop.f32.mrf.mxu3 }
 0x226   : > { %v2649_v26 = vpop.f32.mrf.mxu0 }
 0x227   : > { %v2699_v32 = vadd.f32 %v2698_v2, %v2649_v26 }
 0x228   : > { %v6165_v22 = vpop.f32.mrf.mxu1 }
 0x229   : > { %v2734_v42 = vmul.f32 %v6157_v34, %v2699_v32 }
 0x22b   : > { %v6167_v24 = vpack.c.bf16 %v2734_v42, %v2733_v56 }
 0x22c   : > { %v2679_v27 = vpop.f32.mrf.mxu3 }
 0x22e   : > { %v2652_v37 = vpop.f32.mrf.mxu0 }
 0x22f   : > { %v2702_v44 = vadd.f32 %v2701_v30, %v2652_v37  ;;  %v2779_v37 = vld [vmem:[%s6367_s3 + $0x40] sm:$0xff] }
 0x230   : > { %v6169_v18 = vpop.f32.mrf.mxu1  ;;  %2829 = vperm.xlu2 %3990, %v2779_v37  }
 0x231   : > { %v2735_v50 = vmul.f32 %v6157_v34, %v2702_v44 }
 0x236   : > { %v2654_v45 = vpop.f32.mrf.mxu0 }
 0x237   : > { %v2704_v1 = vadd.f32 %v2703_v3, %v2654_v45 }
 0x238   : > { %v2716_v60 = vpop.f32.mrf.mxu1 }
 0x239   : > { %v2736_v15 = vmul.f32 %v6157_v34, %v2704_v1  ;;  %v2982_v1 = vld [vmem:[%s6368_s4 + $0x10] sm:$0xff] }
 0x23b   : > { %v6173_v51 = vpack.c.bf16 %v2736_v15, %v2735_v50  ;;  %v2983_v50 = vld [vmem:[%s6368_s4 + $0x18] sm:$0xff]  ;;  %v2785_v15 = vld [vmem:[%s6367_s3 + $0x70] sm:$0xff] }
 0x23e   : > { %v2657_v11 = vpop.f32.mrf.mxu0 }
 0x23f   : > { %v2707_v21 = vadd.f32 %v2706_v39, %v2657_v11  ;;  %v2784_v39 = vld [vmem:[%s6367_s3 + $0x68] sm:$0xff]  ;;  %v2986_v11 = vld [vmem:[%s6368_s4 + $0x30] sm:$0xff] }
 0x240   : > { %v2718_v49 = vpop.f32.mrf.mxu1  ;;  %2854 = vperm.xlu1 %3989, %v2784_v39  }
 0x241   : > { %v2737_v12 = vmul.f32 %v6157_v34, %v2707_v21  ;;  %v2989_v21 = vld [vmem:[%s6368_s4 + $0x48] sm:$0xff] }
 0x246   : > { %v2659_v0 = vpop.f32.mrf.mxu0 }
 0x247   : > { %v2709_v43 = vadd.f32 %v2708_v20, %v2659_v0  ;;  %v2991_v0 = vld [vmem:[%s6368_s4 + $0x58] sm:$0xff] }
 0x248   : > { %v2721_v62 = vpop.f32.mrf.mxu1 }
 0x249   : > { %v2738_v33 = vmul.f32 %v6157_v34, %v2709_v43  ;;  %v2722_v13 = vadd.f32 %v2721_v62, %v2672_v40  ;;  %v2988_v40 = vld [vmem:[%s6368_s4 + $0x40] sm:$0xff]  ;;  %v2987_v62 = vld [vmem:[%s6368_s4 + $0x38] sm:$0xff] }
 0x24a   : > { %v2992_v43 = vld [vmem:[%s6368_s4 + $0x60] sm:$0xff] }
 0x24b   : > { %v6183_v53 = vpack.c.bf16 %v2738_v33, %v2737_v12  ;;  %v2743_v36 = vmul.f32 %v6157_v34, %v2722_v13  ;;  %v3841_v12 = vld [vmem:[%s6366_s2 + $0x8] sm:$0xff]  ;;  %v3847_v33 = vld [vmem:[%s6366_s2 + $0x38] sm:$0xff] }
 0x24e   : > { %v2662_v59 = vpop.f32.mrf.mxu0 }
 0x24f   : > { %v2712_v26 = vadd.f32 %v6165_v22, %v2662_v59  ;;  %v2980_v22 = vld [vmem:[%s6368_s4] sm:$0xff]  ;;  %v3843_v59 = vld [vmem:[%s6366_s2 + $0x18] sm:$0xff] }
 0x250   : > { %v2723_v25 = vpop.f32.mrf.mxu1  ;;  %2998 = vperm.xlu1 %3989, %v2980_v22  }
 0x251   : > { %v2724_v47 = vadd.f32 %v2723_v25, %v2674_v9  ;;  %v2739_v44 = vmul.f32 %v6157_v34, %v2712_v26  ;;  %v2993_v9 = vld [vmem:[%s6368_s4 + $0x68] sm:$0xff]  ;;  %v2790_v25 = vpop.permute.xlu0 %2789 }
 0x253   : > { %v2744_v28 = vmul.f32 %v6157_v34, %v2724_v47 }
 0x255   : > { %v2769_v20 = vpack.c.bf16 %v2744_v28, %v2743_v36 }
 0x256   : > { %v2664_v17 = vpop.f32.mrf.mxu0 }
 0x257   : > { %v2714_v23 = vadd.f32 %v6169_v18, %v2664_v17  ;;  %v2786_v18 = vld [vmem:[%s6367_s3 + $0x78] sm:$0xff]  ;;  %v2800_v17 = vpop.permute.xlu1 %2799 }
 0x258   : > { %v2726_v16 = vpop.f32.mrf.mxu1  ;;  %2864 = vperm.xlu0 %3988, %v2786_v18   ;;  %3013 = vperm.xlu1 %3989, %v2983_v50  }
 0x259   : > { %v2727_v46 = vadd.f32 %v2726_v16, %v2677_v57  ;;  %v2740_v56 = vmul.f32 %v6157_v34, %v2714_v23  ;;  %v2795_v5 = vpop.permute.xlu0 %2794 }
 0x25b   : > { %v2745_v55 = vmul.f32 %v6157_v34, %v2727_v46  ;;  %v2767_v45 = vpack.c.bf16 %v2740_v56, %v2739_v44 }
 0x25e   : > { %v2667_v6 = vpop.f32.mrf.mxu0 }
 0x25f   : > { %v2717_v14 = vadd.f32 %v2716_v60, %v2667_v6  ;;  %v2985_v60 = vld [vmem:[%s6368_s4 + $0x28] sm:$0xff]  ;;  %v2805_v63 = vpop.permute.xlu1 %2804 }
 0x260   : > { %v2728_v54 = vpop.f32.mrf.mxu1  ;;  %3008 = vperm.xlu0 %3988, %v2982_v1   ;;  %3028 = vperm.xlu1 %3989, %v2986_v11  }
 0x261   : > { %v2729_v2 = vadd.f32 %v2728_v54, %v2679_v27  ;;  %v2741_v32 = vmul.f32 %v6157_v34, %v2717_v14  ;;  %v2820_v48 = vpop.permute.xlu0 %2819 }
 0x263   : > { %v2746_v30 = vmul.f32 %v6157_v34, %v2729_v2 }
 0x265   : > { %v2770_v41 = vpack.c.bf16 %v2746_v30, %v2745_v55 }
 0x266   : > { %v2669_v8 = vpop.f32.mrf.mxu0 }
 0x267   : > { %v2719_v3 = vadd.f32 %v2718_v49, %v2669_v8  ;;  %2915 = vmatpush.bf16.msra.mxu2 %v2770_v41  ;;  %3939 = vmatpush.bf16.msrb.mxu3 %v2770_v41  ;;  %v3846_v49 = vld [vmem:[%s6366_s2 + $0x30] sm:$0xff]  ;;  %v2825_v35 = vpop.permute.xlu1 %2824 }
 0x268   : > { %3023 = vperm.xlu0 %3988, %v2985_v60   ;;  %3043 = vperm.xlu1 %3989, %v2989_v21  }
 0x269   : > { %v2742_v38 = vmul.f32 %v6157_v34, %v2719_v3  ;;  %v2782_v34 = vld [vmem:[%s6367_s3 + $0x58] sm:$0xff]  ;;  %v2835_v47 = vpop.permute.xlu0 %2834 }
 0x26a   : > { %2844 = vperm.xlu2 %3990, %v2782_v34  }
 0x26b   : > { %2916 = vmatpush.bf16.msra.mxu2 %v2769_v20  ;;  %3940 = vmatpush.bf16.msrb.mxu3 %v2769_v20  ;;  %v2768_v42 = vpack.c.bf16 %v2742_v38, %v2741_v32 }
 0x26f   : > { %2917 = vmatpush.bf16.msra.mxu2 %v2768_v42  ;;  %3941 = vmatpush.bf16.msrb.mxu3 %v2768_v42  ;;  %v2840_v2 = vpop.permute.xlu1 %2839 }
 0x270   : > { %3038 = vperm.xlu0 %3988, %v2988_v40   ;;  %3058 = vperm.xlu1 %3989, %v2992_v43  }
 0x272   : > { %2859 = vperm.xlu2 %3990, %v2785_v15   ;;  %v2815_v6 = vpop.permute.xlu2 %2814 }
 0x273   : > { %2918 = vmatpush.bf16.msra.mxu2 %v2767_v45  ;;  %3942 = vmatpush.bf16.msrb.mxu3 %v2767_v45 }
 0x277   : > { %2919 = vmatpush.bf16.msra.mxu2 %v6183_v53  ;;  %3943 = vmatpush.bf16.msrb.mxu3 %v6183_v53  ;;  %v3842_v53 = vld [vmem:[%s6366_s2 + $0x10] sm:$0xff] }
 0x278   : > { %3053 = vperm.xlu0 %3988, %v2991_v0   ;;  %3073 = vperm.xlu1 %3989, %v2995_v61  }
 0x27b   : > { %2920 = vmatpush.bf16.msra.mxu2 %v6173_v51  ;;  %3944 = vmatpush.bf16.msrb.mxu3 %v6173_v51  ;;  %v3840_v51 = vld [vmem:[%s6366_s2] sm:$0xff] }
 0x27f   : > { %2921 = vmatpush.bf16.msra.mxu2 %v6167_v24  ;;  %3945 = vmatpush.bf16.msrb.mxu3 %v6167_v24  ;;  %v2981_v24 = vld [vmem:[%s6368_s4 + $0x8] sm:$0xff] }
 0x280   : > { %3003 = vperm.xlu2 %3990, %v2981_v24   ;;  %3068 = vperm.xlu0 %3988, %v2994_v19  }
 0x283   : > { %2922 = vmatpush.bf16.msra.mxu2 %v6161_v10  ;;  %3946 = vmatpush.bf16.msrb.mxu3 %v6161_v10  ;;  %v2984_v10 = vld [vmem:[%s6368_s4 + $0x20] sm:$0xff] }
 0x286   : > { %2923 = vmatmul.bf16.vlgmr.msra.gmra.mxu2 %v3840_v51  ;;  %2953 = vmatmul.bf16.vlgmr.msrb.gmra.mxu3 %v3846_v49 }
 0x288   : > { %3018 = vperm.xlu2 %3990, %v2984_v10  }
 0x28a   : > { %v2830_v27 = vpop.permute.xlu2 %2829 }
 0x28e   : > { %v2850_v30 = vpop.permute.xlu0 %2849 }
 0x290   : > { %3033 = vperm.xlu2 %3990, %v2987_v62  }
 0x296   : > { %2928 = vmatmul.bf16.gmra.mxu2 %v3841_v12  ;;  %2958 = vmatmul.bf16.gmra.mxu3 %v3847_v33 }
 0x298   : > { %3048 = vperm.xlu2 %3990, %v2990_v31  }
 0x2a0   : > { %3063 = vperm.xlu2 %3990, %v2993_v9  }
 0x2a6   : > { %2933 = vmatmul.bf16.gmra.mxu2 %v3842_v53 }
 0x2b2   : > { %v6319_v8 = vpop.permute.xlu1 %2854 }
 0x2b6   : > { %2938 = vmatmul.bf16.gmra.mxu2 %v3843_v59 }
 0x2c2   : > { %v2999_v14 = vpop.permute.xlu1 %2998 }
 0x2c4   : > { %v6317_v55 = vpop.permute.xlu2 %2844 }
 0x2c6   : > { %2943 = vmatmul.bf16.gmra.mxu2 %v3844_v29 }
 0x2ca   : > { %v6323_v3 = vpop.permute.xlu0 %2864  ;;  %v3014_v23 = vpop.permute.xlu1 %3013 }
 0x2cc   : > { %v6321_v41 = vpop.permute.xlu2 %2859 }
 0x2d2   : > { %v3009_v39 = vpop.permute.xlu0 %3008  ;;  %v3029_v22 = vpop.permute.xlu1 %3028 }
 0x2d6   : > { %2948 = vmatmul.bf16.gmra.mxu2 %v3845_v7 }
 0x2da   : > { %v3004_v36 = vpop.permute.xlu2 %3003  ;;  %v3024_v18 = vpop.permute.xlu0 %3023 }
 0x2db   : > { %v3044_v9 = vpop.permute.xlu1 %3043 }
 0x2e2   : > { %v3019_v26 = vpop.permute.xlu2 %3018  ;;  %v3039_v53 = vpop.permute.xlu0 %3038 }
 0x2ea   : > { %v3034_v10 = vpop.permute.xlu2 %3033 }
 0x309   : > { %v2924_v57 = vpop.f32.mrf.mxu2  ;;  %v2954_v38 = vpop.f32.mrf.mxu3 }
 0x30a   : > { %v2925_v56 = vadd.f32 %v2924_v57, %v2790_v25 }
 0x30c   : > { %v2964_v45 = vmax.f32 %v2925_v56, 0.0 }
 0x30e   : > { %v3076_v49 = vmul.f32 %v2999_v14, %v2964_v45 }
 0x311   : > { %v2926_v16 = vpop.f32.mrf.mxu2  ;;  %v2956_v50 = vpop.f32.mrf.mxu3 }
 0x312   : > { %v2927_v20 = vadd.f32 %v2926_v16, %v2795_v5 }
 0x314   : > { %v2965_v37 = vmax.f32 %v2927_v20, 0.0 }
 0x316   : > { %v3077_v15 = vmul.f32 %v3004_v36, %v2965_v37  ;;  %v3054_v36 = vpop.permute.xlu0 %3053 }
 0x318   : > { %v3092_v0 = vadd.f32 %v3077_v15, %v3076_v49 }
 0x319   : > { %v2929_v46 = vpop.f32.mrf.mxu2 }
 0x31a   : > { %v2930_v42 = vadd.f32 %v2929_v46, %v2800_v17  ;;  %v2959_v17 = vpop.f32.mrf.mxu3 }
 0x31b   : > { %v2960_v56 = vadd.f32 %v2959_v17, %v6321_v41 }
 0x31c   : > { %v2966_v34 = vmax.f32 %v2930_v42, 0.0 }
 0x31e   : > { %v3078_v24 = vmul.f32 %v3009_v39, %v2966_v34  ;;  %v2978_v34 = vmax.f32 %v2960_v56, 0.0  ;;  %v3069_v15 = vpop.permute.xlu0 %3068 }
 0x320   : > { %v3093_v62 = vadd.f32 %v3092_v0, %v3078_v24 }
 0x321   : > { %v2931_v54 = vpop.f32.mrf.mxu2 }
 0x322   : > { %v2932_v44 = vadd.f32 %v2931_v54, %v2805_v63 }
 0x324   : > { %v2967_v60 = vmax.f32 %v2932_v44, 0.0 }
 0x326   : > { %v3079_v43 = vmul.f32 %v3014_v23, %v2967_v60  ;;  %v3090_v60 = vmul.f32 %v3069_v15, %v2978_v34 }
 0x328   : > { %v3094_v59 = vadd.f32 %v3093_v62, %v3079_v43  ;;  %v3114_v43 = vstv %s3113_s16 }
 0x329   : > { %v2934_v13 = vpop.f32.mrf.mxu2 }
 0x32a   : > { %v2935_v1 = vadd.f32 %v2934_v13, %v2810_v52 }
 0x32c   : > { %v2968_v40 = vmax.f32 %v2935_v1, 0.0 }
 0x32e   : > { %v3080_v19 = vmul.f32 %v3019_v26, %v2968_v40  ;;  %v3059_v26 = vpop.permute.xlu1 %3058 }
 0x330   : > { %v3095_v52 = vadd.f32 %v3094_v59, %v3080_v19 }
 0x331   : > { %v2936_v28 = vpop.f32.mrf.mxu2 }
 0x332   : > { %v2937_v11 = vadd.f32 %v2936_v28, %v2815_v6 }
 0x334   : > { %v2969_v12 = vmax.f32 %v2937_v11, 0.0 }
 0x336   : > { %v3081_v29 = vmul.f32 %v3024_v18, %v2969_v12  ;;  %v3074_v41 = vpop.permute.xlu1 %3073 }
 0x338   : > { %v3096_v6 = vadd.f32 %v3095_v52, %v3081_v29 }
 0x339   : > { %v2939_v58 = vpop.f32.mrf.mxu2 }
 0x33a   : > { %v2940_v21 = vadd.f32 %v2939_v58, %v2820_v48 }
 0x33c   : > { %v2970_v61 = vmax.f32 %v2940_v21, 0.0 }
 0x33e   : > { %v3082_v5 = vmul.f32 %v3029_v22, %v2970_v61 }
 0x340   : > { %v3097_v54 = vadd.f32 %v3096_v6, %v3082_v5 }
 0x341   : > { %v2941_v4 = vpop.f32.mrf.mxu2 }
 0x342   : > { %v2942_v33 = vadd.f32 %v2941_v4, %v2825_v35  ;;  %v3049_v35 = vpop.permute.xlu2 %3048 }
 0x344   : > { %v2971_v7 = vmax.f32 %v2942_v33, 0.0 }
 0x346   : > { %v3083_v46 = vmul.f32 %v3034_v10, %v2971_v7 }
 0x348   : > { %v3098_v58 = vadd.f32 %v3097_v54, %v3083_v46 }
 0x349   : > { %v2944_v32 = vpop.f32.mrf.mxu2 }
 0x34a   : > { %v2945_v31 = vadd.f32 %v2944_v32, %v2830_v27  ;;  %v2955_v27 = vadd.f32 %v2954_v38, %v2850_v30  ;;  %v3064_v22 = vpop.permute.xlu2 %3063 }
 0x34c   : > { %v2972_v16 = vmax.f32 %v2945_v31, 0.0  ;;  %v2976_v32 = vmax.f32 %v2955_v27, 0.0 }
 0x34e   : > { %v3084_v13 = vmul.f32 %v3039_v53, %v2972_v16  ;;  %v3088_v45 = vmul.f32 %v3059_v26, %v2976_v32 }
 0x350   : > { %v3099_v39 = vadd.f32 %v3098_v58, %v3084_v13 }
 0x351   : > { %v2946_v51 = vpop.f32.mrf.mxu2 }
 0x352   : > { %v2947_v25 = vadd.f32 %v2946_v51, %v2835_v47  ;;  %v2957_v47 = vadd.f32 %v2956_v50, %v6319_v8 }
 0x354   : > { %v2973_v48 = vmax.f32 %v2947_v25, 0.0  ;;  %v2977_v44 = vmax.f32 %v2957_v47, 0.0 }
 0x356   : > { %v3085_v14 = vmul.f32 %v3044_v9, %v2973_v48  ;;  %v3089_v1 = vmul.f32 %v3064_v22, %v2977_v44 }
 0x358   : > { %v3100_v42 = vadd.f32 %v3099_v39, %v3085_v14 }
 0x359   : > { %v2949_v57 = vpop.f32.mrf.mxu2 }
 0x35a   : > { %v2950_v63 = vadd.f32 %v2949_v57, %v2840_v2  ;;  %v2961_v2 = vpop.f32.mrf.mxu3 }
 0x35b   : > { %v2962_v30 = vadd.f32 %v2961_v2, %v6323_v3 }
 0x35c   : > { %v2974_v28 = vmax.f32 %v2950_v63, 0.0 }
 0x35d   : > { %v2979_v50 = vmax.f32 %v2962_v30, 0.0 }
 0x35e   : > { %v3086_v23 = vmul.f32 %v3049_v35, %v2974_v28 }
 0x35f   : > { %v3091_v51 = vmul.f32 %v3074_v41, %v2979_v50 }
 0x360   : > { %v3101_v38 = vadd.f32 %v3100_v42, %v3086_v23 }
 0x361   : > { %v2951_v4 = vpop.f32.mrf.mxu2 }
 0x362   : > { %v2952_v20 = vadd.f32 %v2951_v4, %v6317_v55 }
 0x364   : > { %v2975_v37 = vmax.f32 %v2952_v20, 0.0 }
 0x366   : > { %v3087_v18 = vmul.f32 %v3054_v36, %v2975_v37 }
 0x368   : > { %v3102_v8 = vadd.f32 %v3101_v38, %v3087_v18 }
 0x36a   : > { %v3103_v55 = vadd.f32 %v3102_v8, %v3088_v45 }
 0x36c   : > { %v3104_v11 = vadd.f32 %v3103_v55, %v3089_v1 }
 0x36e   : > { %v3105_v49 = vadd.f32 %v3104_v11, %v3090_v60 }
 0x370   : > { %v3106_v24 = vadd.f32 %v3105_v49, %v3091_v51 }
 0x372   : > { %v3107_v40 = vrot.slane %v3106_v24, 4 }
 0x374   : > { %v3108_v3 = vadd.f32 %v3107_v40, %v3106_v24 }
 0x376   : > { %v3109_v21 = vrot.slane %v3108_v3, 2 }
 0x378   : > { %v3110_v10 = vadd.f32 %v3109_v21, %v3108_v3 }
 0x37a   : > { %v3111_v0 = vrot.slane %v3110_v10, 1 }
 0x37c   : > { %v3112_v12 = vadd.f32 %v3111_v0, %v3110_v10 }
 0x37e   : > { %v3115_v33 = vadd.f32 %v3114_v43, %v3112_v12 }
 0x380   : > { %3116 = vst [vmem:[%s288_s22] sm:$0x1] %v3115_v33 }
 0x381   : > { %4132 = shalt.err (!%p4129_p5)
}
 0x382   : > { %3947 = dma.vmem_to_hbm [thread:$0]  (%p4247_p6), %s3129_s27, 16, %s3131_s29, %s3118_s30  }
 0x383 PF: > { %s3142_s17 = sand.u32 1, %s4155_s23   ;;  %p3950_p7 = pnand %p3193_p9, %p4251_p8 }
 0x384   : > { %s3143_s15 = scalar_lea.sflag [#allocation6], %s3142_s17 }
 0x385   : > { %p3951_p10 = pneg %p3950_p7 }
 0x387   : > { %4150 = dma.done.wait (%p3951_p10), %s3143_s15, 16  }
 0x388   : > { %4152 = vsyncadd (%p3951_p10), %s3143_s15, 4294967280  ;;  %p17_p11 = scmp.ge.s32.totalorder %s4232_s28, 4   ;;  %s6373_s23 = smov %s4159_s24 }
 0x389   : > { %s6374_s24 = smov %s4163_s25  ;;  %s6375_s25 = smov %s4245_s7 }
 0x38a   : > { %s6376_s26 = smov %s4232_s28  ;;  %19 = sbr.rel (!%p17_p11) target bundleno = 5 (0x5), region = 122 }
 0x38f   :  { %3148 = vsyncpa [#allocation6], 1 }
 0x390   :  { %3150 = vsyncpa [#allocation6 + $0x1], 1 }

</bundles_post_ra>
